<compile_context>
chip_gen: v7x
topology: tpu7x:2x2x1
jax: 0.10.0
libtpu: 0.0.40
codegen_flags: <defaults>
</compile_context>

<pallas_src>
import math
import functools

import jax
import jax.numpy as jnp
from jax import lax
from jax.experimental import pallas as pl


# ----------------------------------------------------------------------------
# In-kernel helpers (traced Python, fully unrolled at these tiny sizes)
# ----------------------------------------------------------------------------

def _f32_iota(shape, dim):
    # 2-D iota (TPU requires >=2D); converted to f32 so all block-index math
    # uses float ops (avoids any reliance on vector integer div/mod lowering).
    return lax.broadcasted_iota(jnp.int32, shape, dim).astype(jnp.float32)


def _blk(idx_f32, size):
    # floor(idx / size) for small non-negative integer-valued f32 (exact here;
    # the +0.5 keeps it away from representability boundaries).
    return jnp.floor((idx_f32 + 0.5) * (1.0 / float(size)))


def _mha(q, k, v, wo, bo, *, batch, lq, lk, nhead, hd):
    """Multi-head attention fused over batch and heads (block-diagonal form).

    q: (batch*lq, D)   k, v: (batch*lk, D)   wo: (D, D)   bo: (1, D)

    Row block h of the tiled Q keeps only head-h lanes, so a single score
    matmul against the un-tiled K yields every head's scores; an additive
    cross-batch mask keeps attention within each batch.  One softmax, one
    P@V matmul, mask+sum of the H sublane blocks, then wo applied once.
    """
    D = nhead * hd
    rows = nhead * batch * lq
    cols = batch * lk
    scale = 1.0 / math.sqrt(hd)

    # head mask over the head-tiled rows: row block h keeps only head-h lanes
    row_head = _blk(_f32_iota((rows, D), 0), batch * lq)
    lane_head = _blk(_f32_iota((rows, D), 1), hd)
    head_mask = row_head == lane_head

    q_bd = jnp.where(head_mask, jnp.concatenate([q * scale] * nhead, axis=0), 0.0)

    # scores for every (head, batch, q) row against every (batch, k) column
    s = lax.dot_general(q_bd, k, (((1,), (1,)), ((), ())),
                        preferred_element_type=jnp.float32)          # (rows, cols)

    # cross-batch positions get a large negative bias (softmax -> 0)
    r = _f32_iota((rows, cols), 0)
    row_b = _blk(r, lq) - float(batch) * _blk(r, batch * lq)          # (r//lq) % batch
    col_b = _blk(_f32_iota((rows, cols), 1), lk)
    s = jnp.where(row_b == col_b, s, -1e30)

    m = jnp.max(s, axis=-1, keepdims=True)
    p = jnp.exp(s - m)
    # softmax normalization via EUP reciprocal (free issue slot)
    p = p * pl.reciprocal(jnp.sum(p, axis=-1, keepdims=True), approx=True)

    o_mixed = jnp.dot(p, v, preferred_element_type=jnp.float32)       # (rows, D)
    o_mixed = jnp.where(head_mask, o_mixed, 0.0)
    o = o_mixed[0:batch * lq, :]
    for h in range(1, nhead):                                         # aligned sublane blocks
        o = o + o_mixed[h * batch * lq:(h + 1) * batch * lq, :]
    return jnp.dot(o, wo, preferred_element_type=jnp.float32) + bo


# ----------------------------------------------------------------------------
# The single fused kernel
# ----------------------------------------------------------------------------

def _temporal_kernel(src_ref, tgt_ref, time_ref, w_ref, out_ref, mem_ref,
                     *, layout, batch, win, small_win, d_model, nhead, hd):
    B, W, SW, D, H = batch, win, small_win, d_model, nhead

    def ld(name):
        r0, nr, nc = layout[name]
        return w_ref[pl.ds(r0, nr), pl.ds(0, nc)]     # static, tile-aligned slice

    def lin(x, wname, bname):
        return jnp.dot(x, ld(wname), preferred_element_type=jnp.float32) + ld(bname)

    # ---- biased positional embedding on the whole (B*W, D) batch-major slab ----
    t = time_ref[...]                                                  # (B*W, D)
    prev = jnp.concatenate([t[0:1, :], t[:-1, :]], axis=0)             # row r-1 (row 0 dup)
    r = _f32_iota((B * W, D), 0)
    first_row = (_blk(r, W) * float(W)) == r                           # r % W == 0
    diff = jnp.where(first_row, 0.0, t - prev)                         # zero-padded diff
    interval = jnp.round(diff * (1.0 / 0.0001736))
    wt = jnp.concatenate([ld("Wt")] * B, axis=0)                       # (B*W, D)
    arc = jnp.concatenate([ld("arc")] * B, axis=0)                     # (B*W, D)
    phase = arc + interval * wt
    pe = jnp.sin(phase) + jnp.cos(phase)                               # (B*W, D)
    pe_tgt = jnp.concatenate(
        [pe[b * W + (W - SW):(b + 1) * W, :] for b in range(B)], axis=0)

    # ---- input embeddings + PE ----
    # TODO(synk): dropout1 / dropout2 (p=0.2) implemented as identity (eval mode).
    src_e = lin(src_ref[...], "L1_w", "L1_b") + pe                     # (B*W, D)
    tgt_e = lin(tgt_ref[...], "L2_w", "L2_b") + pe_tgt                 # (B*SW, D)

    # ---- transformer encoder: 1 custom layer, no LayerNorm ----
    x = src_e
    x = x + _mha(lin(x, "e_wq", "e_bq"), lin(x, "e_wk", "e_bk"),
                 lin(x, "e_wv", "e_bv"), ld("e_wo"), ld("e_bo"),
                 batch=B, lq=W, lk=W, nhead=H, hd=hd)
    # nn.LeakyReLU(True) -> negative_slope == 1.0, i.e. identity: no op emitted.
    x = x + lin(lin(x, "ef_w1", "ef_b1"), "ef_w2", "ef_b2")
    mem_ref[...] = x                                                   # memory output

    # ---- transformer decoder: 1 custom layer, no LayerNorm ----
    y = tgt_e
    y = y + _mha(lin(y, "ds_wq", "ds_bq"), lin(y, "ds_wk", "ds_bk"),
                 lin(y, "ds_wv", "ds_bv"), ld("ds_wo"), ld("ds_bo"),
                 batch=B, lq=SW, lk=SW, nhead=H, hd=hd)
    y = y + _mha(lin(y, "dc_wq", "dc_bq"), lin(x, "dc_wk", "dc_bk"),
                 lin(x, "dc_wv", "dc_bv"), ld("dc_wo"), ld("dc_bo"),
                 batch=B, lq=SW, lk=W, nhead=H, hd=hd)
    y = y + lin(lin(y, "df_w1", "df_b1"), "df_w2", "df_b2")

    # ---- output head: Linear3 + exact sigmoid ----
    z = lin(y, "L3_w", "L3_b")                                         # (B*SW, dim)
    out_ref[...] = 1.0 / (1.0 + jnp.exp(-z))


# ----------------------------------------------------------------------------
# One-time weight packing (outside jit): one slab, one DMA
# ----------------------------------------------------------------------------

def pack_weights(params):
    """Pack every weight/bias into a single f32 slab.

    Each piece is lane-aligned at column 0 and row-padded to a multiple of 8
    sublanes so every in-kernel slice is tile-aligned.
    Returns (slab, layout) with layout[name] = (row_offset, rows, cols).
    """
    pieces = []

    def add(name, arr):
        a = jnp.asarray(arr, jnp.float32)
        if a.ndim == 1:
            a = a.reshape(1, -1)
        pieces.append((name, a))

    add("Wt", params["Wt"])
    add("arc", params["arc"])
    add("L1_w", params["L1_w"]); add("L1_b", params["L1_b"])
    add("L2_w", params["L2_w"]); add("L2_b", params["L2_b"])
    add("L3_w", params["L3_w"]); add("L3_b", params["L3_b"])
    for tag, blk in (("e", params["enc_attn"]), ("ds", params["dec_self"]),
                     ("dc", params["dec_cross"])):
        for nm in ("wq", "bq", "wk", "bk", "wv", "bv", "wo", "bo"):
            add(f"{tag}_{nm}", blk[nm])
    for tag, blk in (("ef", params["enc_ffn"]), ("df", params["dec_ffn"])):
        for nm in ("w1", "b1", "w2", "b2"):
            add(f"{tag}_{nm}", blk[nm])

    width = max(a.shape[1] for _, a in pieces)
    layout, rows, off = {}, [], 0
    for name, a in pieces:
        r, c = a.shape
        rpad = (-r) % 8
        rows.append(jnp.pad(a, ((0, rpad), (0, width - c))))
        layout[name] = (off, r, c)
        off += r + rpad
    return jnp.concatenate(rows, axis=0), layout


# ----------------------------------------------------------------------------
# Wrapper: layout plumbing + the single pallas_call
# ----------------------------------------------------------------------------

def temporal_forward(src, tgt, src_time, w_slab, *, layout, nhead, small_win):
    win, batch, dim = src.shape
    sw = tgt.shape[0]
    d_model = layout["L1_w"][2]
    hd = d_model // nhead

    # batch-major flattening (tiny contiguous reshapes, fused by XLA)
    src2 = jnp.transpose(src, (1, 0, 2)).reshape(batch * win, dim)
    tgt2 = jnp.transpose(tgt, (1, 0, 2)).reshape(batch * sw, dim)
    time2 = jnp.transpose(src_time, (1, 0, 2)).reshape(batch * win, d_model)

    kernel = functools.partial(
        _temporal_kernel, layout=layout, batch=batch, win=win,
        small_win=small_win, d_model=d_model, nhead=nhead, hd=hd)

    # No grid: whole problem (<100 KiB) runs in one VMEM-resident invocation.
    out2, mem2 = pl.pallas_call(
        kernel,
        out_shape=(jax.ShapeDtypeStruct((batch * sw, dim), jnp.float32),
                   jax.ShapeDtypeStruct((batch * win, d_model), jnp.float32)),
    )(src2, tgt2, time2, w_slab)

    out = out2.reshape(batch, sw, dim).transpose(1, 0, 2)
    memory = mem2.reshape(batch, win, d_model).transpose(1, 0, 2)
    return out, memory


# ----------------------------------------------------------------------------
# Deterministic parameter initialization
# ----------------------------------------------------------------------------

def init_params(key, embed_time, slide_win, dim, dim_feedforward=16):
    d_model = embed_time * dim

    def u(k, shape):
        return jax.random.uniform(k, shape, jnp.float32, -0.3, 0.3)

    keys = iter(jax.random.split(key, 64))

    def attn_params():
        return {"wq": u(next(keys), (d_model, d_model)), "bq": u(next(keys), (d_model,)),
                "wk": u(next(keys), (d_model, d_model)), "bk": u(next(keys), (d_model,)),
                "wv": u(next(keys), (d_model, d_model)), "bv": u(next(keys), (d_model,)),
                "wo": u(next(keys), (d_model, d_model)), "bo": u(next(keys), (d_model,))}

    def ffn_params():
        return {"w1": u(next(keys), (d_model, dim_feedforward)),
                "b1": u(next(keys), (dim_feedforward,)),
                "w2": u(next(keys), (dim_feedforward, d_model)),
                "b2": u(next(keys), (d_model,))}

    position = jnp.arange(slide_win, dtype=jnp.float32)[:, None]          # (W, 1)
    div_term = jnp.exp(jnp.arange(d_model, dtype=jnp.float32)
                       * (-math.log(10000.0) / d_model))                  # (D,)
    arc = position * div_term                                             # (W, D)

    return {
        "Wt": u(next(keys), (slide_win, d_model)),
        "arc": arc,
        "L1_w": u(next(keys), (dim, d_model)), "L1_b": u(next(keys), (d_model,)),
        "L2_w": u(next(keys), (dim, d_model)), "L2_b": u(next(keys), (d_model,)),
        "L3_w": u(next(keys), (d_model, dim)), "L3_b": u(next(keys), (dim,)),
        "enc_attn": attn_params(), "enc_ffn": ffn_params(),
        "dec_self": attn_params(), "dec_cross": attn_params(),
        "dec_ffn": ffn_params(),
    }


# ----------------------------------------------------------------------------
# Main
# ----------------------------------------------------------------------------

if __name__ == "__main__":
    embed_time, slide_win, small_win, dim = 2, 16, 8, 4
    batch = 2
    d_model = embed_time * dim          # 8
    nhead = d_model // 2                # 4 heads, head_dim = 2

    root = jax.random.PRNGKey(0)
    k_src, k_tgt, k_time, k_par = jax.random.split(root, 4)

    src = jax.random.normal(k_src, (slide_win, batch, dim), jnp.float32)
    tgt = jax.random.normal(k_tgt, (small_win, batch, dim), jnp.float32)
    # src_time: monotone timestamps; last dim equals embed_time*dim ('wbi,wi->wbi')
    src_time = jnp.cumsum(
        jnp.abs(jax.random.normal(k_time, (slide_win, batch, d_model), jnp.float32)) * 1e-3,
        axis=0)

    params = init_params(k_par, embed_time, slide_win, dim)
    w_slab, layout = pack_weights(params)          # one-time packing (outside jit)

    fwd = jax.jit(functools.partial(temporal_forward, layout=layout,
                                    nhead=nhead, small_win=small_win))
    out, memory = fwd(src, tgt, src_time, w_slab)
    jax.block_until_ready((out, memory))

    assert out.shape == (small_win, batch, dim)
    assert memory.shape == (slide_win, batch, d_model)
    assert bool(jnp.all(jnp.isfinite(out))) and bool(jnp.all(jnp.isfinite(memory)))
    print("KERNEL_OK")
</pallas_src>

<mosaic_0001>
module attributes {stable_mosaic.version = 11 : i64} {
  func.func @_temporal_kernel(%arg0: memref<32x4xf32, #tpu.memory_space<vmem>>, %arg1: memref<16x4xf32, #tpu.memory_space<vmem>>, %arg2: memref<32x8xf32, #tpu.memory_space<vmem>>, %arg3: memref<352x16xf32, #tpu.memory_space<vmem>>, %arg4: memref<16x4xf32, #tpu.memory_space<vmem>>, %arg5: memref<32x8xf32, #tpu.memory_space<vmem>>) attributes {dimension_semantics = [], scalar_prefetch = 0 : i64, scratch_operands = 0 : i64, tpu.core_type = #tpu.core_type<tc>} {
    %c0 = arith.constant 0 : index
    %c0_0 = arith.constant 0 : index
    %0 = vector.load %arg2[%c0, %c0_0] : memref<32x8xf32, #tpu.memory_space<vmem>>, vector<32x8xf32>
    %1 = vector.extract_strided_slice %0 {offsets = [0, 0], sizes = [1, 8], strides = [1, 1]} : vector<32x8xf32> to vector<1x8xf32>
    %2 = vector.extract_strided_slice %0 {offsets = [0, 0], sizes = [31, 8], strides = [1, 1]} : vector<32x8xf32> to vector<31x8xf32>
    %3 = tpu.concatenate %1, %2 in 0 : vector<1x8xf32>, vector<31x8xf32> -> vector<32x8xf32>
    %4 = tpu.iota {dimensions = array<i32: 0>} : vector<32x8xi32>
    %5 = arith.sitofp %4 : vector<32x8xi32> to vector<32x8xf32>
    %cst = arith.constant 5.000000e-01 : f32
    %6 = vector.broadcast %cst : f32 to vector<32x8xf32>
    %7 = arith.addf %5, %6 : vector<32x8xf32>
    %cst_1 = arith.constant 6.250000e-02 : f32
    %8 = vector.broadcast %cst_1 : f32 to vector<32x8xf32>
    %9 = arith.mulf %7, %8 : vector<32x8xf32>
    %10 = math.floor %9 : vector<32x8xf32>
    %cst_2 = arith.constant 1.600000e+01 : f32
    %11 = vector.broadcast %cst_2 : f32 to vector<32x8xf32>
    %12 = arith.mulf %10, %11 : vector<32x8xf32>
    %13 = arith.cmpf oeq, %12, %5 : vector<32x8xf32>
    %14 = arith.subf %0, %3 : vector<32x8xf32>
    %cst_3 = arith.constant 0.000000e+00 : f32
    %15 = vector.broadcast %cst_3 : f32 to vector<32x8xf32>
    %16 = arith.select %13, %15, %14 : vector<32x8xi1>, vector<32x8xf32>
    %cst_4 = arith.constant 5760.36865 : f32
    %17 = vector.broadcast %cst_4 : f32 to vector<32x8xf32>
    %18 = arith.mulf %16, %17 : vector<32x8xf32>
    %19 = math.roundeven %18 : vector<32x8xf32>
    %c0_5 = arith.constant 0 : index
    %c0_6 = arith.constant 0 : index
    %20 = vector.load %arg3[%c0_5, %c0_6] : memref<352x16xf32, #tpu.memory_space<vmem>>, vector<16x8xf32>
    %21 = tpu.concatenate %20, %20 in 0 : vector<16x8xf32>, vector<16x8xf32> -> vector<32x8xf32>
    %c16 = arith.constant 16 : index
    %c0_7 = arith.constant 0 : index
    %22 = vector.load %arg3[%c16, %c0_7] : memref<352x16xf32, #tpu.memory_space<vmem>>, vector<16x8xf32>
    %23 = tpu.concatenate %22, %22 in 0 : vector<16x8xf32>, vector<16x8xf32> -> vector<32x8xf32>
    %24 = arith.mulf %19, %21 : vector<32x8xf32>
    %25 = arith.addf %23, %24 : vector<32x8xf32>
    %26 = math.sin %25 : vector<32x8xf32>
    %27 = math.cos %25 : vector<32x8xf32>
    %28 = arith.addf %26, %27 : vector<32x8xf32>
    %29 = vector.extract_strided_slice %28 {offsets = [8, 0], sizes = [8, 8], strides = [1, 1]} : vector<32x8xf32> to vector<8x8xf32>
    %30 = vector.extract_strided_slice %28 {offsets = [24, 0], sizes = [8, 8], strides = [1, 1]} : vector<32x8xf32> to vector<8x8xf32>
    %31 = tpu.concatenate %29, %30 in 0 : vector<8x8xf32>, vector<8x8xf32> -> vector<16x8xf32>
    %c0_8 = arith.constant 0 : index
    %c0_9 = arith.constant 0 : index
    %32 = vector.load %arg0[%c0_8, %c0_9] : memref<32x4xf32, #tpu.memory_space<vmem>>, vector<32x4xf32>
    %c32 = arith.constant 32 : index
    %c0_10 = arith.constant 0 : index
    %33 = vector.load %arg3[%c32, %c0_10] : memref<352x16xf32, #tpu.memory_space<vmem>>, vector<4x8xf32>
    %cst_11 = arith.constant dense<0.000000e+00> : vector<32x8xf32>
    %34 = tpu.matmul %32, %33, %cst_11 {dimension_numbers = #tpu.dot_dimension_numbers<[1], [0], [0], [1], [0, 0, 1, 1], [], []>} : vector<32x4xf32>, vector<4x8xf32>, vector<32x8xf32> -> vector<32x8xf32>
    %c40 = arith.constant 40 : index
    %c0_12 = arith.constant 0 : index
    %35 = vector.load %arg3[%c40, %c0_12] : memref<352x16xf32, #tpu.memory_space<vmem>>, vector<1x8xf32>
    %36 = vector.broadcast %35 : vector<1x8xf32> to vector<32x8xf32>
    %37 = arith.addf %34, %36 : vector<32x8xf32>
    %38 = arith.addf %37, %28 : vector<32x8xf32>
    %c0_13 = arith.constant 0 : index
    %c0_14 = arith.constant 0 : index
    %39 = vector.load %arg1[%c0_13, %c0_14] : memref<16x4xf32, #tpu.memory_space<vmem>>, vector<16x4xf32>
    %c48 = arith.constant 48 : index
    %c0_15 = arith.constant 0 : index
    %40 = vector.load %arg3[%c48, %c0_15] : memref<352x16xf32, #tpu.memory_space<vmem>>, vector<4x8xf32>
    %cst_16 = arith.constant dense<0.000000e+00> : vector<16x8xf32>
    %41 = tpu.matmul %39, %40, %cst_16 {dimension_numbers = #tpu.dot_dimension_numbers<[1], [0], [0], [1], [0, 0, 1, 1], [], []>} : vector<16x4xf32>, vector<4x8xf32>, vector<16x8xf32> -> vector<16x8xf32>
    %c56 = arith.constant 56 : index
    %c0_17 = arith.constant 0 : index
    %42 = vector.load %arg3[%c56, %c0_17] : memref<352x16xf32, #tpu.memory_space<vmem>>, vector<1x8xf32>
    %43 = vector.broadcast %42 : vector<1x8xf32> to vector<16x8xf32>
    %44 = arith.addf %41, %43 : vector<16x8xf32>
    %45 = arith.addf %44, %31 : vector<16x8xf32>
    %c80 = arith.constant 80 : index
    %c0_18 = arith.constant 0 : index
    %46 = vector.load %arg3[%c80, %c0_18] : memref<352x16xf32, #tpu.memory_space<vmem>>, vector<8x8xf32>
    %cst_19 = arith.constant dense<0.000000e+00> : vector<32x8xf32>
    %47 = tpu.matmul %38, %46, %cst_19 {dimension_numbers = #tpu.dot_dimension_numbers<[1], [0], [0], [1], [0, 0, 1, 1], [], []>} : vector<32x8xf32>, vector<8x8xf32>, vector<32x8xf32> -> vector<32x8xf32>
    %c88 = arith.constant 88 : index
    %c0_20 = arith.constant 0 : index
    %48 = vector.load %arg3[%c88, %c0_20] : memref<352x16xf32, #tpu.memory_space<vmem>>, vector<1x8xf32>
    %49 = vector.broadcast %48 : vector<1x8xf32> to vector<32x8xf32>
    %50 = arith.addf %47, %49 : vector<32x8xf32>
    %c96 = arith.constant 96 : index
    %c0_21 = arith.constant 0 : index
    %51 = vector.load %arg3[%c96, %c0_21] : memref<352x16xf32, #tpu.memory_space<vmem>>, vector<8x8xf32>
    %cst_22 = arith.constant dense<0.000000e+00> : vector<32x8xf32>
    %52 = tpu.matmul %38, %51, %cst_22 {dimension_numbers = #tpu.dot_dimension_numbers<[1], [0], [0], [1], [0, 0, 1, 1], [], []>} : vector<32x8xf32>, vector<8x8xf32>, vector<32x8xf32> -> vector<32x8xf32>
    %c104 = arith.constant 104 : index
    %c0_23 = arith.constant 0 : index
    %53 = vector.load %arg3[%c104, %c0_23] : memref<352x16xf32, #tpu.memory_space<vmem>>, vector<1x8xf32>
    %54 = vector.broadcast %53 : vector<1x8xf32> to vector<32x8xf32>
    %55 = arith.addf %52, %54 : vector<32x8xf32>
    %c112 = arith.constant 112 : index
    %c0_24 = arith.constant 0 : index
    %56 = vector.load %arg3[%c112, %c0_24] : memref<352x16xf32, #tpu.memory_space<vmem>>, vector<8x8xf32>
    %cst_25 = arith.constant dense<0.000000e+00> : vector<32x8xf32>
    %57 = tpu.matmul %38, %56, %cst_25 {dimension_numbers = #tpu.dot_dimension_numbers<[1], [0], [0], [1], [0, 0, 1, 1], [], []>} : vector<32x8xf32>, vector<8x8xf32>, vector<32x8xf32> -> vector<32x8xf32>
    %c120 = arith.constant 120 : index
    %c0_26 = arith.constant 0 : index
    %58 = vector.load %arg3[%c120, %c0_26] : memref<352x16xf32, #tpu.memory_space<vmem>>, vector<1x8xf32>
    %59 = vector.broadcast %58 : vector<1x8xf32> to vector<32x8xf32>
    %60 = arith.addf %57, %59 : vector<32x8xf32>
    %c128 = arith.constant 128 : index
    %c0_27 = arith.constant 0 : index
    %61 = vector.load %arg3[%c128, %c0_27] : memref<352x16xf32, #tpu.memory_space<vmem>>, vector<8x8xf32>
    %c136 = arith.constant 136 : index
    %c0_28 = arith.constant 0 : index
    %62 = vector.load %arg3[%c136, %c0_28] : memref<352x16xf32, #tpu.memory_space<vmem>>, vector<1x8xf32>
    %63 = tpu.iota {dimensions = array<i32: 0>} : vector<128x8xi32>
    %64 = arith.sitofp %63 : vector<128x8xi32> to vector<128x8xf32>
    %cst_29 = arith.constant 5.000000e-01 : f32
    %65 = vector.broadcast %cst_29 : f32 to vector<128x8xf32>
    %66 = arith.addf %64, %65 : vector<128x8xf32>
    %cst_30 = arith.constant 3.125000e-02 : f32
    %67 = vector.broadcast %cst_30 : f32 to vector<128x8xf32>
    %68 = arith.mulf %66, %67 : vector<128x8xf32>
    %69 = math.floor %68 : vector<128x8xf32>
    %70 = tpu.iota {dimensions = array<i32: 1>} : vector<128x8xi32>
    %71 = arith.sitofp %70 : vector<128x8xi32> to vector<128x8xf32>
    %cst_31 = arith.constant 5.000000e-01 : f32
    %72 = vector.broadcast %cst_31 : f32 to vector<128x8xf32>
    %73 = arith.addf %71, %72 : vector<128x8xf32>
    %cst_32 = arith.constant 5.000000e-01 : f32
    %74 = vector.broadcast %cst_32 : f32 to vector<128x8xf32>
    %75 = arith.mulf %73, %74 : vector<128x8xf32>
    %76 = math.floor %75 : vector<128x8xf32>
    %77 = arith.cmpf oeq, %69, %76 : vector<128x8xf32>
    %cst_33 = arith.constant 0.707106769 : f32
    %78 = vector.broadcast %cst_33 : f32 to vector<32x8xf32>
    %79 = arith.mulf %50, %78 : vector<32x8xf32>
    %80 = tpu.concatenate %79, %79, %79, %79 in 0 : vector<32x8xf32>, vector<32x8xf32>, vector<32x8xf32>, vector<32x8xf32> -> vector<128x8xf32>
    %cst_34 = arith.constant 0.000000e+00 : f32
    %81 = vector.broadcast %cst_34 : f32 to vector<128x8xf32>
    %82 = arith.select %77, %80, %81 : vector<128x8xi1>, vector<128x8xf32>
    %cst_35 = arith.constant dense<0.000000e+00> : vector<128x32xf32>
    %83 = tpu.matmul %82, %55, %cst_35 {dimension_numbers = #tpu.dot_dimension_numbers<[1], [1], [0], [0], [0, 0, 1, 0], [], []>} : vector<128x8xf32>, vector<32x8xf32>, vector<128x32xf32> -> vector<128x32xf32>
    %84 = tpu.iota {dimensions = array<i32: 0>} : vector<128x32xi32>
    %85 = arith.sitofp %84 : vector<128x32xi32> to vector<128x32xf32>
    %cst_36 = arith.constant 5.000000e-01 : f32
    %86 = vector.broadcast %cst_36 : f32 to vector<128x32xf32>
    %87 = arith.addf %85, %86 : vector<128x32xf32>
    %cst_37 = arith.constant 6.250000e-02 : f32
    %88 = vector.broadcast %cst_37 : f32 to vector<128x32xf32>
    %89 = arith.mulf %87, %88 : vector<128x32xf32>
    %90 = math.floor %89 : vector<128x32xf32>
    %cst_38 = arith.constant 5.000000e-01 : f32
    %91 = vector.broadcast %cst_38 : f32 to vector<128x32xf32>
    %92 = arith.addf %85, %91 : vector<128x32xf32>
    %cst_39 = arith.constant 3.125000e-02 : f32
    %93 = vector.broadcast %cst_39 : f32 to vector<128x32xf32>
    %94 = arith.mulf %92, %93 : vector<128x32xf32>
    %95 = math.floor %94 : vector<128x32xf32>
    %cst_40 = arith.constant 2.000000e+00 : f32
    %96 = vector.broadcast %cst_40 : f32 to vector<128x32xf32>
    %97 = arith.mulf %96, %95 : vector<128x32xf32>
    %98 = arith.subf %90, %97 : vector<128x32xf32>
    %99 = tpu.iota {dimensions = array<i32: 1>} : vector<128x32xi32>
    %100 = arith.sitofp %99 : vector<128x32xi32> to vector<128x32xf32>
    %cst_41 = arith.constant 5.000000e-01 : f32
    %101 = vector.broadcast %cst_41 : f32 to vector<128x32xf32>
    %102 = arith.addf %100, %101 : vector<128x32xf32>
    %cst_42 = arith.constant 6.250000e-02 : f32
    %103 = vector.broadcast %cst_42 : f32 to vector<128x32xf32>
    %104 = arith.mulf %102, %103 : vector<128x32xf32>
    %105 = math.floor %104 : vector<128x32xf32>
    %106 = arith.cmpf oeq, %98, %105 : vector<128x32xf32>
    %cst_43 = arith.constant -1.000000e+30 : f32
    %107 = vector.broadcast %cst_43 : f32 to vector<128x32xf32>
    %108 = arith.select %106, %83, %107 : vector<128x32xi1>, vector<128x32xf32>
    %cst_44 = arith.constant dense<0xFF800000> : vector<128xf32>
    %109 = vector.multi_reduction <maximumf>, %108, %cst_44 [1] : vector<128x32xf32> to vector<128xf32>
    %110 = vector.shape_cast %109 : vector<128xf32> to vector<128x1xf32>
    %111 = vector.broadcast %110 : vector<128x1xf32> to vector<128x32xf32>
    %112 = arith.subf %108, %111 : vector<128x32xf32>
    %113 = math.exp %112 : vector<128x32xf32>
    %cst_45 = arith.constant dense<0.000000e+00> : vector<128xf32>
    %114 = vector.multi_reduction <add>, %113, %cst_45 [1] : vector<128x32xf32> to vector<128xf32>
    %115 = vector.shape_cast %114 : vector<128xf32> to vector<128x1xf32>
    %116 = tpu.reciprocal %115 {approx = true} : vector<128x1xf32> -> vector<128x1xf32>
    %117 = vector.broadcast %116 : vector<128x1xf32> to vector<128x32xf32>
    %118 = arith.mulf %113, %117 : vector<128x32xf32>
    %cst_46 = arith.constant dense<0.000000e+00> : vector<128x8xf32>
    %119 = tpu.matmul %118, %60, %cst_46 {dimension_numbers = #tpu.dot_dimension_numbers<[1], [0], [0], [1], [0, 0, 1, 1], [], []>} : vector<128x32xf32>, vector<32x8xf32>, vector<128x8xf32> -> vector<128x8xf32>
    %cst_47 = arith.constant 0.000000e+00 : f32
    %120 = vector.broadcast %cst_47 : f32 to vector<128x8xf32>
    %121 = arith.select %77, %119, %120 : vector<128x8xi1>, vector<128x8xf32>
    %122 = vector.extract_strided_slice %121 {offsets = [0, 0], sizes = [32, 8], strides = [1, 1]} : vector<128x8xf32> to vector<32x8xf32>
    %123 = vector.extract_strided_slice %121 {offsets = [32, 0], sizes = [32, 8], strides = [1, 1]} : vector<128x8xf32> to vector<32x8xf32>
    %124 = arith.addf %122, %123 : vector<32x8xf32>
    %125 = vector.extract_strided_slice %121 {offsets = [64, 0], sizes = [32, 8], strides = [1, 1]} : vector<128x8xf32> to vector<32x8xf32>
    %126 = arith.addf %124, %125 : vector<32x8xf32>
    %127 = vector.extract_strided_slice %121 {offsets = [96, 0], sizes = [32, 8], strides = [1, 1]} : vector<128x8xf32> to vector<32x8xf32>
    %128 = arith.addf %126, %127 : vector<32x8xf32>
    %cst_48 = arith.constant dense<0.000000e+00> : vector<32x8xf32>
    %129 = tpu.matmul %128, %61, %cst_48 {dimension_numbers = #tpu.dot_dimension_numbers<[1], [0], [0], [1], [0, 0, 1, 1], [], []>} : vector<32x8xf32>, vector<8x8xf32>, vector<32x8xf32> -> vector<32x8xf32>
    %130 = vector.broadcast %62 : vector<1x8xf32> to vector<32x8xf32>
    %131 = arith.addf %129, %130 : vector<32x8xf32>
    %132 = arith.addf %38, %131 : vector<32x8xf32>
    %c272 = arith.constant 272 : index
    %c0_49 = arith.constant 0 : index
    %133 = vector.load %arg3[%c272, %c0_49] : memref<352x16xf32, #tpu.memory_space<vmem>>, vector<8x16xf32>
    %cst_50 = arith.constant dense<0.000000e+00> : vector<32x16xf32>
    %134 = tpu.matmul %132, %133, %cst_50 {dimension_numbers = #tpu.dot_dimension_numbers<[1], [0], [0], [1], [0, 0, 1, 1], [], []>} : vector<32x8xf32>, vector<8x16xf32>, vector<32x16xf32> -> vector<32x16xf32>
    %c280 = arith.constant 280 : index
    %c0_51 = arith.constant 0 : index
    %135 = vector.load %arg3[%c280, %c0_51] : memref<352x16xf32, #tpu.memory_space<vmem>>, vector<1x16xf32>
    %136 = vector.broadcast %135 : vector<1x16xf32> to vector<32x16xf32>
    %137 = arith.addf %134, %136 : vector<32x16xf32>
    %c288 = arith.constant 288 : index
    %c0_52 = arith.constant 0 : index
    %138 = vector.load %arg3[%c288, %c0_52] : memref<352x16xf32, #tpu.memory_space<vmem>>, vector<16x8xf32>
    %cst_53 = arith.constant dense<0.000000e+00> : vector<32x8xf32>
    %139 = tpu.matmul %137, %138, %cst_53 {dimension_numbers = #tpu.dot_dimension_numbers<[1], [0], [0], [1], [0, 0, 1, 1], [], []>} : vector<32x16xf32>, vector<16x8xf32>, vector<32x8xf32> -> vector<32x8xf32>
    %c304 = arith.constant 304 : index
    %c0_54 = arith.constant 0 : index
    %140 = vector.load %arg3[%c304, %c0_54] : memref<352x16xf32, #tpu.memory_space<vmem>>, vector<1x8xf32>
    %141 = vector.broadcast %140 : vector<1x8xf32> to vector<32x8xf32>
    %142 = arith.addf %139, %141 : vector<32x8xf32>
    %143 = arith.addf %132, %142 : vector<32x8xf32>
    %c0_55 = arith.constant 0 : index
    %c0_56 = arith.constant 0 : index
    %144 = vector.load %arg5[%c0_55, %c0_56] : memref<32x8xf32, #tpu.memory_space<vmem>>, vector<32x8xf32>
    tpu.vector_store %arg5[%c0_55, %c0_56], %143 {strides = array<i32>} : memref<32x8xf32, #tpu.memory_space<vmem>>, vector<32x8xf32>,
    %c144 = arith.constant 144 : index
    %c0_57 = arith.constant 0 : index
    %145 = vector.load %arg3[%c144, %c0_57] : memref<352x16xf32, #tpu.memory_space<vmem>>, vector<8x8xf32>
    %cst_58 = arith.constant dense<0.000000e+00> : vector<16x8xf32>
    %146 = tpu.matmul %45, %145, %cst_58 {dimension_numbers = #tpu.dot_dimension_numbers<[1], [0], [0], [1], [0, 0, 1, 1], [], []>} : vector<16x8xf32>, vector<8x8xf32>, vector<16x8xf32> -> vector<16x8xf32>
    %c152 = arith.constant 152 : index
    %c0_59 = arith.constant 0 : index
    %147 = vector.load %arg3[%c152, %c0_59] : memref<352x16xf32, #tpu.memory_space<vmem>>, vector<1x8xf32>
    %148 = vector.broadcast %147 : vector<1x8xf32> to vector<16x8xf32>
    %149 = arith.addf %146, %148 : vector<16x8xf32>
    %c160 = arith.constant 160 : index
    %c0_60 = arith.constant 0 : index
    %150 = vector.load %arg3[%c160, %c0_60] : memref<352x16xf32, #tpu.memory_space<vmem>>, vector<8x8xf32>
    %cst_61 = arith.constant dense<0.000000e+00> : vector<16x8xf32>
    %151 = tpu.matmul %45, %150, %cst_61 {dimension_numbers = #tpu.dot_dimension_numbers<[1], [0], [0], [1], [0, 0, 1, 1], [], []>} : vector<16x8xf32>, vector<8x8xf32>, vector<16x8xf32> -> vector<16x8xf32>
    %c168 = arith.constant 168 : index
    %c0_62 = arith.constant 0 : index
    %152 = vector.load %arg3[%c168, %c0_62] : memref<352x16xf32, #tpu.memory_space<vmem>>, vector<1x8xf32>
    %153 = vector.broadcast %152 : vector<1x8xf32> to vector<16x8xf32>
    %154 = arith.addf %151, %153 : vector<16x8xf32>
    %c176 = arith.constant 176 : index
    %c0_63 = arith.constant 0 : index
    %155 = vector.load %arg3[%c176, %c0_63] : memref<352x16xf32, #tpu.memory_space<vmem>>, vector<8x8xf32>
    %cst_64 = arith.constant dense<0.000000e+00> : vector<16x8xf32>
    %156 = tpu.matmul %45, %155, %cst_64 {dimension_numbers = #tpu.dot_dimension_numbers<[1], [0], [0], [1], [0, 0, 1, 1], [], []>} : vector<16x8xf32>, vector<8x8xf32>, vector<16x8xf32> -> vector<16x8xf32>
    %c184 = arith.constant 184 : index
    %c0_65 = arith.constant 0 : index
    %157 = vector.load %arg3[%c184, %c0_65] : memref<352x16xf32, #tpu.memory_space<vmem>>, vector<1x8xf32>
    %158 = vector.broadcast %157 : vector<1x8xf32> to vector<16x8xf32>
    %159 = arith.addf %156, %158 : vector<16x8xf32>
    %c192 = arith.constant 192 : index
    %c0_66 = arith.constant 0 : index
    %160 = vector.load %arg3[%c192, %c0_66] : memref<352x16xf32, #tpu.memory_space<vmem>>, vector<8x8xf32>
    %c200 = arith.constant 200 : index
    %c0_67 = arith.constant 0 : index
    %161 = vector.load %arg3[%c200, %c0_67] : memref<352x16xf32, #tpu.memory_space<vmem>>, vector<1x8xf32>
    %162 = tpu.iota {dimensions = array<i32: 0>} : vector<64x8xi32>
    %163 = arith.sitofp %162 : vector<64x8xi32> to vector<64x8xf32>
    %cst_68 = arith.constant 5.000000e-01 : f32
    %164 = vector.broadcast %cst_68 : f32 to vector<64x8xf32>
    %165 = arith.addf %163, %164 : vector<64x8xf32>
    %cst_69 = arith.constant 6.250000e-02 : f32
    %166 = vector.broadcast %cst_69 : f32 to vector<64x8xf32>
    %167 = arith.mulf %165, %166 : vector<64x8xf32>
    %168 = math.floor %167 : vector<64x8xf32>
    %169 = tpu.iota {dimensions = array<i32: 1>} : vector<64x8xi32>
    %170 = arith.sitofp %169 : vector<64x8xi32> to vector<64x8xf32>
    %cst_70 = arith.constant 5.000000e-01 : f32
    %171 = vector.broadcast %cst_70 : f32 to vector<64x8xf32>
    %172 = arith.addf %170, %171 : vector<64x8xf32>
    %cst_71 = arith.constant 5.000000e-01 : f32
    %173 = vector.broadcast %cst_71 : f32 to vector<64x8xf32>
    %174 = arith.mulf %172, %173 : vector<64x8xf32>
    %175 = math.floor %174 : vector<64x8xf32>
    %176 = arith.cmpf oeq, %168, %175 : vector<64x8xf32>
    %cst_72 = arith.constant 0.707106769 : f32
    %177 = vector.broadcast %cst_72 : f32 to vector<16x8xf32>
    %178 = arith.mulf %149, %177 : vector<16x8xf32>
    %179 = tpu.concatenate %178, %178, %178, %178 in 0 : vector<16x8xf32>, vector<16x8xf32>, vector<16x8xf32>, vector<16x8xf32> -> vector<64x8xf32>
    %cst_73 = arith.constant 0.000000e+00 : f32
    %180 = vector.broadcast %cst_73 : f32 to vector<64x8xf32>
    %181 = arith.select %176, %179, %180 : vector<64x8xi1>, vector<64x8xf32>
    %cst_74 = arith.constant dense<0.000000e+00> : vector<64x16xf32>
    %182 = tpu.matmul %181, %154, %cst_74 {dimension_numbers = #tpu.dot_dimension_numbers<[1], [1], [0], [0], [0, 0, 1, 0], [], []>} : vector<64x8xf32>, vector<16x8xf32>, vector<64x16xf32> -> vector<64x16xf32>
    %183 = tpu.iota {dimensions = array<i32: 0>} : vector<64x16xi32>
    %184 = arith.sitofp %183 : vector<64x16xi32> to vector<64x16xf32>
    %cst_75 = arith.constant 5.000000e-01 : f32
    %185 = vector.broadcast %cst_75 : f32 to vector<64x16xf32>
    %186 = arith.addf %184, %185 : vector<64x16xf32>
    %cst_76 = arith.constant 1.250000e-01 : f32
    %187 = vector.broadcast %cst_76 : f32 to vector<64x16xf32>
    %188 = arith.mulf %186, %187 : vector<64x16xf32>
    %189 = math.floor %188 : vector<64x16xf32>
    %cst_77 = arith.constant 5.000000e-01 : f32
    %190 = vector.broadcast %cst_77 : f32 to vector<64x16xf32>
    %191 = arith.addf %184, %190 : vector<64x16xf32>
    %cst_78 = arith.constant 6.250000e-02 : f32
    %192 = vector.broadcast %cst_78 : f32 to vector<64x16xf32>
    %193 = arith.mulf %191, %192 : vector<64x16xf32>
    %194 = math.floor %193 : vector<64x16xf32>
    %cst_79 = arith.constant 2.000000e+00 : f32
    %195 = vector.broadcast %cst_79 : f32 to vector<64x16xf32>
    %196 = arith.mulf %195, %194 : vector<64x16xf32>
    %197 = arith.subf %189, %196 : vector<64x16xf32>
    %198 = tpu.iota {dimensions = array<i32: 1>} : vector<64x16xi32>
    %199 = arith.sitofp %198 : vector<64x16xi32> to vector<64x16xf32>
    %cst_80 = arith.constant 5.000000e-01 : f32
    %200 = vector.broadcast %cst_80 : f32 to vector<64x16xf32>
    %201 = arith.addf %199, %200 : vector<64x16xf32>
    %cst_81 = arith.constant 1.250000e-01 : f32
    %202 = vector.broadcast %cst_81 : f32 to vector<64x16xf32>
    %203 = arith.mulf %201, %202 : vector<64x16xf32>
    %204 = math.floor %203 : vector<64x16xf32>
    %205 = arith.cmpf oeq, %197, %204 : vector<64x16xf32>
    %cst_82 = arith.constant -1.000000e+30 : f32
    %206 = vector.broadcast %cst_82 : f32 to vector<64x16xf32>
    %207 = arith.select %205, %182, %206 : vector<64x16xi1>, vector<64x16xf32>
    %cst_83 = arith.constant dense<0xFF800000> : vector<64xf32>
    %208 = vector.multi_reduction <maximumf>, %207, %cst_83 [1] : vector<64x16xf32> to vector<64xf32>
    %209 = vector.shape_cast %208 : vector<64xf32> to vector<64x1xf32>
    %210 = vector.broadcast %209 : vector<64x1xf32> to vector<64x16xf32>
    %211 = arith.subf %207, %210 : vector<64x16xf32>
    %212 = math.exp %211 : vector<64x16xf32>
    %cst_84 = arith.constant dense<0.000000e+00> : vector<64xf32>
    %213 = vector.multi_reduction <add>, %212, %cst_84 [1] : vector<64x16xf32> to vector<64xf32>
    %214 = vector.shape_cast %213 : vector<64xf32> to vector<64x1xf32>
    %215 = tpu.reciprocal %214 {approx = true} : vector<64x1xf32> -> vector<64x1xf32>
    %216 = vector.broadcast %215 : vector<64x1xf32> to vector<64x16xf32>
    %217 = arith.mulf %212, %216 : vector<64x16xf32>
    %cst_85 = arith.constant dense<0.000000e+00> : vector<64x8xf32>
    %218 = tpu.matmul %217, %159, %cst_85 {dimension_numbers = #tpu.dot_dimension_numbers<[1], [0], [0], [1], [0, 0, 1, 1], [], []>} : vector<64x16xf32>, vector<16x8xf32>, vector<64x8xf32> -> vector<64x8xf32>
    %cst_86 = arith.constant 0.000000e+00 : f32
    %219 = vector.broadcast %cst_86 : f32 to vector<64x8xf32>
    %220 = arith.select %176, %218, %219 : vector<64x8xi1>, vector<64x8xf32>
    %221 = vector.extract_strided_slice %220 {offsets = [0, 0], sizes = [16, 8], strides = [1, 1]} : vector<64x8xf32> to vector<16x8xf32>
    %222 = vector.extract_strided_slice %220 {offsets = [16, 0], sizes = [16, 8], strides = [1, 1]} : vector<64x8xf32> to vector<16x8xf32>
    %223 = arith.addf %221, %222 : vector<16x8xf32>
    %224 = vector.extract_strided_slice %220 {offsets = [32, 0], sizes = [16, 8], strides = [1, 1]} : vector<64x8xf32> to vector<16x8xf32>
    %225 = arith.addf %223, %224 : vector<16x8xf32>
    %226 = vector.extract_strided_slice %220 {offsets = [48, 0], sizes = [16, 8], strides = [1, 1]} : vector<64x8xf32> to vector<16x8xf32>
    %227 = arith.addf %225, %226 : vector<16x8xf32>
    %cst_87 = arith.constant dense<0.000000e+00> : vector<16x8xf32>
    %228 = tpu.matmul %227, %160, %cst_87 {dimension_numbers = #tpu.dot_dimension_numbers<[1], [0], [0], [1], [0, 0, 1, 1], [], []>} : vector<16x8xf32>, vector<8x8xf32>, vector<16x8xf32> -> vector<16x8xf32>
    %229 = vector.broadcast %161 : vector<1x8xf32> to vector<16x8xf32>
    %230 = arith.addf %228, %229 : vector<16x8xf32>
    %231 = arith.addf %45, %230 : vector<16x8xf32>
    %c208 = arith.constant 208 : index
    %c0_88 = arith.constant 0 : index
    %232 = vector.load %arg3[%c208, %c0_88] : memref<352x16xf32, #tpu.memory_space<vmem>>, vector<8x8xf32>
    %cst_89 = arith.constant dense<0.000000e+00> : vector<16x8xf32>
    %233 = tpu.matmul %231, %232, %cst_89 {dimension_numbers = #tpu.dot_dimension_numbers<[1], [0], [0], [1], [0, 0, 1, 1], [], []>} : vector<16x8xf32>, vector<8x8xf32>, vector<16x8xf32> -> vector<16x8xf32>
    %c216 = arith.constant 216 : index
    %c0_90 = arith.constant 0 : index
    %234 = vector.load %arg3[%c216, %c0_90] : memref<352x16xf32, #tpu.memory_space<vmem>>, vector<1x8xf32>
    %235 = vector.broadcast %234 : vector<1x8xf32> to vector<16x8xf32>
    %236 = arith.addf %233, %235 : vector<16x8xf32>
    %c224 = arith.constant 224 : index
    %c0_91 = arith.constant 0 : index
    %237 = vector.load %arg3[%c224, %c0_91] : memref<352x16xf32, #tpu.memory_space<vmem>>, vector<8x8xf32>
    %cst_92 = arith.constant dense<0.000000e+00> : vector<32x8xf32>
    %238 = tpu.matmul %143, %237, %cst_92 {dimension_numbers = #tpu.dot_dimension_numbers<[1], [0], [0], [1], [0, 0, 1, 1], [], []>} : vector<32x8xf32>, vector<8x8xf32>, vector<32x8xf32> -> vector<32x8xf32>
    %c232 = arith.constant 232 : index
    %c0_93 = arith.constant 0 : index
    %239 = vector.load %arg3[%c232, %c0_93] : memref<352x16xf32, #tpu.memory_space<vmem>>, vector<1x8xf32>
    %240 = vector.broadcast %239 : vector<1x8xf32> to vector<32x8xf32>
    %241 = arith.addf %238, %240 : vector<32x8xf32>
    %c240 = arith.constant 240 : index
    %c0_94 = arith.constant 0 : index
    %242 = vector.load %arg3[%c240, %c0_94] : memref<352x16xf32, #tpu.memory_space<vmem>>, vector<8x8xf32>
    %cst_95 = arith.constant dense<0.000000e+00> : vector<32x8xf32>
    %243 = tpu.matmul %143, %242, %cst_95 {dimension_numbers = #tpu.dot_dimension_numbers<[1], [0], [0], [1], [0, 0, 1, 1], [], []>} : vector<32x8xf32>, vector<8x8xf32>, vector<32x8xf32> -> vector<32x8xf32>
    %c248 = arith.constant 248 : index
    %c0_96 = arith.constant 0 : index
    %244 = vector.load %arg3[%c248, %c0_96] : memref<352x16xf32, #tpu.memory_space<vmem>>, vector<1x8xf32>
    %245 = vector.broadcast %244 : vector<1x8xf32> to vector<32x8xf32>
    %246 = arith.addf %243, %245 : vector<32x8xf32>
    %c256 = arith.constant 256 : index
    %c0_97 = arith.constant 0 : index
    %247 = vector.load %arg3[%c256, %c0_97] : memref<352x16xf32, #tpu.memory_space<vmem>>, vector<8x8xf32>
    %c264 = arith.constant 264 : index
    %c0_98 = arith.constant 0 : index
    %248 = vector.load %arg3[%c264, %c0_98] : memref<352x16xf32, #tpu.memory_space<vmem>>, vector<1x8xf32>
    %249 = tpu.iota {dimensions = array<i32: 0>} : vector<64x8xi32>
    %250 = arith.sitofp %249 : vector<64x8xi32> to vector<64x8xf32>
    %cst_99 = arith.constant 5.000000e-01 : f32
    %251 = vector.broadcast %cst_99 : f32 to vector<64x8xf32>
    %252 = arith.addf %250, %251 : vector<64x8xf32>
    %cst_100 = arith.constant 6.250000e-02 : f32
    %253 = vector.broadcast %cst_100 : f32 to vector<64x8xf32>
    %254 = arith.mulf %252, %253 : vector<64x8xf32>
    %255 = math.floor %254 : vector<64x8xf32>
    %256 = tpu.iota {dimensions = array<i32: 1>} : vector<64x8xi32>
    %257 = arith.sitofp %256 : vector<64x8xi32> to vector<64x8xf32>
    %cst_101 = arith.constant 5.000000e-01 : f32
    %258 = vector.broadcast %cst_101 : f32 to vector<64x8xf32>
    %259 = arith.addf %257, %258 : vector<64x8xf32>
    %cst_102 = arith.constant 5.000000e-01 : f32
    %260 = vector.broadcast %cst_102 : f32 to vector<64x8xf32>
    %261 = arith.mulf %259, %260 : vector<64x8xf32>
    %262 = math.floor %261 : vector<64x8xf32>
    %263 = arith.cmpf oeq, %255, %262 : vector<64x8xf32>
    %cst_103 = arith.constant 0.707106769 : f32
    %264 = vector.broadcast %cst_103 : f32 to vector<16x8xf32>
    %265 = arith.mulf %236, %264 : vector<16x8xf32>
    %266 = tpu.concatenate %265, %265, %265, %265 in 0 : vector<16x8xf32>, vector<16x8xf32>, vector<16x8xf32>, vector<16x8xf32> -> vector<64x8xf32>
    %cst_104 = arith.constant 0.000000e+00 : f32
    %267 = vector.broadcast %cst_104 : f32 to vector<64x8xf32>
    %268 = arith.select %263, %266, %267 : vector<64x8xi1>, vector<64x8xf32>
    %cst_105 = arith.constant dense<0.000000e+00> : vector<64x32xf32>
    %269 = tpu.matmul %268, %241, %cst_105 {dimension_numbers = #tpu.dot_dimension_numbers<[1], [1], [0], [0], [0, 0, 1, 0], [], []>} : vector<64x8xf32>, vector<32x8xf32>, vector<64x32xf32> -> vector<64x32xf32>
    %270 = tpu.iota {dimensions = array<i32: 0>} : vector<64x32xi32>
    %271 = arith.sitofp %270 : vector<64x32xi32> to vector<64x32xf32>
    %cst_106 = arith.constant 5.000000e-01 : f32
    %272 = vector.broadcast %cst_106 : f32 to vector<64x32xf32>
    %273 = arith.addf %271, %272 : vector<64x32xf32>
    %cst_107 = arith.constant 1.250000e-01 : f32
    %274 = vector.broadcast %cst_107 : f32 to vector<64x32xf32>
    %275 = arith.mulf %273, %274 : vector<64x32xf32>
    %276 = math.floor %275 : vector<64x32xf32>
    %cst_108 = arith.constant 5.000000e-01 : f32
    %277 = vector.broadcast %cst_108 : f32 to vector<64x32xf32>
    %278 = arith.addf %271, %277 : vector<64x32xf32>
    %cst_109 = arith.constant 6.250000e-02 : f32
    %279 = vector.broadcast %cst_109 : f32 to vector<64x32xf32>
    %280 = arith.mulf %278, %279 : vector<64x32xf32>
    %281 = math.floor %280 : vector<64x32xf32>
    %cst_110 = arith.constant 2.000000e+00 : f32
    %282 = vector.broadcast %cst_110 : f32 to vector<64x32xf32>
    %283 = arith.mulf %282, %281 : vector<64x32xf32>
    %284 = arith.subf %276, %283 : vector<64x32xf32>
    %285 = tpu.iota {dimensions = array<i32: 1>} : vector<64x32xi32>
    %286 = arith.sitofp %285 : vector<64x32xi32> to vector<64x32xf32>
    %cst_111 = arith.constant 5.000000e-01 : f32
    %287 = vector.broadcast %cst_111 : f32 to vector<64x32xf32>
    %288 = arith.addf %286, %287 : vector<64x32xf32>
    %cst_112 = arith.constant 6.250000e-02 : f32
    %289 = vector.broadcast %cst_112 : f32 to vector<64x32xf32>
    %290 = arith.mulf %288, %289 : vector<64x32xf32>
    %291 = math.floor %290 : vector<64x32xf32>
    %292 = arith.cmpf oeq, %284, %291 : vector<64x32xf32>
    %cst_113 = arith.constant -1.000000e+30 : f32
    %293 = vector.broadcast %cst_113 : f32 to vector<64x32xf32>
    %294 = arith.select %292, %269, %293 : vector<64x32xi1>, vector<64x32xf32>
    %cst_114 = arith.constant dense<0xFF800000> : vector<64xf32>
    %295 = vector.multi_reduction <maximumf>, %294, %cst_114 [1] : vector<64x32xf32> to vector<64xf32>
    %296 = vector.shape_cast %295 : vector<64xf32> to vector<64x1xf32>
    %297 = vector.broadcast %296 : vector<64x1xf32> to vector<64x32xf32>
    %298 = arith.subf %294, %297 : vector<64x32xf32>
    %299 = math.exp %298 : vector<64x32xf32>
    %cst_115 = arith.constant dense<0.000000e+00> : vector<64xf32>
    %300 = vector.multi_reduction <add>, %299, %cst_115 [1] : vector<64x32xf32> to vector<64xf32>
    %301 = vector.shape_cast %300 : vector<64xf32> to vector<64x1xf32>
    %302 = tpu.reciprocal %301 {approx = true} : vector<64x1xf32> -> vector<64x1xf32>
    %303 = vector.broadcast %302 : vector<64x1xf32> to vector<64x32xf32>
    %304 = arith.mulf %299, %303 : vector<64x32xf32>
    %cst_116 = arith.constant dense<0.000000e+00> : vector<64x8xf32>
    %305 = tpu.matmul %304, %246, %cst_116 {dimension_numbers = #tpu.dot_dimension_numbers<[1], [0], [0], [1], [0, 0, 1, 1], [], []>} : vector<64x32xf32>, vector<32x8xf32>, vector<64x8xf32> -> vector<64x8xf32>
    %cst_117 = arith.constant 0.000000e+00 : f32
    %306 = vector.broadcast %cst_117 : f32 to vector<64x8xf32>
    %307 = arith.select %263, %305, %306 : vector<64x8xi1>, vector<64x8xf32>
    %308 = vector.extract_strided_slice %307 {offsets = [0, 0], sizes = [16, 8], strides = [1, 1]} : vector<64x8xf32> to vector<16x8xf32>
    %309 = vector.extract_strided_slice %307 {offsets = [16, 0], sizes = [16, 8], strides = [1, 1]} : vector<64x8xf32> to vector<16x8xf32>
    %310 = arith.addf %308, %309 : vector<16x8xf32>
    %311 = vector.extract_strided_slice %307 {offsets = [32, 0], sizes = [16, 8], strides = [1, 1]} : vector<64x8xf32> to vector<16x8xf32>
    %312 = arith.addf %310, %311 : vector<16x8xf32>
    %313 = vector.extract_strided_slice %307 {offsets = [48, 0], sizes = [16, 8], strides = [1, 1]} : vector<64x8xf32> to vector<16x8xf32>
    %314 = arith.addf %312, %313 : vector<16x8xf32>
    %cst_118 = arith.constant dense<0.000000e+00> : vector<16x8xf32>
    %315 = tpu.matmul %314, %247, %cst_118 {dimension_numbers = #tpu.dot_dimension_numbers<[1], [0], [0], [1], [0, 0, 1, 1], [], []>} : vector<16x8xf32>, vector<8x8xf32>, vector<16x8xf32> -> vector<16x8xf32>
    %316 = vector.broadcast %248 : vector<1x8xf32> to vector<16x8xf32>
    %317 = arith.addf %315, %316 : vector<16x8xf32>
    %318 = arith.addf %231, %317 : vector<16x8xf32>
    %c312 = arith.constant 312 : index
    %c0_119 = arith.constant 0 : index
    %319 = vector.load %arg3[%c312, %c0_119] : memref<352x16xf32, #tpu.memory_space<vmem>>, vector<8x16xf32>
    %cst_120 = arith.constant dense<0.000000e+00> : vector<16x16xf32>
    %320 = tpu.matmul %318, %319, %cst_120 {dimension_numbers = #tpu.dot_dimension_numbers<[1], [0], [0], [1], [0, 0, 1, 1], [], []>} : vector<16x8xf32>, vector<8x16xf32>, vector<16x16xf32> -> vector<16x16xf32>
    %c320 = arith.constant 320 : index
    %c0_121 = arith.constant 0 : index
    %321 = vector.load %arg3[%c320, %c0_121] : memref<352x16xf32, #tpu.memory_space<vmem>>, vector<1x16xf32>
    %322 = vector.broadcast %321 : vector<1x16xf32> to vector<16x16xf32>
    %323 = arith.addf %320, %322 : vector<16x16xf32>
    %c328 = arith.constant 328 : index
    %c0_122 = arith.constant 0 : index
    %324 = vector.load %arg3[%c328, %c0_122] : memref<352x16xf32, #tpu.memory_space<vmem>>, vector<16x8xf32>
    %cst_123 = arith.constant dense<0.000000e+00> : vector<16x8xf32>
    %325 = tpu.matmul %323, %324, %cst_123 {dimension_numbers = #tpu.dot_dimension_numbers<[1], [0], [0], [1], [0, 0, 1, 1], [], []>} : vector<16x16xf32>, vector<16x8xf32>, vector<16x8xf32> -> vector<16x8xf32>
    %c344 = arith.constant 344 : index
    %c0_124 = arith.constant 0 : index
    %326 = vector.load %arg3[%c344, %c0_124] : memref<352x16xf32, #tpu.memory_space<vmem>>, vector<1x8xf32>
    %327 = vector.broadcast %326 : vector<1x8xf32> to vector<16x8xf32>
    %328 = arith.addf %325, %327 : vector<16x8xf32>
    %329 = arith.addf %318, %328 : vector<16x8xf32>
    %c64 = arith.constant 64 : index
    %c0_125 = arith.constant 0 : index
    %330 = vector.load %arg3[%c64, %c0_125] : memref<352x16xf32, #tpu.memory_space<vmem>>, vector<8x4xf32>
    %cst_126 = arith.constant dense<0.000000e+00> : vector<16x4xf32>
    %331 = tpu.matmul %329, %330, %cst_126 {dimension_numbers = #tpu.dot_dimension_numbers<[1], [0], [0], [1], [0, 0, 1, 1], [], []>} : vector<16x8xf32>, vector<8x4xf32>, vector<16x4xf32> -> vector<16x4xf32>
    %c72 = arith.constant 72 : index
    %c0_127 = arith.constant 0 : index
    %332 = vector.load %arg3[%c72, %c0_127] : memref<352x16xf32, #tpu.memory_space<vmem>>, vector<1x4xf32>
    %333 = vector.broadcast %332 : vector<1x4xf32> to vector<16x4xf32>
    %334 = arith.addf %331, %333 : vector<16x4xf32>
    %cst_128 = arith.constant 0.000000e+00 : f32
    %335 = vector.broadcast %cst_128 : f32 to vector<16x4xf32>
    %336 = arith.subf %335, %334 : vector<16x4xf32>
    %337 = math.exp %336 : vector<16x4xf32>
    %cst_129 = arith.constant 1.000000e+00 : f32
    %338 = vector.broadcast %cst_129 : f32 to vector<16x4xf32>
    %339 = arith.addf %338, %337 : vector<16x4xf32>
    %cst_130 = arith.constant 1.000000e+00 : f32
    %340 = vector.broadcast %cst_130 : f32 to vector<16x4xf32>
    %341 = arith.divf %340, %339 : vector<16x4xf32>
    %c0_131 = arith.constant 0 : index
    %c0_132 = arith.constant 0 : index
    %342 = vector.load %arg4[%c0_131, %c0_132] : memref<16x4xf32, #tpu.memory_space<vmem>>, vector<16x4xf32>
    tpu.vector_store %arg4[%c0_131, %c0_132], %341 {strides = array<i32>} : memref<16x4xf32, #tpu.memory_space<vmem>>, vector<16x4xf32>,
    return
  }
}

</mosaic_0001>

<bundles_post_ra>
// kernel: temporal_forward.1
= control target key start
LH: loop header
LB: loop body
LE: loop exit
PB: predicated region body
PF: predicated region fallthrough
CT: control target
= control target key end

     0   :  { %vm952_vm0 = vcmask 1043456   ;;  %vm6887_vm1 = vcmask 31744   ;;  %v40_v0 = vlaneseq  ;;  %vm27_vm2 = vcmask 1040384   ;;  %s6881_s3 = inlined_call_operand.vmem [shape: f32[352,16], index: 3, kind: input, shape index: {}]   ;;  %s6882_s0 = inlined_call_operand.vmem [shape: f32[32,4], index: 0, kind: input, shape index: {}]   ;;  %s6883_s2 = inlined_call_operand.vmem [shape: f32[32,8], index: 2, kind: input, shape index: {}]   ;;  %s6884_s1 = inlined_call_operand.vmem [shape: f32[16,4], index: 1, kind: input, shape index: {}]   ;;  %s6885_s5 = inlined_call_operand.vmem [shape: f32[32,8], index: 5, kind: output, shape index: {1}]   ;;  %s6886_s4 = inlined_call_operand.vmem [shape: f32[16,4], index: 4, kind: output, shape index: {0}]  }
   0x1   :  { %v933_v1 = vld [vmem:[%s6881_s3 + $0x20] sm:$0xf]  ;;  %v930_v3 = vld [vmem:[%s6882_s0 + $0x8] sm:$0xff]  ;;  %v931_v4 = vld [vmem:[%s6882_s0 + $0x10] sm:$0xff] }
   0x2   :  { %v929_v2 = vld [vmem:[%s6882_s0] sm:$0xff]  ;;  %4721 = vmatprep.subr.msk.mxu0 %vm952_vm0, %v933_v1  ;;  %v5273_v6 = vshrl.u32 %v40_v0, 7  ;;  %v5282_v8 = vld [vmem:[%s6883_s2 + $0x8] sm:$0xff]  ;;  %v932_v10 = vld [vmem:[%s6882_s0 + $0x18] sm:$0xff] }
   0x3   :  { %4723 = vmatprep.mubr.msk.f32.mxu0 %vm6887_vm1, %v929_v2  ;;  %v1243_v5 = vld [vmem:[%s6881_s3 + $0x60] sm:$0xff]  ;;  %4722 = vmatpush3.msk.msra.mxu0 %vm952_vm0, %v933_v1  ;;  %v29_v13 = vrot.slane %v5282_v8, 7  ;;  %v21_v32 = vld [vmem:[%s6883_s2 + $0x10] sm:$0xff]  ;;  %v22_v33 = vld [vmem:[%s6883_s2 + $0x18] sm:$0xff] }
   0x4   :  { %v19_v7 = vld [vmem:[%s6883_s2] sm:$0xff]  ;;  %4724 = vmatmul.mubr.msk.f32.vlgmr.msra.gmra.mrb[0].mxu0 %vm6887_vm1, %v930_v3  ;;  %4742 = vmatprep.subr.mxu0 %v1243_v5  ;;  %v42_v9 = vadd.s32 8, %v5273_v6  ;;  %v45_v11 = vcvt.s32.f32 %v5273_v6  ;;  %v44_v17 = vadd.s32 24, %v5273_v6  ;;  %v43_v34 = vadd.s32 16, %v5273_v6  ;;  %v86_v42 = vld [vmem:[%s6881_s3 + $0x8] sm:$0xff]  ;;  %v88_v49 = vld [vmem:[%s6881_s3 + $0x18] sm:$0xff] }
   0x5   :  { %4726 = vmatprep.mubr.msk.f32.mxu0 %vm6887_vm1, %v931_v4  ;;  %4743 = vmatpush3.msra.mxu0 %v1243_v5  ;;  %v28_v12 = vrot.slane %v19_v7, 7  ;;  %v31_v36 = vrot.slane %v21_v32, 7  ;;  %v33_v37 = vrot.slane %v22_v33, 7  ;;  %v85_v51 = vld [vmem:[%s6881_s3] sm:$0xff]  ;;  %v87_v56 = vld [vmem:[%s6881_s3 + $0x10] sm:$0xff] }
   0x6   :  { %v46_v14 = vcvt.s32.f32 %v42_v9  ;;  %v5292_v15 = vadd.f32 0.5, %v45_v11  ;;  %v48_v21 = vcvt.s32.f32 %v44_v17  ;;  %v47_v40 = vcvt.s32.f32 %v43_v34 }
   0x7   :  { %v30_v19 = vsel %vm27_vm2, %v28_v12, %v29_v13  ;;  %v39_v27 = vsel %vm27_vm2, %v19_v7, %v28_v12  ;;  %v34_v44 = vsel %vm27_vm2, %v31_v36, %v33_v37  ;;  %v32_v62 = vsel %vm27_vm2, %v29_v13, %v31_v36 }
   0x8   :  { %6929 = vst [vmem:[#allocation2_spill] sm:$0xff] %v5292_v15  ;;  %4727 = vmatmul.mubr.msk.f32.gmra.mrb[2].mxu0 %vm6887_vm1, %v932_v10  ;;  %v5295_v16 = vadd.f32 0.5, %v46_v14  ;;  %v53_v18 = vmul.f32 0.0625, %v5292_v15  ;;  %v70_v24 = vsub.f32 %v5282_v8, %v30_v19  ;;  %v5306_v25 = vadd.f32 0.5, %v48_v21 }
   0x9   :  { %v69_v31 = vsub.f32 %v19_v7, %v39_v27  ;;  %v5326_v46 = vadd.f32 0.5, %v47_v40  ;;  %v72_v48 = vsub.f32 %v22_v33, %v34_v44  ;;  %v71_v3 = vsub.f32 %v21_v32, %v32_v62 }
   0xa   :  { %6930 = vst [vmem:[#allocation3_spill] sm:$0xff] %v5295_v16  ;;  %v54_v20 = vmul.f32 0.0625, %v5295_v16  ;;  %v5301_v22 = vfloor.f32 %v53_v18  ;;  %6931 = vst [vmem:[#allocation4_spill] sm:$0xff] %v5306_v25  ;;  %v56_v30 = vmul.f32 0.0625, %v5306_v25  ;;  %v5221_v44 = vmov 1326507024  }
   0xb   :  { %6932 = vst [vmem:[#allocation5_spill] sm:$0xff] %v5326_v46  ;;  %v55_v52 = vmul.f32 0.0625, %v5326_v46 }
   0xc   :  { %v5303_v23 = vfloor.f32 %v54_v20  ;;  %v61_v28 = vmul.f32 16.0, %v5301_v22  ;;  %v5319_v38 = vfloor.f32 %v56_v30 }
   0xd   :  { %v5340_v58 = vfloor.f32 %v55_v52 }
   0xe   :  { %v62_v26 = vmul.f32 16.0, %v5303_v23  ;;  %vm65_vm4 = vcmp.eq.f32.partialorder %v61_v28, %v45_v11  ;;  %v64_v45 = vmul.f32 16.0, %v5319_v38 }
   0xf   :  { %v73_v39 = vsel %vm65_vm4, 0.0, %v69_v31  ;;  %v63_v63 = vmul.f32 16.0, %v5340_v58 }
  0x10   :  { %vm66_vm3 = vcmp.eq.f32.partialorder %v62_v26, %v46_v14  ;;  %v77_v43 = vmul.f32 5760.3687, %v73_v39  ;;  %vm68_vm5 = vcmp.eq.f32.partialorder %v64_v45, %v48_v21  ;;  %v5219_v39 = vmov 2102212464  }
  0x11   :  { %v74_v29 = vsel %vm66_vm3, 0.0, %v70_v24  ;;  %v76_v54 = vsel %vm68_vm5, 0.0, %v72_v48  ;;  %vm67_vm6 = vcmp.eq.f32.partialorder %v63_v63, %v47_v40 }
  0x12   :  { %v78_v35 = vmul.f32 5760.3687, %v74_v29  ;;  %v5041_v50 = vround.rtne.f32 %v77_v43  ;;  %v80_v57 = vmul.f32 5760.3687, %v76_v54  ;;  %v75_v8 = vsel %vm67_vm6, 0.0, %v71_v3 }
  0x13   :  { %v79_v12 = vmul.f32 5760.3687, %v75_v8  ;;  %v5224_v54 = vmov 2131351028  }
  0x14   :  { %v5042_v41 = vround.rtne.f32 %v78_v35  ;;  %v89_v55 = vmul.f32 %v5041_v50, %v85_v51  ;;  %v5044_v61 = vround.rtne.f32 %v80_v57 }
  0x15   :  { %v5043_v17 = vround.rtne.f32 %v79_v12 }
  0x16   :  { %v90_v47 = vmul.f32 %v5042_v41, %v86_v42  ;;  %v5343_v60 = vadd.f32 %v89_v55, %v87_v56  ;;  %v92_v4 = vmul.f32 %v5044_v61, %v86_v42  ;;  %v5220_v41 = vmov 920167782  }
  0x17   :  { %v91_v21 = vmul.f32 %v5043_v17, %v85_v51 }
  0x18   :  { %v5335_v53 = vadd.f32 %v90_v47, %v88_v49  ;;  %v100_v2 = vand.u32 2139095040, %v5343_v60  ;;  %v5348_v9 = vadd.f32 %v92_v4, %v88_v49  ;;  %v97_v20 = vand.u32 2147483647, %v5343_v60 }
  0x19   :  { %v5357_v30 = vadd.f32 %v91_v21, %v87_v56  ;;  %v5222_v47 = vmov 683565275   ;;  %v5223_v49 = vmov 2475754826  }
  0x1a   :  { %v204_v59 = vand.u32 2139095040, %v5335_v53  ;;  %v101_v7 = vshrl.u32 %v100_v2, 23  ;;  %v412_v14 = vand.u32 2139095040, %v5348_v9  ;;  %v201_v28 = vand.u32 2147483647, %v5335_v53 }
  0x1b   :  { %v5355_v29 = vand.u32 8388607, %v97_v20  ;;  %v308_v37 = vand.u32 2139095040, %v5357_v30  ;;  %v409_v62 = vand.u32 2147483647, %v5348_v9 }
  0x1c   :  { %v205_v1 = vshrl.u32 %v204_v59, 23  ;;  %v4377_v11 = vadd.s32 4294967169, %v101_v7  ;;  %v413_v19 = vshrl.u32 %v412_v14, 23  ;;  %v5363_v34 = vand.u32 8388607, %v201_v28 }
  0x1d   :  { %v105_v36 = vor.u32 8388608, %v5355_v29  ;;  %v309_v63 = vshrl.u32 %v308_v37, 23 }
  0x1e   :  { %v4381_v5 = vadd.s32 4294967169, %v205_v1  ;;  %v107_v13 = vadd.s32 1, %v4377_v11  ;;  %v4389_v26 = vadd.s32 4294967169, %v413_v19  ;;  %v209_v59 = vor.u32 8388608, %v5363_v34 }
  0x20   :  { %v211_v10 = vadd.s32 1, %v4381_v5  ;;  %vm108_vm8 = vcmp.gt.s32.totalorder %v107_v13, 0  ;;  %v419_v33 = vadd.s32 1, %v4389_v26 }
  0x21   :  { %v109_v27 = vsel %vm108_vm8, %v107_v13, 0 }
  0x22   :  { %vm212_vm7 = vcmp.gt.s32.totalorder %v211_v10, 0  ;;  %v111_v32 = vand.u32 31, %v109_v27  ;;  %vm420_vm9 = vcmp.gt.s32.totalorder %v419_v33, 0  ;;  %v5387_v61 = vshrl.u32 %v109_v27, 5 }
  0x23   :  { %v213_v18 = vsel %vm212_vm7, %v211_v10, 0  ;;  %v421_v4 = vsel %vm420_vm9, %v419_v33, 0 }
  0x24   :  { %v215_v24 = vand.u32 31, %v213_v18  ;;  %v5365_v35 = vshrl.u32 %v213_v18, 5  ;;  %v5377_v51 = vsub.s32 32, %v111_v32  ;;  %v114_v3 = vshll.u32 %v5222_v47, %v111_v32 }
  0x25   :  { %v117_v5 = vshll.u32 %v5223_v49, %v111_v32  ;;  %v123_v7 = vshll.u32 %v5219_v39, %v111_v32  ;;  %v120_v17 = vshll.u32 %v5224_v54, %v111_v32  ;;  %v423_v18 = vand.u32 31, %v421_v4 }
  0x26   :  { %v5359_v31 = vsub.s32 32, %v215_v24  ;;  %v227_v40 = vshll.u32 %v5219_v39, %v215_v24  ;;  %v230_v43 = vshll.u32 %v5220_v41, %v215_v24  ;;  %v218_v48 = vshll.u32 %v5222_v47, %v215_v24 }
  0x27   :  { %v221_v50 = vshll.u32 %v5223_v49, %v215_v24  ;;  %v224_v56 = vshll.u32 %v5224_v54, %v215_v24  ;;  %vm236_vm10 = vcmp.lt.s32.totalorder %v5365_v35, 4  ;;  %v124_v8 = vshrl.u32 %v5220_v41, %v5377_v51 }
  0x28   :  { %v228_v42 = vshrl.u32 %v5220_v41, %v5359_v31  ;;  %v231_v45 = vshrl.u32 %v5221_v44, %v5359_v31  ;;  %v219_v52 = vshrl.u32 %v5223_v49, %v5359_v31  ;;  %v222_v55 = vshrl.u32 %v5224_v54, %v5359_v31 }
  0x29   :  { %v225_v57 = vshrl.u32 %v5219_v39, %v5359_v31  ;;  %v115_v14 = vshrl.u32 %v5223_v49, %v5377_v51  ;;  %vm233_vm11 = vcmp.lt.s32.totalorder %v5365_v35, 1  ;;  %v118_v13 = vshrl.u32 %v5224_v54, %v5377_v51 }
  0x2a   :  { %v229_v1 = vor.u32 %v228_v42, %v227_v40  ;;  %v232_v2 = vor.u32 %v231_v45, %v230_v43  ;;  %v5396_v10 = vor.u32 %v219_v52, %v218_v48  ;;  %v5398_v11 = vor.u32 %v222_v55, %v221_v50 }
  0x2b   :  { %v226_v12 = vor.u32 %v225_v57, %v224_v56  ;;  %vm235_vm12 = vcmp.lt.s32.totalorder %v5365_v35, 3  ;;  %v121_v24 = vshrl.u32 %v5219_v39, %v5377_v51  ;;  %vm234_vm13 = vcmp.lt.s32.totalorder %v5365_v35, 2 }
  0x2c   :  { %v242_v19 = vsel %vm236_vm10, %v229_v1, 920167782  ;;  %v246_v21 = vsel %vm236_vm10, %v232_v2, 1326507024  ;;  %v125_v26 = vor.u32 %v124_v8, %v123_v7  ;;  %v126_v27 = vshll.u32 %v5220_v41, %v111_v32 }
  0x2d   :  { %v127_v29 = vshrl.u32 %v5221_v44, %v5377_v51  ;;  %v241_v33 = vsel %vm233_vm11, %v5396_v10, %v5398_v11  ;;  %v245_v34 = vsel %vm233_vm11, %v5398_v11, %v226_v12  ;;  %v5424_v37 = vor.u32 %v115_v14, %v114_v3 }
  0x2e   :  { %vm132_vm14 = vcmp.lt.s32.totalorder %v5387_v61, 4  ;;  %v243_v40 = vsel %vm235_vm12, %v226_v12, %v242_v19  ;;  %v247_v32 = vsel %vm235_vm12, %v229_v1, %v246_v21  ;;  %v5431_v42 = vor.u32 %v118_v13, %v117_v5 }
  0x2f   :  { %v5433_v43 = vsub.s32 32, %v423_v18  ;;  %v5435_v45 = vor.u32 %v121_v24, %v120_v17  ;;  %vm129_vm15 = vcmp.lt.s32.totalorder %v5387_v61, 1  ;;  %v5438_v48 = vshll.u32 %v105_v36, 8 }
  0x30   :  { %v128_v50 = vor.u32 %v127_v29, %v126_v27  ;;  %vm131_vm2 = vcmp.lt.s32.totalorder %v5387_v61, 3  ;;  %v138_v52 = vsel %vm132_vm14, %v125_v26, 920167782  ;;  %v4385_v55 = vadd.s32 4294967169, %v309_v63 }
  0x31   :  { %v244_v56 = vsel %vm234_vm13, %v241_v33, %v243_v40  ;;  %v248_v57 = vsel %vm234_vm13, %v245_v34, %v247_v32  ;;  %v5447_v1 = vshll.u32 %v209_v59, 8  ;;  %v416_v2 = vand.u32 8388607, %v409_v62 }
  0x32   :  { %vm130_vm3 = vcmp.lt.s32.totalorder %v5387_v61, 2  ;;  %v137_v36 = vsel %vm129_vm15, %v5424_v37, %v5431_v42  ;;  %v435_v63 = vshll.u32 %v5219_v39, %v423_v18  ;;  %v436_v3 = vshrl.u32 %v5220_v41, %v5433_v43 }
  0x33   :  { %v139_v59 = vsel %vm131_vm2, %v5435_v45, %v138_v52  ;;  %v5462_v5 = vshrl.u32 %v421_v4, 5  ;;  %v438_v7 = vshll.u32 %v5220_v41, %v423_v18  ;;  %v439_v8 = vshrl.u32 %v5221_v44, %v5433_v43 }
  0x34   :  { %v142_v14 = vsel %vm132_vm14, %v128_v50, 1326507024  ;;  %v426_v13 = vshll.u32 %v5222_v47, %v423_v18  ;;  %v429_v17 = vshll.u32 %v5223_v49, %v423_v18  ;;  %v315_v19 = vadd.s32 1, %v4385_v55 }
  0x35   :  { %v427_v21 = vshrl.u32 %v5223_v49, %v5433_v43  ;;  %v430_v4 = vshrl.u32 %v5224_v54, %v5433_v43  ;;  %v432_v24 = vshll.u32 %v5224_v54, %v423_v18  ;;  %v433_v27 = vshrl.u32 %v5219_v39, %v5433_v43 }
  0x36   :  { %v217_v29 = vshrl.u32 %v5222_v47, %v5359_v31  ;;  %v5481_v33 = vmul.u32.u64.low %v5447_v1, %v248_v57  ;;  %v5482_v34 = vmul.u32.u64.high %v5447_v1, %v248_v57, %v5481_v33  ;;  %v437_v40 = vor.u32 %v436_v3, %v435_v63 }
  0x37   :  { %v5485_v32 = vmul.u32.u64.low %v5447_v1, %v244_v56  ;;  %v5486_v50 = vmul.u32.u64.high %v5447_v1, %v244_v56, %v5485_v32  ;;  %v440_v52 = vor.u32 %v439_v8, %v438_v7  ;;  %vm444_vm4 = vcmp.lt.s32.totalorder %v5462_v5, 4  ;;  %v1047_v56 = vld [vmem:[%s6881_s3 + $0x30] sm:$0xf] }
  0x38   :  { %v238_v18 = vsel %vm236_vm10, %v226_v12, 2102212464  ;;  %v140_v55 = vsel %vm130_vm3, %v137_v36, %v139_v59  ;;  %v141_v31 = vsel %vm129_vm15, %v5431_v42, %v5435_v45  ;;  %v143_v57 = vsel %vm131_vm2, %v125_v26, %v142_v14  ;;  %4729 = vmatprep.subr.msk.mxu1 %vm952_vm0, %v1047_v56  ;;  %v1045_v12 = vld [vmem:[%s6884_s1] sm:$0xff]  ;;  %v1046_v26 = vld [vmem:[%s6884_s1 + $0x8] sm:$0xff] }
  0x39   :  { %v428_v63 = vor.u32 %v427_v21, %v426_v13  ;;  %v431_v36 = vor.u32 %v430_v4, %v429_v17  ;;  %v434_v3 = vor.u32 %v433_v27, %v432_v24  ;;  %vm316_vm5 = vcmp.gt.s32.totalorder %v315_v19, 0  ;;  %4730 = vmatpush3.msk.msra.mxu1 %vm952_vm0, %v1047_v56  ;;  %4731 = vmatprep.mubr.msk.f32.mxu1 %vm6887_vm1, %v1045_v12 }
  0x3a   :  { %vm441_vm6 = vcmp.lt.s32.totalorder %v5462_v5, 1  ;;  %vm443_vm7 = vcmp.lt.s32.totalorder %v5462_v5, 3  ;;  %v450_v59 = vsel %vm444_vm4, %v437_v40, 920167782  ;;  %v113_v7 = vshrl.u32 %v5222_v47, %v5377_v51  ;;  %4732 = vmatmul.mubr.msk.f32.vlgmr.msra.gmra.mrb[0].mxu1 %vm6887_vm1, %v1046_v26  ;;  %v1139_v51 = vld [vmem:[%s6881_s3 + $0x50] sm:$0xff] }
  0x3b   :  { %v144_v8 = vsel %vm130_vm3, %v141_v31, %v143_v57  ;;  %v417_v14 = vor.u32 8388608, %v416_v2  ;;  %v454_v13 = vsel %vm444_vm4, %v440_v52, 1326507024  ;;  %v237_v17 = vsel %vm233_vm11, %v217_v29, %v5396_v10  ;;  %4734 = vmatprep.subr.mxu1 %v1139_v51 }
  0x3c   :  { %v5527_v21 = vmul.u32.u64.low %v5438_v48, %v140_v55  ;;  %v5528_v4 = vmul.u32.u64.high %v5438_v48, %v140_v55, %v5527_v21  ;;  %v317_v24 = vsel %vm316_vm5, %v315_v19, 0  ;;  %v239_v2 = vsel %vm235_vm12, %v5398_v11, %v238_v18  ;;  %4735 = vmatpush3.msra.mxu1 %v1139_v51 }
  0x3d   :  { %vm442_vm0 = vcmp.lt.s32.totalorder %v5462_v5, 2  ;;  %v449_v27 = vsel %vm441_vm6, %v428_v63, %v431_v36  ;;  %v451_v10 = vsel %vm443_vm7, %v434_v3, %v450_v59  ;;  %v453_v33 = vsel %vm441_vm6, %v431_v36, %v434_v3 }
  0x3e   :  { %v5543_v29 = vmul.u32.u64.low %v5438_v48, %v144_v8  ;;  %v5544_v19 = vmul.u32.u64.high %v5438_v48, %v144_v8, %v5543_v29  ;;  %v455_v52 = vsel %vm443_vm7, %v437_v40, %v454_v13  ;;  %v134_v11 = vsel %vm132_vm14, %v5435_v45, 2102212464 }
  0x3f   :  { %v5553_v18 = vshll.u32 %v417_v14, 8  ;;  %v319_v55 = vand.u32 31, %v317_v24  ;;  %v452_v31 = vsel %vm442_vm0, %v449_v27, %v451_v10  ;;  %v240_v57 = vsel %vm234_vm13, %v237_v17, %v239_v2 }
  0x40   :  { %v259_v56 = vadd.s32 1, %v5486_v50  ;;  %v456_v12 = vsel %vm442_vm0, %v453_v33, %v455_v52  ;;  %vm258_vm8 = vc.u32 %v5482_v34, %v5485_v32  ;;  %v133_v45 = vsel %vm129_vm15, %v113_v7, %v5424_v37 }
  0x41   :  { %v135_v40 = vsel %vm131_vm2, %v5431_v42, %v134_v11  ;;  %v425_v35 = vshrl.u32 %v5222_v47, %v5433_v43  ;;  %v446_v26 = vsel %vm444_vm4, %v434_v3, 2102212464  ;;  %v320_v14 = vsub.s32 32, %v319_v55  ;;  %v5587_v42 = vld [vmem:[%s6881_s3 + $0x70] sm:$0xff] }
  0x42   :  { %v5575_v59 = vmul.u32.u64.low %v5553_v18, %v452_v31  ;;  %v5576_v8 = vmul.u32.u64.high %v5553_v18, %v452_v31, %v5575_v59  ;;  %v5580_v13 = vmul.u32.u64.low %v5553_v18, %v456_v12  ;;  %v5581_v17 = vmul.u32.u64.high %v5553_v18, %v456_v12, %v5580_v13  ;;  %4750 = vmatprep.subr.mxu1 %v5587_v42 }
  0x43   :  { %v305_v37 = vand.u32 2147483647, %v5357_v30  ;;  %v256_v43 = vmul.u32 %v5447_v1, %v240_v57  ;;  %v260_v3 = vsel %vm258_vm8, %v259_v56, %v5486_v50  ;;  %v136_v7 = vsel %vm130_vm3, %v133_v45, %v135_v40 }
  0x44   :  { %v155_v51 = vadd.s32 1, %v5528_v4  ;;  %vm154_vm9 = vc.u32 %v5544_v19, %v5527_v21  ;;  %v445_v2 = vsel %vm441_vm6, %v425_v35, %v428_v63  ;;  %v447_v27 = vsel %vm443_vm7, %v431_v36, %v446_v26 }
  0x45   :  { %v318_v10 = vshrl.u32 %v317_v24, 5  ;;  %v331_v1 = vshll.u32 %v5219_v39, %v319_v55  ;;  %v332_v50 = vshrl.u32 %v5220_v41, %v320_v14  ;;  %v334_v61 = vshll.u32 %v5220_v41, %v319_v55 }
  0x46   :  { %v335_v29 = vshrl.u32 %v5221_v44, %v320_v14  ;;  %v325_v33 = vshll.u32 %v5223_v49, %v319_v55  ;;  %v326_v52 = vshrl.u32 %v5224_v54, %v320_v14  ;;  %v328_v11 = vshll.u32 %v5224_v54, %v319_v55 }
  0x47   :  { %v329_v63 = vshrl.u32 %v5219_v39, %v320_v14  ;;  %v322_v31 = vshll.u32 %v5222_v47, %v319_v55  ;;  %v323_v36 = vshrl.u32 %v5223_v49, %v320_v14  ;;  %v261_v24 = vadd.s32 %v260_v3, %v256_v43 }
  0x48   :  { %v152_v57 = vmul.u32 %v5438_v48, %v136_v7  ;;  %v156_v41 = vsel %vm154_vm9, %v155_v51, %v5528_v4  ;;  %v312_v44 = vand.u32 8388607, %v305_v37  ;;  %v448_v54 = vsel %vm442_vm0, %v445_v2, %v447_v27 }
  0x49   :  { %v467_v39 = vadd.s32 1, %v5576_v8  ;;  %v333_v56 = vor.u32 %v332_v50, %v331_v1  ;;  %v336_v55 = vor.u32 %v335_v29, %v334_v61  ;;  %vm466_vm10 = vc.u32 %v5581_v17, %v5575_v59 }
  0x4a   :  { %v327_v49 = vor.u32 %v326_v52, %v325_v33  ;;  %v330_v48 = vor.u32 %v329_v63, %v328_v11  ;;  %vm340_vm11 = vcmp.lt.s32.totalorder %v318_v10, 4  ;;  %v324_v12 = vor.u32 %v323_v36, %v322_v31 }
  0x4b   :  { %vm337_vm12 = vcmp.lt.s32.totalorder %v318_v10, 1  ;;  %vm339_vm13 = vcmp.lt.s32.totalorder %v318_v10, 3  ;;  %v262_v4 = vadd.s32 536870912, %v261_v24  ;;  %v157_v45 = vadd.s32 %v156_v41, %v152_v57 }
  0x4c   :  { %v313_v40 = vor.u32 8388608, %v312_v44  ;;  %v464_v35 = vmul.u32 %v5553_v18, %v448_v54  ;;  %v468_v5 = vsel %vm466_vm10, %v467_v39, %v5576_v8  ;;  %v346_v26 = vsel %vm340_vm11, %v333_v56, 920167782 }
  0x4d   :  { %v350_v13 = vsel %vm340_vm11, %v336_v55, 1326507024  ;;  %v321_v43 = vshrl.u32 %v5222_v47, %v320_v14  ;;  %vm338_vm14 = vcmp.lt.s32.totalorder %v318_v10, 2  ;;  %v349_v3 = vsel %vm337_vm12, %v327_v49, %v330_v48 }
  0x4e   :  { %v351_v7 = vsel %vm339_vm13, %v333_v56, %v350_v13  ;;  %v342_v51 = vsel %vm340_vm11, %v330_v48, 2102212464  ;;  %v345_v2 = vsel %vm337_vm12, %v324_v12, %v327_v49  ;;  %v347_v27 = vsel %vm339_vm13, %v330_v48, %v346_v26 }
  0x4f   :  { %v5630_v1 = vshrl.u32 %v262_v4, 30  ;;  %v353_v50 = vshll.u32 %v313_v40, 8  ;;  %v469_v18 = vadd.s32 %v468_v5, %v464_v35  ;;  %v352_v8 = vsel %vm338_vm14, %v349_v3, %v351_v7 }
  0x50   :  { %v158_v61 = vadd.s32 536870912, %v157_v45  ;;  %v341_v29 = vsel %vm337_vm12, %v321_v43, %v324_v12  ;;  %v343_v47 = vsel %vm339_vm13, %v327_v49, %v342_v51  ;;  %v348_v14 = vsel %vm338_vm14, %v345_v2, %v347_v27 }
  0x51   :  { %v264_v33 = vshll.u32 %v5630_v1, 30  ;;  %v5637_v52 = vmul.u32.u64.low %v353_v50, %v352_v8  ;;  %v5638_v11 = vmul.u32.u64.high %v353_v50, %v352_v8, %v5637_v52  ;;  %v470_v63 = vadd.s32 536870912, %v469_v18 }
  0x52   :  { %v344_v31 = vsel %vm338_vm14, %v341_v29, %v343_v47  ;;  %v5641_v36 = vmul.u32.u64.low %v353_v50, %v348_v14  ;;  %v5642_v57 = vmul.u32.u64.high %v353_v50, %v348_v14, %v5641_v36  ;;  %v5645_v41 = vshrl.u32 %v158_v61, 30 }
  0x53   :  { %v265_v44 = vsub.s32 %v261_v24, %v264_v33  ;;  %v360_v54 = vmul.u32 %v353_v50, %v344_v31  ;;  %v5649_v39 = vshrl.u32 %v470_v63, 30  ;;  %v257_v31 = vadd.s32 %v5485_v32, %v5482_v34 }
  0x54   :  { %vm362_vm15 = vc.u32 %v5638_v11, %v5641_v36  ;;  %v363_v56 = vadd.s32 1, %v5642_v57  ;;  %v160_v55 = vshll.u32 %v5645_v41, 30  ;;  %v465_v34 = vadd.s32 %v5575_v59, %v5581_v17 }
  0x55   :  { %v267_v49 = vsub.s32 0, %v265_v44  ;;  %v472_v12 = vshll.u32 %v5649_v39, 30  ;;  %vm203_vm6 = vcmp.lt.s32.totalorder %v5335_v53, 0  ;;  %vm5669_vm7 = vcmp.le.f32.partialorder %v201_v28, 0.7853982 }
  0x56   :  { %v364_v10 = vsel %vm362_vm15, %v363_v56, %v5642_v57  ;;  %v161_v4 = vsub.s32 %v157_v45, %v160_v55  ;;  %vm99_vm0 = vcmp.lt.s32.totalorder %v5343_v60, 0  ;;  %vm5681_vm8 = vcmp.le.f32.partialorder %v97_v20, 0.7853982 }
  0x57   :  { %v365_v48 = vadd.s32 %v364_v10, %v360_v54  ;;  %v4382_v35 = vmin.u32 %v267_v49, %v265_v44  ;;  %v473_v5 = vsub.s32 %v469_v18, %v472_v12  ;;  %vm411_vm9 = vcmp.lt.s32.totalorder %v5348_v9, 0 }
  0x58   :  { %v163_v26 = vsub.s32 0, %v161_v4  ;;  %vm307_vm10 = vcmp.lt.s32.totalorder %v5357_v30, 0  ;;  %vm5697_vm11 = vcmp.le.f32.partialorder %v409_v62, 0.7853982  ;;  %vm5709_vm12 = vcmp.le.f32.partialorder %v305_v37, 0.7853982 }
  0x59   :  { %v366_v40 = vadd.s32 536870912, %v365_v48  ;;  %v269_v43 = vclz %v4382_v35  ;;  %v475_v7 = vsub.s32 0, %v473_v5  ;;  %v153_v35 = vadd.s32 %v5527_v21, %v5544_v19 }
  0x5a   :  { %v4378_v51 = vmin.u32 %v163_v26, %v161_v4 }
  0x5b   :  { %v5655_v24 = vshrl.u32 %v366_v40, 30  ;;  %v4383_v27 = vadd.s32 4294967294, %v269_v43  ;;  %v4390_v50 = vmin.u32 %v475_v7, %v473_v5 }
  0x5c   :  { %v165_v8 = vclz %v4378_v51 }
  0x5d   :  { %v368_v13 = vshll.u32 %v5655_v24, 30  ;;  %vm4384_vm2 = vcmp.lt.s32.totalorder %v4383_v27, 0  ;;  %v477_v29 = vclz %v4390_v50 }
  0x5e   :  { %v4379_v45 = vadd.s32 4294967294, %v165_v8  ;;  %v272_v47 = vsel %vm4384_vm2, 0, %v4383_v27  ;;  %v361_v8 = vadd.s32 %v5641_v36, %v5638_v11 }
  0x5f   :  { %v369_v3 = vsub.s32 %v365_v48, %v368_v13  ;;  %v4391_v33 = vadd.s32 4294967294, %v477_v29  ;;  %v277_v52 = vsub.s32 4294967266, %v272_v47  ;;  %v273_v57 = vsub.s32 32, %v272_v47 }
  0x60   :  { %vm4380_vm3 = vcmp.lt.s32.totalorder %v4379_v45, 0  ;;  %v274_v10 = vshll.u32 %v265_v44, %v272_v47 }
  0x61   :  { %v371_v2 = vsub.s32 0, %v369_v3  ;;  %v168_v63 = vsel %vm4380_vm3, 0, %v4379_v45  ;;  %vm4392_vm4 = vcmp.lt.s32.totalorder %v4391_v33, 0  ;;  %v278_v54 = vadd.s32 127, %v277_v52 }
  0x62   :  { %v173_v56 = vsub.s32 4294967266, %v168_v63  ;;  %v480_v55 = vsel %vm4392_vm4, 0, %v4391_v33  ;;  %v275_v49 = vshrl.u32 %v257_v31, %v273_v57  ;;  %v169_v26 = vsub.s32 32, %v168_v63 }
  0x63   :  { %v4386_v61 = vmin.u32 %v371_v2, %v369_v3  ;;  %v279_v48 = vshll.u32 %v278_v54, 23  ;;  %v485_v40 = vsub.s32 4294967266, %v480_v55  ;;  %v481_v32 = vsub.s32 32, %v480_v55 }
  0x64   :  { %v174_v13 = vadd.s32 127, %v173_v56  ;;  %v276_v7 = vor.u32 %v275_v49, %v274_v10  ;;  %v170_v27 = vshll.u32 %v161_v4, %v168_v63  ;;  %v171_v50 = vshrl.u32 %v153_v35, %v169_v26 }
  0x65   :  { %v373_v14 = vclz %v4386_v61  ;;  %v280_v51 = vor.u32 4788187, %v279_v48  ;;  %v486_v2 = vadd.s32 127, %v485_v40  ;;  %v482_v19 = vshll.u32 %v473_v5, %v480_v55 }
  0x66   :  { %v175_v44 = vshll.u32 %v174_v13, 23  ;;  %v283_v21 = vcvt.s32.f32 %v276_v7  ;;  %v483_v47 = vshrl.u32 %v465_v34, %v481_v32  ;;  %v172_v33 = vor.u32 %v171_v50, %v170_v27 }
  0x67   :  { %v4387_v18 = vadd.s32 4294967294, %v373_v14  ;;  %v281_v45 = vand.u32 2147483647, %v280_v51  ;;  %v487_v14 = vshll.u32 %v486_v2, 23  ;;  %v287_v40 = vsub.s32 4, %v5630_v1 }
  0x68   :  { %v176_v52 = vor.u32 4788187, %v175_v44  ;;  %v484_v57 = vor.u32 %v483_v47, %v482_v19  ;;  %v179_v54 = vcvt.s32.f32 %v172_v33  ;;  %v183_v32 = vsub.s32 4, %v5645_v41 }
  0x69   :  { %vm4388_vm5 = vcmp.lt.s32.totalorder %v4387_v18, 0  ;;  %v284_v17 = vmul.f32 %v283_v21, %v281_v45  ;;  %v488_v4 = vor.u32 4788187, %v487_v14  ;;  %v288_v7 = vsel %vm203_vm6, %v287_v40, %v5630_v1 }
  0x6a   :  { %v376_v12 = vsel %vm4388_vm5, 0, %v4387_v18  ;;  %v177_v63 = vand.u32 2147483647, %v176_v52  ;;  %v491_v49 = vcvt.s32.f32 %v484_v57  ;;  %v290_v1 = vsel %vm5669_vm7, 0, %v288_v7 }
  0x6b   :  { %v381_v43 = vsub.s32 4294967266, %v376_v12  ;;  %v377_v61 = vsub.s32 32, %v376_v12  ;;  %v378_v18 = vshll.u32 %v369_v3, %v376_v12  ;;  %v285_v11 = vxor.u32 2147483648, %v284_v17 }
  0x6c   :  { %v489_v36 = vand.u32 2147483647, %v488_v4  ;;  %v180_v5 = vmul.f32 %v179_v54, %v177_v63  ;;  %v184_v44 = vsel %vm99_vm0, %v183_v32, %v5645_v41  ;;  %v391_v21 = vsub.s32 4, %v5655_v24 }
  0x6d   :  { %v382_v29 = vadd.s32 127, %v381_v43  ;;  %v379_v31 = vshrl.u32 %v361_v8, %v377_v61  ;;  %v286_v12 = vsel %vm203_vm6, %v285_v11, %v284_v17  ;;  %v495_v8 = vsub.s32 4, %v5649_v39 }
  0x6e   :  { %v492_v35 = vmul.f32 %v491_v49, %v489_v36  ;;  %v181_v26 = vxor.u32 2147483648, %v180_v5  ;;  %v289_v13 = vsel %vm5669_vm7, %v5335_v53, %v286_v12  ;;  %v186_v41 = vsel %vm5681_vm8, 0, %v184_v44 }
  0x6f   :  { %v383_v59 = vshll.u32 %v382_v29, 23  ;;  %v380_v56 = vor.u32 %v379_v31, %v378_v18  ;;  %5067 = vcosq.f32 %v289_v13  ;;  %v294_v29 = vadd.s32 3, %v290_v1 }
  0x70   :  { %v493_v51 = vxor.u32 2147483648, %v492_v35  ;;  %v182_v34 = vsel %vm99_vm0, %v181_v26, %v180_v5  ;;  %5069 = vsinq.f32 %v289_v13  ;;  %v496_v19 = vsel %vm411_vm9, %v495_v8, %v5649_v39 }
  0x71   :  { %v384_v10 = vor.u32 4788187, %v383_v59  ;;  %v387_v48 = vcvt.s32.f32 %v380_v56  ;;  %v185_v20 = vsel %vm5681_vm8, %v5343_v60, %v182_v34  ;;  %v295_v14 = vand.u32 3, %v294_v29 }
  0x72   :  { %v494_v50 = vsel %vm411_vm9, %v493_v51, %v492_v35  ;;  %5071 = vcosq.f32 %v185_v20  ;;  %v709_v33 = vand.u32 3, %v290_v1  ;;  %v190_v18 = vadd.s32 3, %v186_v41 }
  0x73   :  { %v385_v55 = vand.u32 2147483647, %v384_v10  ;;  %v497_v45 = vsel %vm5697_vm11, %v5348_v9, %v494_v50  ;;  %5073 = vsinq.f32 %v185_v20  ;;  %v498_v31 = vsel %vm5697_vm11, 0, %v496_v19 }
  0x74   :  { %5075 = vcosq.f32 %v497_v45  ;;  %v392_v59 = vsel %vm307_vm10, %v391_v21, %v5655_v24  ;;  %vm300_vm13 = vcmp.eq.s32.totalorder %v295_v14, 2  ;;  %vm711_vm14 = vcmp.eq.s32.totalorder %v709_v33, 0 }
  0x75   :  { %v388_v43 = vmul.f32 %v387_v48, %v385_v55  ;;  %5077 = vsinq.f32 %v497_v45  ;;  %vm714_vm15 = vcmp.eq.s32.totalorder %v709_v33, 2  ;;  %vm297_vm2 = vcmp.eq.s32.totalorder %v295_v14, 0 }
  0x76   :  { %v191_v39 = vand.u32 3, %v190_v18  ;;  %v502_v4 = vadd.s32 3, %v498_v31  ;;  %v394_v63 = vsel %vm5709_vm12, 0, %v392_v59  ;;  %v606_v56 = vand.u32 3, %v186_v41 }
  0x77   :  { %v389_v2 = vxor.u32 2147483648, %v388_v43  ;;  %vm296_vm3 = vcmp.lt.s32.totalorder %v295_v14, 2  ;;  %vm710_vm4 = vcmp.lt.s32.totalorder %v709_v33, 2  ;;  %v915_v5 = vand.u32 3, %v498_v31 }
  0x78   :  { %v398_v55 = vadd.s32 3, %v394_v63  ;;  %vm293_vm5 = vweird.f32 %v5335_v53  ;;  %vm193_vm6 = vcmp.eq.s32.totalorder %v191_v39, 0  ;;  %vm196_vm7 = vcmp.eq.s32.totalorder %v191_v39, 2 }
  0x79   :  { %v390_v62 = vsel %vm307_vm10, %v389_v2, %v388_v43  ;;  %v5068_v47 = vpop.eup %5067  ;;  %v503_v12 = vand.u32 3, %v502_v4  ;;  %vm192_vm0 = vcmp.lt.s32.totalorder %v191_v39, 2  ;;  %vm608_vm8 = vcmp.eq.s32.totalorder %v606_v56, 0 }
  0x7a   :  { %v393_v37 = vsel %vm5709_vm12, %v5357_v30, %v390_v62  ;;  %v5070_v52 = vpop.eup %5069  ;;  %v301_v17 = vxor.u32 2147483648, %v5068_v47  ;;  %vm611_vm9 = vcmp.eq.s32.totalorder %v606_v56, 2  ;;  %vm607_vm11 = vcmp.lt.s32.totalorder %v606_v56, 2 }
  0x7b   :  { %5079 = vcosq.f32 %v393_v37  ;;  %v298_v57 = vxor.u32 2147483648, %v5070_v52  ;;  %v399_v51 = vand.u32 3, %v398_v55  ;;  %v812_v28 = vand.u32 3, %v394_v63 }
  0x7c   :  { %5081 = vsinq.f32 %v393_v37  ;;  %v5072_v54 = vpop.eup %5071  ;;  %v302_v11 = vsel %vm300_vm13, %v301_v17, %v5070_v52  ;;  %v716_v36 = vsel %vm714_vm15, %v301_v17, %v5070_v52  ;;  %vm917_vm13 = vcmp.eq.s32.totalorder %v915_v5, 0  ;;  %v4409_v17 = vld [vmem:[%s6881_s3 + $0x28] ss:$0 sm:$0xff] }
  0x7d   :  { %v5074_v10 = vpop.eup %5073  ;;  %v299_v24 = vsel %vm297_vm2, %v5068_v47, %v298_v57  ;;  %v713_v49 = vsel %vm711_vm14, %v5068_v47, %v298_v57  ;;  %v197_v3 = vxor.u32 2147483648, %v5072_v54  ;;  %vm504_vm14 = vcmp.lt.s32.totalorder %v503_v12, 2 }
  0x7e   :  { %v5076_v48 = vpop.eup %5075  ;;  %v194_v35 = vxor.u32 2147483648, %v5074_v10  ;;  %v303_v13 = vsel %vm296_vm3, %v299_v24, %v302_v11  ;;  %v717_v43 = vsel %vm710_vm4, %v713_v49, %v716_v36  ;;  %vm920_vm15 = vcmp.eq.s32.totalorder %v915_v5, 2 }
  0x7f   :  { %v5078_v40 = vpop.eup %5077  ;;  %v198_v34 = vsel %vm196_vm7, %v197_v3, %v5074_v10  ;;  %v613_v32 = vsel %vm611_vm9, %v197_v3, %v5074_v10  ;;  %v509_v27 = vxor.u32 2147483648, %v5076_v48  ;;  %vm505_vm2 = vcmp.eq.s32.totalorder %v503_v12, 0 }
  0x80   :  { %v195_v2 = vsel %vm193_vm6, %v5072_v54, %v194_v35  ;;  %v610_v1 = vsel %vm608_vm8, %v5072_v54, %v194_v35  ;;  %v506_v20 = vxor.u32 2147483648, %v5078_v40  ;;  %vm508_vm3 = vcmp.eq.s32.totalorder %v503_v12, 2 }
  0x81   :  { %vm401_vm4 = vcmp.eq.s32.totalorder %v399_v51, 0  ;;  %vm404_vm1 = vcmp.eq.s32.totalorder %v399_v51, 2  ;;  %vm814_vm12 = vcmp.eq.s32.totalorder %v812_v28, 0  ;;  %vm817_vm10 = vcmp.eq.s32.totalorder %v812_v28, 2 }
  0x82   :  { %v199_v8 = vsel %vm192_vm0, %v195_v2, %v198_v34  ;;  %v614_v61 = vsel %vm607_vm11, %v610_v1, %v613_v32  ;;  %vm400_vm7 = vcmp.lt.s32.totalorder %v399_v51, 2  ;;  %vm813_vm9 = vcmp.lt.s32.totalorder %v812_v28, 2  ;;  %v4424_v34 = vld [vmem:[%s6881_s3 + $0x68] ss:$0 sm:$0xff]  ;;  %v5820_v2 = vld [vmem:[%s6881_s3 + $0x58] ss:$0 sm:$0xff] }
  0x83   :  { %v507_v62 = vsel %vm505_vm2, %v5076_v48, %v506_v20  ;;  %v510_v29 = vsel %vm508_vm3, %v509_v27, %v5078_v40  ;;  %v919_v45 = vsel %vm917_vm13, %v5076_v48, %v506_v20  ;;  %v922_v41 = vsel %vm920_vm15, %v509_v27, %v5078_v40 }
  0x84   :  { %v304_v14 = vsel %vm293_vm5, nan, %v303_v13  ;;  %vm501_vm6 = vweird.f32 %v5348_v9  ;;  %vm6941_vm0 = vweird.f32 %v5343_v60  ;;  %v511_v18 = vsel %vm504_vm14, %v507_v62, %v510_v29 }
  0x85   :  { %v5080_v26 = vpop.eup %5079  ;;  %v200_v33 = vsel %vm6941_vm0, nan, %v199_v8  ;;  %vm6942_vm8 = vmmov %vm6941_vm0  ;;  %vm6943_vm11 = vcmp.lt.s32.totalorder %v915_v5, 2  ;;  %v718_v59 = vsel %vm293_vm5, nan, %v717_v43  ;;  %v512_v4 = vsel %vm501_vm6, nan, %v511_v18 }
  0x86   :  { %v5082_v7 = vpop.eup %5081  ;;  %v405_v44 = vxor.u32 2147483648, %v5080_v26  ;;  %v615_v52 = vsel %vm6942_vm8, nan, %v614_v61  ;;  %v923_v31 = vsel %vm6943_vm11, %v919_v45, %v922_v41  ;;  %v5762_v54 = vadd.f32 %v718_v59, %v304_v14  ;;  %v4429_v59 = vld [vmem:[%s6881_s3 + $0x78] ss:$0 sm:$0xff] }
  0x87   :  { %v402_v50 = vxor.u32 2147483648, %v5082_v7  ;;  %v925_v60 = vadd.f32 %v615_v52, %v200_v33  ;;  %v924_v63 = vsel %vm501_vm6, nan, %v923_v31  ;;  %vm6916_vm5 = vcmask 64512  }
  0x88   :  { %v406_v37 = vsel %vm404_vm1, %v405_v44, %v5082_v7  ;;  %v819_v47 = vsel %vm817_vm10, %v405_v44, %v5082_v7  ;;  %vm397_vm1 = vweird.f32 %v5357_v30  ;;  %6944 = vst [vmem:[#allocation6_spill] sm:$0xff] %v5762_v54  ;;  %v5764_v24 = vadd.f32 %v924_v63, %v512_v4  ;;  %vm5826_vm10 = vmpackc.low %vm6916_vm5, %vm6916_vm5 }
  0x89   :  { %v403_v21 = vsel %vm401_vm4, %v5080_v26, %v402_v50  ;;  %v816_v19 = vsel %vm814_vm12, %v5080_v26, %v402_v50  ;;  %v1496_v13 = vand.u32 127, %v40_v0  ;;  %v5810_v28 = vmul.f32 0.03125, %v5292_v15 }
  0x8a   :  { %v407_v9 = vsel %vm400_vm7, %v403_v21, %v406_v37  ;;  %v820_v57 = vsel %vm813_vm9, %v816_v19, %v819_v47  ;;  %6945 = vst [vmem:[#allocation7_spill] sm:$0xff] %v5764_v24  ;;  %v6951_v62 = vmov 0  ;;  %v1427_v45 = vadd.s32 32, %v5273_v6 }
  0x8b   :  { %v408_v53 = vsel %vm397_vm1, nan, %v407_v9  ;;  %v821_v11 = vsel %vm397_vm1, nan, %v820_v57  ;;  %v1497_v43 = vcvt.s32.f32 %v1496_v13  ;;  %v6896_v0 = vfloor.f32 %v5810_v28 }
  0x8c   :  { %v927_v5 = vadd.f32 %v821_v11, %v408_v53  ;;  %v6952_v62 = vsel %vm5826_vm10, 4294967295, %v6951_v62  ;;  %v1428_v52 = vadd.s32 40, %v5273_v6  ;;  %v1429_v9 = vadd.s32 48, %v5273_v6 }
  0x8d   :  { %v5806_v7 = vadd.f32 0.5, %v1497_v43  ;;  %6953 = vst [vmem:[#allocation13_spill] sm:$0xff] %v6952_v62  ;;  %v1430_v11 = vadd.s32 56, %v5273_v6  ;;  %v1432_v13 = vadd.s32 72, %v5273_v6 }
  0x8f   :  { %6949 = vst [vmem:[#allocation11_spill] sm:$0xff] %v5806_v7  ;;  %v1499_v51 = vmul.f32 0.5, %v5806_v7 }
  0x91   :  { %v5815_v32 = vfloor.f32 %v1499_v51 }
  0x93   :  { %6950 = vst [vmem:[#allocation12_spill] sm:$0xff] %v5815_v32  ;;  %vm5833_vm12 = vcmp.eq.f32.partialorder %v6896_v0, %v5815_v32 }
  0xd7   :  { %v4725_v39 = vpop.f32.mrb[0].mxu0 }
  0xd8   :  { %v1028_v56 = vadd.f32 %v4725_v39, %v4409_v17  ;;  %v1022_v10 = vpop.f32.mrb[1].mxu0 }
  0xd9   :  { %v1023_v36 = vadd.f32 %v4409_v17, %v1022_v10  ;;  %v1440_v10 = vcvt.s32.f32 %v1428_v52  ;;  %v1435_v52 = vadd.s32 96, %v5273_v6 }
  0xda   :  { %v5769_v55 = vadd.f32 %v1028_v56, %v5762_v54  ;;  %v5855_v56 = vmul.f32 0.03125, %v5295_v16  ;;  %v6985_v16 = vmov 0 }
  0xdb   :  { %v5766_v49 = vadd.f32 %v1023_v36, %v925_v60  ;;  %v4728_v30 = vpop.f32.mrb[2].mxu0  ;;  %v1431_v60 = vadd.s32 64, %v5273_v6  ;;  %v5861_v36 = vmul.f32 0.03125, %v5326_v46  ;;  %v6979_v46 = vmov 0 }
  0xdc   :  { %v1038_v48 = vadd.f32 %v4728_v30, %v4409_v17  ;;  %v1032_v3 = vpop.f32.mrb[3].mxu0  ;;  %v6995_v54 = vfloor.f32 %v5855_v56 }
  0xdd   :  { %v1033_v12 = vadd.f32 %v4409_v17, %v1032_v3  ;;  %4736 = vmatprep.mubr.msk.f32.mxu1 %vm6916_vm5, %v5766_v49  ;;  %4744 = vmatprep.mubr.msk.f32.mxu0 %vm6916_vm5, %v5766_v49  ;;  %v1439_v17 = vcvt.s32.f32 %v1427_v45 }
  0xde   :  { %v5776_v40 = vadd.f32 %v1038_v48, %v5764_v24  ;;  %4737 = vmatmul.mubr.msk.f32.vlgmr.msra.gmra.mrb[2].mxu1 %vm6916_vm5, %v5769_v55  ;;  %4745 = vmatmul.mubr.msk.f32.vlgmr.msra.gmra.mrb[4].mxu0 %vm6916_vm5, %v5769_v55 }
  0xdf   :  { %v5782_v35 = vadd.f32 %v1033_v12, %v927_v5  ;;  %4751 = vmatpush3.msra.mxu1 %v5587_v42  ;;  %v5863_v30 = vadd.f32 0.5, %v1439_v17  ;;  %v1441_v5 = vcvt.s32.f32 %v1429_v9  ;;  %v1443_v12 = vcvt.s32.f32 %v1431_v60 }
  0xe0   :  { %6946 = vst [vmem:[#allocation8_spill] sm:$0xff] %v5776_v40  ;;  %v1434_v60 = vadd.s32 88, %v5273_v6 }
  0xe1   :  { %6947 = vst [vmem:[#allocation9_spill] sm:$0xff] %v5782_v35  ;;  %4739 = vmatprep.mubr.msk.f32.mxu1 %vm6916_vm5, %v5782_v35  ;;  %4747 = vmatprep.mubr.msk.f32.mxu0 %vm6916_vm5, %v5782_v35  ;;  %6956 = vst [vmem:[#allocation14_spill] sm:$0xff] %v5863_v30  ;;  %v5878_v45 = vmul.f32 0.03125, %v5863_v30 }
  0xe2   :  { %4740 = vmatmul.mubr.msk.f32.gmra.mrb[4].mxu1 %vm6916_vm5, %v5776_v40  ;;  %4748 = vmatmul.mubr.msk.f32.gmra.mrb[6].mxu0 %vm6916_vm5, %v5776_v40 }
  0xe3   :  { %4752 = vmatprep.mubr.msk.f32.mxu1 %vm6916_vm5, %v5766_v49 }
  0xe6   :  { %4753 = vmatmul.mubr.msk.f32.vlgmr.msra.gmra.mrb[6].mxu1 %vm6916_vm5, %v5769_v55 }
  0xe7   :  { %4755 = vmatprep.mubr.msk.f32.mxu1 %vm6916_vm5, %v5782_v35 }
  0xea   :  { %4756 = vmatmul.mubr.msk.f32.gmra.mrb[8].mxu1 %vm6916_vm5, %v5776_v40  ;;  %v1767_v40 = vmul.f32 2.0, %v6995_v54  ;;  %v6998_v54 = vfloor.f32 %v5878_v45 }
 0x10d   :  { %v5801_v42 = vpop.f32.mrb[0].mxu1 }
 0x10e   :  { %6948 = vst [vmem:[#allocation10_spill] sm:$0xff] %v5801_v42  ;;  %v5803_v26 = vpop.f32.mrb[1].mxu1  ;;  %v6996_v42 = vfloor.f32 %v5861_v36 }
 0x110   :  { %v1768_v35 = vmul.f32 2.0, %v6996_v42 }
 0x1b1   :  { %v4738_v1 = vpop.f32.mrb[2].mxu1  ;;  %v4746_v20 = vpop.f32.mrb[4].mxu0 }
 0x1b2   :  { %v1321_v27 = vadd.f32 %v4746_v20, %v4424_v34  ;;  %v1224_v50 = vpop.f32.mrb[3].mxu1  ;;  %v1315_v44 = vpop.f32.mrb[5].mxu0  ;;  %v1230_v43 = vadd.f32 %v4738_v1, %v5820_v2  ;;  %v6894_v20 = vfloor.f32 %v5855_v56  ;;  %v6892_v1 = vfloor.f32 %v5861_v36 }
 0x1b3   :  { %v1225_v8 = vadd.f32 %v5820_v2, %v1224_v50  ;;  %v1316_v61 = vadd.f32 %v4424_v34, %v1315_v44  ;;  %v1770_v56 = vmul.f32 2.0, %v6998_v54 }
 0x1b4   :  { %vm5892_vm13 = vcmp.eq.f32.partialorder %v6894_v20, %v5815_v32  ;;  %vm5908_vm14 = vcmp.eq.f32.partialorder %v6892_v1, %v5815_v32 }
 0x1b5   :  { %v5838_v41 = vmul.f32 0.70710677, %v1225_v8  ;;  %v4983_v21 = vpack.c.bf16 %v1321_v27, %v1316_v61  ;;  %v4741_v37 = vpop.f32.mrb[4].mxu1  ;;  %v4749_v19 = vpop.f32.mrb[6].mxu0  ;;  %v5868_v27 = vadd.f32 0.5, %v1440_v10  ;;  %v5872_v8 = vmul.f32 0.03125, %v5306_v25 }
 0x1b6   :  { %v1331_v47 = vadd.f32 %v4749_v19, %v4424_v34  ;;  %v1234_v14 = vpop.f32.mrb[5].mxu1  ;;  %v1325_v33 = vpop.f32.mrb[7].mxu0  ;;  %v1442_v61 = vcvt.s32.f32 %v1430_v11  ;;  %v1433_v19 = vadd.s32 80, %v5273_v6  ;;  %v1436_v11 = vadd.s32 104, %v5273_v6 }
 0x1b7   :  { %v1326_v18 = vadd.f32 %v4424_v34, %v1325_v33  ;;  %4985 = vmatprep.subr.msk.bf16.mxu0 %vm5826_vm10, %v4983_v21  ;;  %v1521_v31 = vsel %vm5833_vm12, %v5838_v41, 0.0  ;;  %6957 = vst [vmem:[#allocation15_spill] sm:$0xff] %v5868_v27  ;;  %v1235_v50 = vadd.f32 %v5820_v2, %v1234_v14  ;;  %v5883_v14 = vadd.f32 0.5, %v1443_v12 }
 0x1b8   :  { %4988 = vmatpush3.bf16.xpose.msk.msra.mxu0 %vm5826_vm10, %v4983_v21  ;;  %4766 = vmatprep.mubr.msk.f32.mxu0 %vm6916_vm5, %v1521_v31  ;;  %v5880_v21 = vadd.f32 0.5, %v1441_v5  ;;  %v1444_v33 = vcvt.s32.f32 %v1432_v13  ;;  %v1240_v31 = vadd.f32 %v4741_v37, %v5820_v2  ;;  %v5897_v17 = vmul.f32 0.03125, %v5868_v27 }
 0x1b9   :  { %v4989_v57 = vpack.c.bf16 %v1331_v47, %v1326_v18  ;;  %v4754_v39 = vpop.f32.mrb[6].mxu1  ;;  %v5886_v18 = vmul.f32 0.70710677, %v1230_v43  ;;  %v5899_v9 = vmul.f32 0.70710677, %v1235_v50  ;;  %v6889_v37 = vfloor.f32 %v5878_v45 }
 0x1ba   :  { %v1412_v4 = vadd.f32 %v4754_v39, %v4429_v59  ;;  %v1406_v63 = vpop.f32.mrb[7].mxu1  ;;  %6958 = vst [vmem:[#allocation16_spill] sm:$0xff] %v5880_v21  ;;  %v5902_v39 = vadd.f32 0.5, %v1442_v61  ;;  %v5916_v10 = vadd.f32 0.5, %v1444_v33  ;;  %v5919_v5 = vmul.f32 0.70710677, %v1240_v31 }
 0x1bb   :  { %v1407_v53 = vadd.f32 %v4429_v59, %v1406_v63  ;;  %4991 = vmatprep.subr.msk.bf16.mxu0 %vm5826_vm10, %v4989_v57  ;;  %v1445_v63 = vcvt.s32.f32 %v1433_v19  ;;  %v5926_v12 = vmul.f32 0.03125, %v5883_v14  ;;  %v1523_v13 = vsel %vm5908_vm14, %v5899_v9, 0.0 }
 0x1bc   :  { %6961 = vst [vmem:[#allocation17_spill] sm:$0xff] %v5902_v39  ;;  %vm5946_vm2 = vcmp.eq.f32.partialorder %v6889_v37, %v5815_v32  ;;  %v1437_v19 = vadd.s32 112, %v5273_v6  ;;  %v1745_v45 = vmul.f32 0.0625, %v5902_v39 }
 0x1bd   :  { %v4995_v48 = vpack.c.bf16 %v1412_v4, %v1407_v53  ;;  %v4757_v3 = vpop.f32.mrb[8].mxu1  ;;  %v5914_v4 = vmul.f32 0.03125, %v5880_v21  ;;  %v1447_v53 = vcvt.s32.f32 %v1435_v52  ;;  %v5951_v61 = vadd.f32 0.5, %v1445_v63 }
 0x1be   :  { %v1422_v51 = vadd.f32 %v4757_v3, %v4429_v59  ;;  %v1416_v34 = vpop.f32.mrb[9].mxu1  ;;  %v6888_v3 = vfloor.f32 %v5897_v17  ;;  %v6895_v31 = vfloor.f32 %v5926_v12  ;;  %v1525_v63 = vsel %vm5946_vm2, %v5838_v41, 0.0 }
 0x1bf   :  { %v1417_v44 = vadd.f32 %v4429_v59, %v1416_v34  ;;  %4996 = vmatprep.subr.bf16.mxu1 %v4995_v48  ;;  %v1446_v34 = vcvt.s32.f32 %v1434_v60  ;;  %v5966_v60 = vmul.f32 0.03125, %v5916_v10  ;;  %v5987_v37 = vadd.f32 0.5, %v1447_v53 }
 0x1c0   :  { %4994 = vmatpush3.bf16.xpose.msk.msra.mxu0 %vm5826_vm10, %v4989_v57  ;;  %4998 = vmatpush3.bf16.msra.mxu1 %v4995_v48  ;;  %v6890_v57 = vfloor.f32 %v5872_v8  ;;  %v1522_v48 = vsel %vm5892_vm13, %v5886_v18, 0.0  ;;  %vm5960_vm3 = vcmp.eq.f32.partialorder %v6888_v3, %v5815_v32  ;;  %vm6013_vm9 = vcmp.eq.f32.partialorder %v6895_v31, %v5815_v32 }
 0x1c1   :  { %v4999_v47 = vpack.c.bf16 %v1422_v51, %v1417_v44  ;;  %v5940_v51 = vmul.f32 0.03125, %v5902_v39  ;;  %v6891_v44 = vfloor.f32 %v5914_v4  ;;  %v1529_v31 = vsel %vm6013_vm9, %v5838_v41, 0.0 }
 0x1c2   :  { %vm5935_vm15 = vcmp.eq.f32.partialorder %v6890_v57, %v5815_v32  ;;  %v1449_v57 = vcvt.s32.f32 %v1437_v19 }
 0x1c3   :  { %5000 = vmatprep.subr.bf16.mxu1 %v4999_v47  ;;  %v1524_v33 = vsel %vm5935_vm15, %v5919_v5, 0.0  ;;  %vm5980_vm4 = vcmp.eq.f32.partialorder %v6891_v44, %v5815_v32 }
 0x1c4   :  { %5002 = vmatpush3.bf16.msra.mxu1 %v4999_v47  ;;  %v1448_v47 = vcvt.s32.f32 %v1436_v11  ;;  %v6893_v11 = vfloor.f32 %v5940_v51  ;;  %v1527_v44 = vsel %vm5980_vm4, %v5899_v9, 0.0  ;;  %v6021_v20 = vadd.f32 0.5, %v1449_v57 }
 0x1c6   :  { %vm6002_vm7 = vcmp.eq.f32.partialorder %v6893_v11, %v5815_v32  ;;  %v6019_v11 = vmul.f32 0.03125, %v5987_v37  ;;  %v6053_v25 = vmul.f32 0.03125, %v6021_v20 }
 0x1c7   :  { %4767 = vmatmul.mubr.msk.f32.vlgmr.msra.gmra.mrb[8].mxu0 %vm6916_vm5, %v1522_v48  ;;  %v5973_v48 = vadd.f32 0.5, %v1446_v34  ;;  %v1526_v34 = vsel %vm5960_vm3, %v5886_v18, 0.0 }
 0x1c8   :  { %4769 = vmatprep.mubr.msk.f32.mxu0 %vm6916_vm5, %v1523_v13  ;;  %v1438_v13 = vadd.s32 120, %v5273_v6  ;;  %v6897_v6 = vfloor.f32 %v5966_v60  ;;  %v6908_v62 = vfloor.f32 %v6053_v25 }
 0x1c9   :  { %v6007_v19 = vmul.f32 0.03125, %v5973_v48 }
 0x1ca   :  { %v1450_v1 = vcvt.s32.f32 %v1438_v13  ;;  %v1528_v13 = vsel %vm6002_vm7, %v5919_v5, 0.0  ;;  %vm6029_vm6 = vcmp.eq.f32.partialorder %v6897_v6, %v5815_v32  ;;  %vm6101_vm10 = vcmp.eq.f32.partialorder %v6908_v62, %v5815_v32 }
 0x1cb   :  { %4770 = vmatmul.mubr.msk.f32.gmra.mrb[10].mxu0 %vm6916_vm5, %v1524_v33  ;;  %v5985_v33 = vmul.f32 0.03125, %v5951_v61  ;;  %v1530_v57 = vsel %vm6029_vm6, %v5886_v18, 0.0 }
 0x1cc   :  { %4772 = vmatprep.mubr.msk.f32.mxu0 %vm6916_vm5, %v1525_v63  ;;  %v5993_v63 = vadd.f32 0.5, %v1448_v47 }
 0x1cd   :  { %v6978_v6 = vfloor.f32 %v5985_v33 }
 0x1ce   :  { %v6039_v0 = vmul.f32 0.03125, %v5993_v63 }
 0x1cf   :  { %4773 = vmatmul.mubr.msk.f32.gmra.mrb[12].mxu0 %vm6916_vm5, %v1526_v34  ;;  %v6041_v34 = vadd.f32 0.5, %v1450_v1  ;;  %vm6047_vm0 = vcmp.eq.f32.partialorder %v6978_v6, %v5815_v32  ;;  %v6982_v6 = vmov 0 }
 0x1d0   :  { %4775 = vmatprep.mubr.msk.f32.mxu0 %vm6916_vm5, %v1527_v44  ;;  %v6980_v46 = vsel %vm6047_vm0, 4294967295, %v6979_v46  ;;  %v1531_v1 = vsel %vm6047_vm0, %v5899_v9, 0.0 }
 0x1d1   :  { %v6071_v15 = vmul.f32 0.03125, %v6041_v34 }
 0x1d3   :  { %4776 = vmatmul.mubr.msk.f32.gmra.mrb[14].mxu0 %vm6916_vm5, %v1528_v13  ;;  %v6911_v24 = vfloor.f32 %v6071_v15 }
 0x1d4   :  { %4778 = vmatprep.mubr.msk.f32.mxu0 %vm6916_vm5, %v1529_v31  ;;  %v6981_v31 = vfloor.f32 %v6007_v19 }
 0x1d6   :  { %vm6065_vm8 = vcmp.eq.f32.partialorder %v6981_v31, %v5815_v32 }
 0x1d7   :  { %4779 = vmatmul.mubr.msk.f32.gmra.mrb[16].mxu0 %vm6916_vm5, %v1530_v57  ;;  %v6983_v6 = vsel %vm6065_vm8, 4294967295, %v6982_v6  ;;  %v6984_v57 = vfloor.f32 %v6019_v11  ;;  %v1532_v31 = vsel %vm6065_vm8, %v5919_v5, 0.0 }
 0x1d8   :  { %4781 = vmatprep.mubr.msk.f32.mxu0 %vm6916_vm5, %v1531_v1  ;;  %v6987_v1 = vfloor.f32 %v6039_v0 }
 0x1d9   :  { %vm6077_vm11 = vcmp.eq.f32.partialorder %v6984_v57, %v5815_v32  ;;  %v6988_v57 = vmov 0 }
 0x1da   :  { %v6986_v16 = vsel %vm6077_vm11, 4294967295, %v6985_v16  ;;  %v1533_v13 = vsel %vm6077_vm11, %v5838_v41, 0.0  ;;  %vm6092_vm1 = vcmp.eq.f32.partialorder %v6987_v1, %v5815_v32  ;;  %v1535_v1 = vsel %vm6101_vm10, %v5899_v9, 0.0 }
 0x1db   :  { %4782 = vmatmul.mubr.msk.f32.gmra.mrb[18].mxu0 %vm6916_vm5, %v1532_v31  ;;  %v6989_v57 = vsel %vm6092_vm1, 4294967295, %v6988_v57  ;;  %v6990_v31 = vmov 0  ;;  %v1534_v41 = vsel %vm6092_vm1, %v5886_v18, 0.0  ;;  %vm6115_vm11 = vcmp.eq.f32.partialorder %v6911_v24, %v5815_v32 }
 0x1dc   :  { %4784 = vmatprep.mubr.msk.f32.mxu0 %vm6916_vm5, %v1533_v13  ;;  %v6991_v31 = vsel %vm6101_vm10, 4294967295, %v6990_v31  ;;  %v6992_v13 = vmov 0  ;;  %v1536_v62 = vsel %vm6115_vm11, %v5919_v5, 0.0  ;;  %v1798_v18 = vmul.f32 0.0625, %v5806_v7 }
 0x1dd   :  { %v6993_v13 = vsel %vm6115_vm11, 4294967295, %v6992_v13  ;;  %v1742_v24 = vmul.f32 0.0625, %v5863_v30  ;;  %v1783_v5 = vsub.f32 %v5303_v23, %v1767_v40  ;;  %vm6923_vm11 = vcmask 261120  }
 0x1de   :  { %v6130_v32 = vfloor.f32 %v1798_v18  ;;  %v1744_v18 = vmul.f32 0.0625, %v5880_v21 }
 0x1df   :  { %4785 = vmatmul.mubr.msk.f32.gmra.mrb[20].mxu0 %vm6916_vm5, %v1534_v41  ;;  %v6994_v41 = vfloor.f32 %v5810_v28  ;;  %v1743_v28 = vmul.f32 0.0625, %v5868_v27 }
 0x1e0   :  { %4787 = vmatprep.mubr.msk.f32.mxu0 %vm6916_vm5, %v1535_v1  ;;  %vm1801_vm10 = vcmp.eq.f32.partialorder %v1783_v5, %v6130_v32  ;;  %v6156_v21 = vfloor.f32 %v1744_v18 }
 0x1e1   :  { %v1766_v9 = vmul.f32 2.0, %v6994_v41  ;;  %v6139_v41 = vfloor.f32 %v1742_v24  ;;  %v6999_v24 = vfloor.f32 %v5897_v17 }
 0x1e2   :  { %7000 = vst [vmem:[#allocation18_spill] sm:$0xff] %v6156_v21 }
 0x1e3   :  { %4788 = vmatmul.mubr.msk.f32.gmra.mrb[22].mxu0 %vm6916_vm5, %v1536_v62  ;;  %v1782_v1 = vsub.f32 %v5301_v22, %v1766_v9  ;;  %v6997_v62 = vfloor.f32 %v5872_v8  ;;  %v1784_v9 = vsub.f32 %v5340_v58, %v1768_v35  ;;  %v6148_v8 = vfloor.f32 %v1743_v28 }
 0x1e4   :  { %v7001_v35 = vfloor.f32 %v5914_v4  ;;  %v6169_v4 = vfloor.f32 %v1745_v45 }
 0x1e5   :  { %v1769_v7 = vmul.f32 2.0, %v6997_v62  ;;  %vm1800_vm5 = vcmp.eq.f32.partialorder %v1782_v1, %v6130_v32  ;;  %v1771_v62 = vmul.f32 2.0, %v6999_v24  ;;  %v1786_v1 = vsub.f32 %v6139_v41, %v1770_v56 }
 0x1e6   :  { %v1772_v5 = vmul.f32 2.0, %v7001_v35  ;;  %vm1802_vm1 = vcmp.eq.f32.partialorder %v1784_v9, %v6130_v32  ;;  %v7002_v24 = vfloor.f32 %v5940_v51  ;;  %v7007_v51 = vfloor.f32 %v5926_v12 }
 0x1e7   :  { %v1785_v42 = vsub.f32 %v5319_v38, %v1769_v7  ;;  %v1746_v7 = vmul.f32 0.0625, %v5883_v14  ;;  %v1787_v18 = vsub.f32 %v6148_v8, %v1771_v62 }
 0x1e8   :  { %v1773_v35 = vmul.f32 2.0, %v7002_v24  ;;  %v1774_v62 = vmul.f32 2.0, %v7007_v51 }
 0x1ea   :  { %v1789_v27 = vsub.f32 %v6169_v4, %v1773_v35 }
 0x29a   :  { %v4768_v36 = vpop.f32.mrb[8].mxu0 }
 0x29b   :  { %v1663_v40 = vpop.f32.mrb[9].mxu0  ;;  %v6164_v17 = vsel %vm1801_vm10, %v4768_v36, -1e+30  ;;  %vm7005_vm10 = vcmask 261120  }
 0x29c   :  { %v6153_v54 = vsel %vm1800_vm5, %v1663_v40, -1e+30  ;;  %v1747_v40 = vmul.f32 0.0625, %v5916_v10  ;;  %vm1803_vm5 = vcmp.eq.f32.partialorder %v1785_v42, %v6130_v32  ;;  %v1748_v10 = vmul.f32 0.0625, %v5951_v61  ;;  %vm7006_vm0 = vmmov %vm7005_vm10 }
 0x29d   :  { %v1833_v30 = vsel %vm6923_vm11, %v6153_v54, -inf  ;;  %vm6176_vm11 = vcmp.eq.f32.partialorder %v1786_v1, %v6130_v32  ;;  %v1836_v9 = vsel %vm7005_vm10, %v6164_v17, -inf  ;;  %v1758_v42 = vfloor.f32 %v1746_v7 }
 0x29e   :  { %1834 = vmax.xlane.f32.xlu0 %v1833_v30  ;;  %v4771_v28 = vpop.f32.mrb[10].mxu0  ;;  %v1788_v30 = vsub.f32 %v6156_v21, %v1772_v5  ;;  %v7008_v5 = vfloor.f32 %v5966_v60  ;;  %v1749_v21 = vmul.f32 0.0625, %v5973_v48  ;;  %v1760_v7 = vfloor.f32 %v1748_v10 }
 0x29f   :  { %v1673_v56 = vpop.f32.mrb[11].mxu0  ;;  %v6188_v45 = vsel %vm1803_vm5, %v4771_v28, -1e+30  ;;  %v7009_v28 = vfloor.f32 %v5985_v33  ;;  %vm7010_vm5 = vmmov %vm7006_vm0  ;;  %v1790_v35 = vsub.f32 %v1758_v42, %v1774_v62  ;;  %v7012_v42 = vfloor.f32 %v6019_v11 }
 0x2a0   :  { %v6173_v39 = vsel %vm1802_vm1, %v1673_v56, -1e+30  ;;  %v1759_v56 = vfloor.f32 %v1747_v40  ;;  %v1775_v24 = vmul.f32 2.0, %v7008_v5  ;;  %vm1805_vm1 = vcmp.eq.f32.partialorder %v1787_v18, %v6130_v32 }
 0x2a1   :  { %v1839_v36 = vsel %vm7006_vm0, %v6173_v39, -inf  ;;  %v1750_v40 = vmul.f32 0.0625, %v5987_v37  ;;  %v1842_v60 = vsel %vm7006_vm0, %v6188_v45, -inf  ;;  %vm1806_vm10 = vcmp.eq.f32.partialorder %v1788_v30, %v6130_v32 }
 0x2a2   :  { %1837 = vmax.xlane.f32.xlu0 %v1836_v9  ;;  %1840 = vmax.xlane.f32.xlu1 %v1839_v36  ;;  %v4774_v1 = vpop.f32.mrb[12].mxu0  ;;  %v1776_v9 = vmul.f32 2.0, %v7009_v28  ;;  %v1791_v10 = vsub.f32 %v1759_v56, %v1775_v24  ;;  %v1761_v36 = vfloor.f32 %v1749_v21  ;;  %v7011_v37 = vfloor.f32 %v6007_v19 }
 0x2a3   :  { %v1683_v61 = vpop.f32.mrb[13].mxu0  ;;  %v6207_v48 = vsel %vm1805_vm1, %v4774_v1, -1e+30  ;;  %v1751_v5 = vmul.f32 0.0625, %v5993_v63  ;;  %v1762_v30 = vfloor.f32 %v1750_v40  ;;  %v1778_v62 = vmul.f32 2.0, %v7012_v42  ;;  %vm7013_vm1 = vmmov %vm7006_vm0 }
 0x2a4   :  { %v6197_v12 = vsel %vm6176_vm11, %v1683_v61, -1e+30  ;;  %vm1807_vm11 = vcmp.eq.f32.partialorder %v1789_v27, %v6130_v32  ;;  %v1777_v51 = vmul.f32 2.0, %v7011_v37  ;;  %v1792_v28 = vsub.f32 %v1760_v7, %v1776_v9 }
 0x2a5   :  { %v1845_v18 = vsel %vm7010_vm5, %v6197_v12, -inf  ;;  %v1848_v1 = vsel %vm7013_vm1, %v6207_v48, -inf  ;;  %vm1808_vm5 = vcmp.eq.f32.partialorder %v1790_v35, %v6130_v32  ;;  %v1752_v21 = vmul.f32 0.0625, %v6021_v20 }
 0x2a6   :  { %1843 = vmax.xlane.f32.xlu1 %v1842_v60  ;;  %1846 = vmax.xlane.f32.xlu0 %v1845_v18  ;;  %v4777_v14 = vpop.f32.mrb[14].mxu0  ;;  %v1793_v11 = vsub.f32 %v1761_v36, %v1777_v51  ;;  %v1763_v24 = vfloor.f32 %v1751_v5  ;;  %v7014_v7 = vfloor.f32 %v6039_v0  ;;  %v1753_v40 = vmul.f32 0.0625, %v6041_v34 }
 0x2a7   :  { %v1693_v33 = vpop.f32.mrb[15].mxu0  ;;  %v6223_v19 = vsel %vm1807_vm11, %v4777_v14, -1e+30  ;;  %vm1810_vm1 = vcmp.eq.f32.partialorder %v1792_v28, %v6130_v32  ;;  %v1794_v20 = vsub.f32 %v1762_v30, %v1778_v62  ;;  %vm7015_vm11 = vmmov %vm7006_vm0  ;;  %v1764_v14 = vfloor.f32 %v1752_v21 }
 0x2a8   :  { %v6213_v61 = vsel %vm1806_vm10, %v1693_v33, -1e+30  ;;  %vm1809_vm10 = vcmp.eq.f32.partialorder %v1791_v10, %v6130_v32  ;;  %v1779_v9 = vmul.f32 2.0, %v7014_v7  ;;  %v1854_v18 = vsel %vm7015_vm11, %v6223_v19, -inf  ;;  %vm7018_vm11 = vmmov %vm7006_vm0 }
 0x2a9   :  { %v1851_v27 = vsel %vm7006_vm0, %v6213_v61, -inf  ;;  %v7016_v10 = vfloor.f32 %v6053_v25  ;;  %v1765_v51 = vfloor.f32 %v1753_v40  ;;  %v7017_v5 = vfloor.f32 %v6071_v15 }
 0x2aa   :  { %1849 = vmax.xlane.f32.xlu1 %v1848_v1  ;;  %1852 = vmax.xlane.f32.xlu0 %v1851_v27  ;;  %v4780_v63 = vpop.f32.mrb[16].mxu0  ;;  %v1795_v37 = vsub.f32 %v1763_v24, %v1779_v9 }
 0x2ab   :  { %v1703_v56 = vpop.f32.mrb[17].mxu0  ;;  %v1780_v33 = vmul.f32 2.0, %v7016_v10  ;;  %v6238_v36 = vsel %vm1809_vm10, %v4780_v63, -1e+30  ;;  %v1781_v28 = vmul.f32 2.0, %v7017_v5  ;;  %vm1812_vm10 = vcmp.eq.f32.partialorder %v1794_v20, %v6130_v32 }
 0x2ac   :  { %v6229_v60 = vsel %vm1808_vm5, %v1703_v56, -1e+30  ;;  %vm1811_vm5 = vcmp.eq.f32.partialorder %v1793_v11, %v6130_v32  ;;  %v1860_v42 = vsel %vm7018_vm11, %v6238_v36, -inf  ;;  %vm1813_vm8 = vcmp.eq.f32.partialorder %v1795_v37, %v6130_v32  ;;  %vm7020_vm11 = vmmov %vm7006_vm0 }
 0x2ad   :  { %v1857_v35 = vsel %vm7006_vm0, %v6229_v60, -inf  ;;  %v1796_v62 = vsub.f32 %v1764_v14, %v1780_v33  ;;  %v1797_v21 = vsub.f32 %v1765_v51, %v1781_v28 }
 0x2ae   :  { %1855 = vmax.xlane.f32.xlu1 %v1854_v18  ;;  %1858 = vmax.xlane.f32.xlu0 %v1857_v35  ;;  %v4783_v0 = vpop.f32.mrb[18].mxu0 }
 0x2af   :  { %v1713_v34 = vpop.f32.mrb[19].mxu0  ;;  %v6250_v1 = vsel %vm1811_vm5, %v4783_v0, -1e+30  ;;  %vm1815_vm5 = vcmp.eq.f32.partialorder %v1797_v21, %v6130_v32 }
 0x2b0   :  { %v6243_v30 = vsel %vm1810_vm1, %v1713_v34, -1e+30  ;;  %vm7019_vm1 = vmmov %vm7006_vm0 }
 0x2b1   :  { %v1863_v25 = vsel %vm7006_vm0, %v6243_v30, -inf  ;;  %v1866_v56 = vsel %vm7019_vm1, %v6250_v1, -inf  ;;  %vm1814_vm0 = vcmp.eq.f32.partialorder %v1796_v62, %v6130_v32 }
 0x2b2   :  { %1861 = vmax.xlane.f32.xlu1 %v1860_v42  ;;  %1864 = vmax.xlane.f32.xlu0 %v1863_v25  ;;  %v4786_v27 = vpop.f32.mrb[20].mxu0 }
 0x2b3   :  { %v1723_v15 = vpop.f32.mrb[21].mxu0  ;;  %v6260_v24 = vsel %vm1813_vm8, %v4786_v27, -1e+30  ;;  %vm7022_vm8 = vmmov %vm7019_vm1 }
 0x2b4   :  { %v6253_v63 = vsel %vm1812_vm10, %v1723_v15, -1e+30  ;;  %vm7021_vm10 = vmmov %vm7019_vm1 }
 0x2b5   :  { %v1869_v11 = vsel %vm7020_vm11, %v6253_v63, -inf  ;;  %v1872_v20 = vsel %vm7021_vm10, %v6260_v24, -inf  ;;  %vm7023_vm11 = vmmov %vm7019_vm1 }
 0x2b6   :  { %1867 = vmax.xlane.f32.xlu1 %v1866_v56  ;;  %1870 = vmax.xlane.f32.xlu0 %v1869_v11  ;;  %v4789_v7 = vpop.f32.mrb[22].mxu0 }
 0x2b7   :  { %v1733_v9 = vpop.f32.mrb[23].mxu0  ;;  %v6269_v35 = vsel %vm1815_vm5, %v4789_v7, -1e+30 }
 0x2b8   :  { %v6263_v40 = vsel %vm1814_vm0, %v1733_v9, -1e+30  ;;  %v1878_v14 = vsel %vm7022_vm8, %v6269_v35, -inf  ;;  %vm7024_vm0 = vmmov %vm7019_vm1 }
 0x2b9   :  { %v1875_v18 = vsel %vm7019_vm1, %v6263_v40, -inf  ;;  %vm7025_vm5 = vmmov %vm7024_vm0 }
 0x2ba   :  { %1873 = vmax.xlane.f32.xlu1 %v1872_v20  ;;  %1876 = vmax.xlane.f32.xlu0 %v1875_v18  ;;  %vm7026_vm10 = vmmov %vm7024_vm0 }
 0x2bb   :  { %vm7027_vm1 = vmmov %vm7024_vm0 }
 0x2bc   :  { %vm7028_vm8 = vmmov %vm7024_vm0 }
 0x2be   :  { %1879 = vmax.xlane.f32.xlu1 %v1878_v14 }
 0x32b   :  { %v1835_v10 = vpop.xlane.xlu0 %1834 }
 0x32c   :  { %v1881_v33 = vsub.f32 %v6153_v54, %v1835_v10 }
 0x32e   :  { %v1897_v0 = vmul.f32 1.442695, %v1881_v33 }
 0x32f   :  { %v1838_v34 = vpop.xlane.xlu0 %1837  ;;  %v1841_v37 = vpop.xlane.xlu1 %1840 }
 0x330   :  { %5083 = vpow2.f32 %v1897_v0  ;;  %v1882_v51 = vsub.f32 %v6164_v17, %v1838_v34  ;;  %v1883_v5 = vsub.f32 %v6173_v39, %v1841_v37 }
 0x332   :  { %v1899_v28 = vmul.f32 1.442695, %v1882_v51  ;;  %v1901_v42 = vmul.f32 1.442695, %v1883_v5 }
 0x333   :  { %v1844_v25 = vpop.xlane.xlu1 %1843  ;;  %v1847_v62 = vpop.xlane.xlu0 %1846 }
 0x334   :  { %5085 = vpow2.f32 %v1899_v28  ;;  %v1884_v27 = vsub.f32 %v6188_v45, %v1844_v25  ;;  %v1885_v15 = vsub.f32 %v6197_v12, %v1847_v62 }
 0x335   :  { %5087 = vpow2.f32 %v1901_v42 }
 0x336   :  { %v1903_v21 = vmul.f32 1.442695, %v1884_v27  ;;  %v1905_v54 = vmul.f32 1.442695, %v1885_v15 }
 0x337   :  { %v1850_v56 = vpop.xlane.xlu1 %1849  ;;  %v1853_v11 = vpop.xlane.xlu0 %1852 }
 0x338   :  { %5089 = vpow2.f32 %v1903_v21  ;;  %v1886_v7 = vsub.f32 %v6207_v48, %v1850_v56  ;;  %v1887_v17 = vsub.f32 %v6213_v61, %v1853_v11 }
 0x339   :  { %5091 = vpow2.f32 %v1905_v54 }
 0x33a   :  { %v6280_v39 = vpop.eup %5083  ;;  %v1907_v9 = vmul.f32 1.442695, %v1886_v7  ;;  %v1909_v20 = vmul.f32 1.442695, %v1887_v17 }
 0x33b   :  { %v1856_v18 = vpop.xlane.xlu1 %1855  ;;  %v1859_v14 = vpop.xlane.xlu0 %1858  ;;  %v1929_v45 = vsel %vm7023_vm11, %v6280_v39, 0.0  ;;  %vm7029_vm11 = vmmov %vm7024_vm0 }
 0x33c   :  { %5093 = vpow2.f32 %v1907_v9  ;;  %v1888_v12 = vsub.f32 %v6223_v19, %v1856_v18  ;;  %v1889_v10 = vsub.f32 %v6229_v60, %v1859_v14  ;;  %1930 = vadd.xlane.f32.xlu0 %v1929_v45 }
 0x33d   :  { %5095 = vpow2.f32 %v1909_v20 }
 0x33e   :  { %v6286_v48 = vpop.eup %5085  ;;  %v1911_v61 = vmul.f32 1.442695, %v1888_v12  ;;  %v1913_v33 = vmul.f32 1.442695, %v1889_v10 }
 0x33f   :  { %v6288_v0 = vpop.eup %5087  ;;  %v1862_v34 = vpop.xlane.xlu1 %1861  ;;  %v1932_v51 = vsel %vm7024_vm0, %v6286_v48, 0.0 }
 0x340   :  { %v1865_v37 = vpop.xlane.xlu0 %1864  ;;  %5097 = vpow2.f32 %v1911_v61  ;;  %v1890_v5 = vsub.f32 %v6238_v36, %v1862_v34  ;;  %1933 = vadd.xlane.f32.xlu1 %v1932_v51  ;;  %v1935_v60 = vsel %vm7025_vm5, %v6288_v0, 0.0  ;;  %vm7030_vm5 = vmmov %vm7024_vm0 }
 0x341   :  { %v1891_v19 = vsub.f32 %v6243_v30, %v1865_v37  ;;  %5099 = vpow2.f32 %v1913_v33  ;;  %1936 = vadd.xlane.f32.xlu0 %v1935_v60 }
 0x342   :  { %v6296_v28 = vpop.eup %5089  ;;  %v1915_v42 = vmul.f32 1.442695, %v1890_v5 }
 0x343   :  { %v1917_v25 = vmul.f32 1.442695, %v1891_v19  ;;  %v6298_v62 = vpop.eup %5091  ;;  %v1868_v27 = vpop.xlane.xlu1 %1867  ;;  %v1938_v21 = vsel %vm7026_vm10, %v6296_v28, 0.0  ;;  %vm7031_vm10 = vmmov %vm7024_vm0 }
 0x344   :  { %v1871_v15 = vpop.xlane.xlu0 %1870  ;;  %5101 = vpow2.f32 %v1915_v42  ;;  %v1892_v36 = vsub.f32 %v6250_v1, %v1868_v27  ;;  %1939 = vadd.xlane.f32.xlu1 %v1938_v21  ;;  %v1941_v54 = vsel %vm7027_vm1, %v6298_v62, 0.0  ;;  %vm7032_vm1 = vmmov %vm7024_vm0 }
 0x345   :  { %v1893_v30 = vsub.f32 %v6253_v63, %v1871_v15  ;;  %5103 = vpow2.f32 %v1917_v25  ;;  %1942 = vadd.xlane.f32.xlu0 %v1941_v54 }
 0x346   :  { %v6306_v56 = vpop.eup %5093  ;;  %v1919_v11 = vmul.f32 1.442695, %v1892_v36 }
 0x347   :  { %v1921_v7 = vmul.f32 1.442695, %v1893_v30  ;;  %v6308_v17 = vpop.eup %5095  ;;  %v1874_v9 = vpop.xlane.xlu1 %1873  ;;  %v1944_v18 = vsel %vm7028_vm8, %v6306_v56, 0.0  ;;  %vm7033_vm8 = vmmov %vm7024_vm0 }
 0x348   :  { %v1877_v20 = vpop.xlane.xlu0 %1876  ;;  %5105 = vpow2.f32 %v1919_v11  ;;  %v1894_v1 = vsub.f32 %v6260_v24, %v1874_v9  ;;  %1945 = vadd.xlane.f32.xlu1 %v1944_v18  ;;  %v1947_v14 = vsel %vm7029_vm11, %v6308_v17, 0.0  ;;  %vm7034_vm11 = vmmov %vm7024_vm0 }
 0x349   :  { %v1895_v63 = vsub.f32 %v6263_v40, %v1877_v20  ;;  %5107 = vpow2.f32 %v1921_v7  ;;  %1948 = vadd.xlane.f32.xlu0 %v1947_v14  ;;  %v1425_v7 = vld [vmem:[%s6881_s3 + $0x80] sm:$0xff] }
 0x34a   :  { %v6316_v45 = vpop.eup %5097  ;;  %v1923_v12 = vmul.f32 1.442695, %v1894_v1  ;;  %4822 = vmatprep.subr.mxu1 %v1425_v7 }
 0x34b   :  { %v1925_v10 = vmul.f32 1.442695, %v1895_v63  ;;  %v6318_v61 = vpop.eup %5099  ;;  %v1880_v33 = vpop.xlane.xlu1 %1879  ;;  %v1950_v34 = vsel %vm7024_vm0, %v6316_v45, 0.0 }
 0x34c   :  { %5109 = vpow2.f32 %v1923_v12  ;;  %v1896_v24 = vsub.f32 %v6269_v35, %v1880_v33  ;;  %1951 = vadd.xlane.f32.xlu1 %v1950_v34  ;;  %v1953_v40 = vsel %vm7030_vm5, %v6318_v61, 0.0  ;;  %vm7035_vm5 = vmmov %vm7024_vm0 }
 0x34d   :  { %5111 = vpow2.f32 %v1925_v10  ;;  %1954 = vadd.xlane.f32.xlu0 %v1953_v40 }
 0x34e   :  { %v6325_v37 = vpop.eup %5101  ;;  %v1927_v51 = vmul.f32 1.442695, %v1896_v24 }
 0x34f   :  { %v6327_v5 = vpop.eup %5103  ;;  %v1956_v19 = vsel %vm7031_vm10, %v6325_v37, 0.0  ;;  %vm7036_vm10 = vmmov %vm7024_vm0 }
 0x350   :  { %5113 = vpow2.f32 %v1927_v51  ;;  %1957 = vadd.xlane.f32.xlu1 %v1956_v19  ;;  %v1959_v60 = vsel %vm7032_vm1, %v6327_v5, 0.0  ;;  %vm7037_vm1 = vmmov %vm7024_vm0 }
 0x351   :  { %1960 = vadd.xlane.f32.xlu0 %v1959_v60 }
 0x352   :  { %v6333_v35 = vpop.eup %5105 }
 0x353   :  { %v6335_v42 = vpop.eup %5107  ;;  %v1962_v25 = vsel %vm7033_vm8, %v6333_v35, 0.0  ;;  %vm7038_vm8 = vmmov %vm7024_vm0 }
 0x354   :  { %1963 = vadd.xlane.f32.xlu1 %v1962_v25  ;;  %v1965_v27 = vsel %vm7034_vm11, %v6335_v42, 0.0  ;;  %vm7039_vm11 = vmmov %vm7024_vm0 }
 0x355   :  { %1966 = vadd.xlane.f32.xlu0 %v1965_v27 }
 0x356   :  { %v6341_v15 = vpop.eup %5109 }
 0x357   :  { %v6343_v21 = vpop.eup %5111  ;;  %v1968_v36 = vsel %vm7024_vm0, %v6341_v15, 0.0 }
 0x358   :  { %1969 = vadd.xlane.f32.xlu1 %v1968_v36  ;;  %v1971_v30 = vsel %vm7035_vm5, %v6343_v21, 0.0  ;;  %vm7040_vm5 = vmmov %vm7024_vm0 }
 0x359   :  { %1972 = vadd.xlane.f32.xlu0 %v1971_v30 }
 0x35a   :  { %v6349_v54 = vpop.eup %5113 }
 0x35b   :  { %v1974_v11 = vsel %vm7036_vm10, %v6349_v54, 0.0  ;;  %vm7041_vm10 = vmmov %vm7024_vm0 }
 0x35c   :  { %1975 = vadd.xlane.f32.xlu1 %v1974_v11 }
 0x3c9   :  { %v1931_v9 = vpop.xlane.xlu0 %1930 }
 0x3ca   :  { %5115 = vrcp.f32 %v1931_v9 }
 0x3cd   :  { %v1934_v20 = vpop.xlane.xlu1 %1933 }
 0x3ce   :  { %5117 = vrcp.f32 %v1934_v20  ;;  %v1937_v18 = vpop.xlane.xlu0 %1936 }
 0x3cf   :  { %5119 = vrcp.f32 %v1937_v18 }
 0x3d1   :  { %v1940_v1 = vpop.xlane.xlu1 %1939 }
 0x3d2   :  { %5121 = vrcp.f32 %v1940_v1  ;;  %v1943_v63 = vpop.xlane.xlu0 %1942 }
 0x3d3   :  { %5123 = vrcp.f32 %v1943_v63 }
 0x3d4   :  { %v5116_v14 = vpop.eup %5115 }
 0x3d5   :  { %v1946_v12 = vpop.xlane.xlu1 %1945  ;;  %v1993_v10 = vmul.f32 %v5116_v14, %v6280_v39 }
 0x3d6   :  { %5125 = vrcp.f32 %v1946_v12  ;;  %v1949_v33 = vpop.xlane.xlu0 %1948 }
 0x3d7   :  { %5127 = vrcp.f32 %v1949_v33  ;;  %4798 = vmatprep.mubr.msk.f32.mxu1 %vm7037_vm1, %v1993_v10  ;;  %vm7042_vm1 = vmmov %vm7024_vm0 }
 0x3d8   :  { %v5118_v34 = vpop.eup %5117 }
 0x3d9   :  { %v5120_v24 = vpop.eup %5119  ;;  %v1994_v40 = vmul.f32 %v5118_v34, %v6286_v48  ;;  %v1952_v51 = vpop.xlane.xlu1 %1951 }
 0x3da   :  { %5129 = vrcp.f32 %v1952_v51  ;;  %v1955_v19 = vpop.xlane.xlu0 %1954  ;;  %v1995_v60 = vmul.f32 %v5120_v24, %v6288_v0 }
 0x3db   :  { %5131 = vrcp.f32 %v1955_v19  ;;  %4799 = vmatmul.mubr.msk.f32.vlgmr.msra.gmra.mrb[10].mxu1 %vm7038_vm8, %v1994_v40  ;;  %vm7043_vm8 = vmmov %vm7024_vm0 }
 0x3dc   :  { %v5122_v25 = vpop.eup %5121  ;;  %4801 = vmatprep.mubr.msk.f32.mxu1 %vm7039_vm11, %v1995_v60  ;;  %4823 = vmatpush3.msra.mxu1 %v1425_v7  ;;  %vm7044_vm11 = vmmov %vm7024_vm0 }
 0x3dd   :  { %v5124_v39 = vpop.eup %5123  ;;  %v1958_v27 = vpop.xlane.xlu1 %1957  ;;  %v1996_v36 = vmul.f32 %v5122_v25, %v6296_v28 }
 0x3de   :  { %5133 = vrcp.f32 %v1958_v27  ;;  %v1961_v30 = vpop.xlane.xlu0 %1960  ;;  %v1997_v48 = vmul.f32 %v5124_v39, %v6298_v62 }
 0x3df   :  { %5135 = vrcp.f32 %v1961_v30  ;;  %4802 = vmatmul.mubr.msk.f32.gmra.mrb[12].mxu1 %vm7024_vm0, %v1996_v36 }
 0x3e0   :  { %v5126_v11 = vpop.eup %5125  ;;  %4804 = vmatprep.mubr.msk.f32.mxu1 %vm7040_vm5, %v1997_v48  ;;  %vm7045_vm5 = vmmov %vm7024_vm0 }
 0x3e1   :  { %v5128_v0 = vpop.eup %5127  ;;  %v1964_v9 = vpop.xlane.xlu1 %1963  ;;  %v1998_v20 = vmul.f32 %v5126_v11, %v6306_v56 }
 0x3e2   :  { %5137 = vrcp.f32 %v1964_v9  ;;  %v1967_v7 = vpop.xlane.xlu0 %1966  ;;  %v1999_v18 = vmul.f32 %v5128_v0, %v6308_v17 }
 0x3e3   :  { %5139 = vrcp.f32 %v1967_v7  ;;  %4805 = vmatmul.mubr.msk.f32.gmra.mrb[14].mxu1 %vm7041_vm10, %v1998_v20  ;;  %vm7046_vm10 = vmmov %vm7024_vm0 }
 0x3e4   :  { %v5130_v28 = vpop.eup %5129  ;;  %4807 = vmatprep.mubr.msk.f32.mxu1 %vm7042_vm1, %v1999_v18  ;;  %vm7047_vm1 = vmmov %vm7024_vm0 }
 0x3e5   :  { %v5132_v62 = vpop.eup %5131  ;;  %v1970_v1 = vpop.xlane.xlu1 %1969  ;;  %v2000_v63 = vmul.f32 %v5130_v28, %v6316_v45 }
 0x3e6   :  { %5141 = vrcp.f32 %v1970_v1  ;;  %v1973_v14 = vpop.xlane.xlu0 %1972  ;;  %v2001_v12 = vmul.f32 %v5132_v62, %v6318_v61 }
 0x3e7   :  { %5143 = vrcp.f32 %v1973_v14  ;;  %4808 = vmatmul.mubr.msk.f32.gmra.mrb[16].mxu1 %vm7043_vm8, %v2000_v63  ;;  %vm7048_vm8 = vmmov %vm7024_vm0 }
 0x3e8   :  { %v5134_v56 = vpop.eup %5133  ;;  %4810 = vmatprep.mubr.msk.f32.mxu1 %vm7044_vm11, %v2001_v12  ;;  %vm7049_vm11 = vmmov %vm7024_vm0 }
 0x3e9   :  { %v5136_v17 = vpop.eup %5135  ;;  %v1976_v10 = vpop.xlane.xlu1 %1975  ;;  %v2002_v33 = vmul.f32 %v5134_v56, %v6325_v37 }
 0x3ea   :  { %5145 = vrcp.f32 %v1976_v10  ;;  %v2003_v34 = vmul.f32 %v5136_v17, %v6327_v5 }
 0x3eb   :  { %4811 = vmatmul.mubr.msk.f32.gmra.mrb[18].mxu1 %vm7024_vm0, %v2002_v33 }
 0x3ec   :  { %v5138_v45 = vpop.eup %5137  ;;  %4813 = vmatprep.mubr.msk.f32.mxu1 %vm7045_vm5, %v2003_v34 }
 0x3ed   :  { %v5140_v24 = vpop.eup %5139  ;;  %v2004_v61 = vmul.f32 %v5138_v45, %v6333_v35  ;;  %v2335_v35 = vld [vmem:[%s6881_s3 + $0x110] sm:$0xff] }
 0x3ee   :  { %v2005_v40 = vmul.f32 %v5140_v24, %v6335_v42  ;;  %4830 = vmatprep.subr.mxu0 %v2335_v35 }
 0x3ef   :  { %4814 = vmatmul.mubr.msk.f32.gmra.mrb[20].mxu1 %vm7046_vm10, %v2004_v61  ;;  %4831 = vmatpush3.msra.mxu0 %v2335_v35 }
 0x3f0   :  { %v5142_v51 = vpop.eup %5141  ;;  %4816 = vmatprep.mubr.msk.f32.mxu1 %vm7047_vm1, %v2005_v40 }
 0x3f1   :  { %v5144_v19 = vpop.eup %5143  ;;  %v2006_v37 = vmul.f32 %v5142_v51, %v6341_v15 }
 0x3f2   :  { %v2007_v5 = vmul.f32 %v5144_v19, %v6343_v21 }
 0x3f3   :  { %4817 = vmatmul.mubr.msk.f32.gmra.mrb[22].mxu1 %vm7048_vm8, %v2006_v37 }
 0x3f4   :  { %v5146_v60 = vpop.eup %5145  ;;  %4819 = vmatprep.mubr.msk.f32.mxu1 %vm7049_vm11, %v2007_v5 }
 0x3f5   :  { %v2008_v25 = vmul.f32 %v5146_v60, %v6349_v54  ;;  %v4415_v60 = vld [vmem:[%s6881_s3 + $0x38] ss:$0 sm:$0xff] }
 0x3f7   :  { %4820 = vmatmul.mubr.msk.f32.gmra.mrb[24].mxu1 %vm7024_vm0, %v2008_v25 }
 0x4ae   :  { %v4800_v42 = vpop.f32.mrb[10].mxu1 }
 0x4af   :  { %v2123_v39 = vpop.f32.mrb[11].mxu1  ;;  %v2203_v36 = vsel %vm5892_vm13, %v4800_v42, 0.0  ;;  %vm7051_vm13 = vnez %v6980_v46 }
 0x4b0   :  { %v2202_v48 = vsel %vm5833_vm12, %v2123_v39, 0.0  ;;  %vm7050_vm12 = vnez %v6983_v6 }
 0x4b2   :  { %v4803_v15 = vpop.f32.mrb[12].mxu1 }
 0x4b3   :  { %v2133_v27 = vpop.f32.mrb[13].mxu1  ;;  %v2205_v7 = vsel %vm5935_vm15, %v4803_v15, 0.0  ;;  %vm7053_vm15 = vnez %v6986_v16  ;;  %v2551_v16 = vld [vmem:[%s6881_s3 + $0x90] sm:$0xff] }
 0x4b4   :  { %v2204_v52 = vsel %vm5908_vm14, %v2133_v27, 0.0  ;;  %vm7052_vm14 = vnez %v6989_v57  ;;  %4848 = vmatprep.subr.mxu0 %v2551_v16  ;;  %v1129_v27 = vadd.f32 %v4415_v60, %v5803_v26  ;;  %v7065_v26 = vld [vmem:[#allocation6_spill] sm:$0xff] }
 0x4b6   :  { %v4806_v21 = vpop.f32.mrb[14].mxu1 }
 0x4b7   :  { %v2207_v30 = vsel %vm5960_vm3, %v4806_v21, 0.0  ;;  %v2143_v54 = vpop.f32.mrb[15].mxu1  ;;  %vm7055_vm3 = vcmask 64512  }
 0x4b8   :  { %v2219_v11 = vadd.f32 %v2207_v30, %v2203_v36  ;;  %v2206_v0 = vsel %vm5946_vm2, %v2143_v54, 0.0  ;;  %vm7054_vm2 = vnez %v6993_v13  ;;  %v4470_v13 = vld [vmem:[%s6881_s3 + $0x88] ss:$0 sm:$0xff]  ;;  %vm7060_vm5 = vmmov %vm7055_vm3  ;;  %v2638_v36 = vld [vmem:[%s6881_s3 + $0xa0] sm:$0xff] }
 0x4b9   :  { %v2218_v9 = vadd.f32 %v2206_v0, %v2202_v48  ;;  %vm7061_vm10 = vmmov %vm7055_vm3  ;;  %v7064_v48 = vld [vmem:[#allocation8_spill] sm:$0xff]  ;;  %v6458_v0 = vadd.f32 %v1129_v27, %v7065_v26  ;;  %v7088_v26 = vld [vmem:[#allocation3_spill] sm:$0xff] }
 0x4ba   :  { %v4809_v20 = vpop.f32.mrb[16].mxu1  ;;  %vm7066_vm1 = vmmov %vm7055_vm3 }
 0x4bb   :  { %v2209_v59 = vsel %vm6002_vm7, %v4809_v20, 0.0  ;;  %v2153_v18 = vpop.f32.mrb[17].mxu1  ;;  %vm7057_vm7 = vmmov %vm7055_vm3 }
 0x4bc   :  { %v2221_v28 = vadd.f32 %v2209_v59, %v2205_v7  ;;  %v2208_v29 = vsel %vm5980_vm4, %v2153_v18, 0.0  ;;  %vm7056_vm4 = vnez %v6991_v31  ;;  %vm7067_vm8 = vmmov %vm7066_vm1  ;;  %v2438_v7 = vld [vmem:[%s6881_s3 + $0x120] sm:$0xff]  ;;  %v2439_v59 = vld [vmem:[%s6881_s3 + $0x128] sm:$0xff] }
 0x4bd   :  { %v2220_v62 = vadd.f32 %v2208_v29, %v2204_v52  ;;  %vm7068_vm11 = vmmov %vm7066_vm1  ;;  %v5003_v18 = vpack.c.bf16 %v2439_v59, %v2438_v7  ;;  %v2719_v52 = vld [vmem:[%s6881_s3 + $0xb0] sm:$0xff] }
 0x4be   :  { %v4812_v1 = vpop.f32.mrb[18].mxu1  ;;  %vm7070_vm0 = vmmov %vm7066_vm1 }
 0x4bf   :  { %v2211_v50 = vsel %vm6029_vm6, %v4812_v1, 0.0  ;;  %v2163_v63 = vpop.f32.mrb[19].mxu1  ;;  %vm7059_vm6 = vmmov %vm7055_vm3  ;;  %5004 = vmatprep.subr.bf16.mxu1 %v5003_v18 }
 0x4c0   :  { %v2223_v14 = vadd.f32 %v2219_v11, %v2211_v50  ;;  %v2210_v43 = vsel %vm6013_vm9, %v2163_v63, 0.0  ;;  %vm7058_vm9 = vmmov %vm7055_vm3 }
 0x4c1   :  { %v2222_v53 = vadd.f32 %v2218_v9, %v2210_v43  ;;  %v7069_v9 = vld [vmem:[#allocation7_spill] sm:$0xff] }
 0x4c2   :  { %v4815_v12 = vpop.f32.mrb[20].mxu1 }
 0x4c3   :  { %v2213_v2 = vsel %vm7050_vm12, %v4815_v12, 0.0  ;;  %v2173_v56 = vpop.f32.mrb[21].mxu1  ;;  %vm7071_vm12 = vmmov %vm7070_vm0  ;;  %v4485_v12 = vld [vmem:[%s6881_s3 + $0x98] ss:$0 sm:$0xff] }
 0x4c4   :  { %v2225_v17 = vadd.f32 %v2221_v28, %v2213_v2  ;;  %v2212_v3 = vsel %vm7051_vm13, %v2173_v56, 0.0  ;;  %vm7072_vm13 = vmmov %vm7070_vm0  ;;  %v4475_v28 = vld [vmem:[%s6881_s3 + $0x118] ss:$0 sm:$0xff] }
 0x4c5   :  { %v2224_v10 = vadd.f32 %v2220_v62, %v2212_v3  ;;  %v4488_v3 = vld [vmem:[%s6881_s3 + $0xa8] ss:$0 sm:$0xff] }
 0x4c6   :  { %v4818_v33 = vpop.f32.mrb[22].mxu1 }
 0x4c7   :  { %v2215_v44 = vsel %vm7052_vm14, %v4818_v33, 0.0  ;;  %v2183_v34 = vpop.f32.mrb[23].mxu1  ;;  %vm2445_vm14 = vcmask 130048  }
 0x4c8   :  { %v2227_v45 = vadd.f32 %v2223_v14, %v2215_v44  ;;  %v2214_v47 = vsel %vm7053_vm15, %v2183_v34, 0.0  ;;  %vm7073_vm15 = vmmov %vm7070_vm0 }
 0x4c9   :  { %v2226_v24 = vadd.f32 %v2222_v53, %v2214_v47 }
 0x4ca   :  { %v4821_v61 = vpop.f32.mrb[24].mxu1 }
 0x4cb   :  { %v2217_v6 = vsel %vm7054_vm2, %v4821_v61, 0.0  ;;  %v2193_v40 = vpop.f32.mrb[25].mxu1  ;;  %4824 = vmatprep.mubr.msk.f32.mxu1 %vm7055_vm3, %v2226_v24  ;;  %vm7075_vm3 = vmmov %vm7070_vm0 }
 0x4cc   :  { %v2229_v46 = vadd.f32 %v2225_v17, %v2217_v6  ;;  %v2216_v51 = vsel %vm7056_vm4, %v2193_v40, 0.0  ;;  %4825 = vmatmul.mubr.msk.f32.vlgmr.msra.gmra.mrb[26].mxu1 %vm7057_vm7, %v2227_v45  ;;  %vm7076_vm4 = vmmov %vm7070_vm0  ;;  %v7077_v40 = vld [vmem:[#allocation13_spill] sm:$0xff] }
 0x4cd   :  { %v2228_v57 = vadd.f32 %v2224_v10, %v2216_v51  ;;  %5006 = vmatpush3.bf16.msra.mxu1 %v5003_v18  ;;  %v7074_v10 = vld [vmem:[#allocation12_spill] sm:$0xff]  ;;  %vm7078_vm7 = vnez %v7077_v40  ;;  %v7089_v18 = vld [vmem:[#allocation2_spill] sm:$0xff] }
 0x4ce   :  { %4858 = vmatprep.subr.mxu1 %v2719_v52  ;;  %vm2802_vm2 = vcmp.eq.f32.partialorder %v5301_v22, %v7074_v10 }
 0x4cf   :  { %4827 = vmatprep.mubr.msk.f32.mxu1 %vm7058_vm9, %v2228_v57  ;;  %vm2803_vm9 = vcmp.eq.f32.partialorder %v5303_v23, %v7074_v10 }
 0x4d0   :  { %4828 = vmatmul.mubr.msk.f32.gmra.mrb[28].mxu1 %vm7059_vm6, %v2229_v46  ;;  %vm2804_vm6 = vcmp.eq.f32.partialorder %v5340_v58, %v7074_v10 }
 0x59f   :  { %v4826_v19 = vpop.f32.mrb[26].mxu1 }
 0x5a0   :  { %v2318_v37 = vadd.f32 %v4826_v19, %v4470_v13  ;;  %v2312_v31 = vpop.f32.mrb[27].mxu1  ;;  %v7083_v19 = vld [vmem:[#allocation18_spill] sm:$0xff] }
 0x5a1   :  { %v2313_v5 = vadd.f32 %v4470_v13, %v2312_v31 }
 0x5a2   :  { %v6440_v42 = vadd.f32 %v2318_v37, %v5769_v55  ;;  %v7063_v55 = vld [vmem:[#allocation10_spill] sm:$0xff] }
 0x5a3   :  { %v6437_v25 = vadd.f32 %v2313_v5, %v5766_v49  ;;  %v4829_v35 = vpop.f32.mrb[28].mxu1  ;;  %v7062_v49 = vld [vmem:[#allocation9_spill] sm:$0xff]  ;;  %v1134_v54 = vadd.f32 %v7063_v55, %v4415_v60  ;;  %v4480_v60 = vld [vmem:[%s6881_s3 + $0x130] ss:$0 sm:$0xff] }
 0x5a4   :  { %v2328_v39 = vadd.f32 %v4829_v35, %v4470_v13  ;;  %v2322_v15 = vpop.f32.mrb[29].mxu1 }
 0x5a5   :  { %v2323_v21 = vadd.f32 %v4470_v13, %v2322_v15  ;;  %4832 = vmatprep.mubr.msk.f32.mxu0 %vm7060_vm5, %v6437_v25  ;;  %v6467_v20 = vadd.f32 %v1134_v54, %v7069_v9  ;;  %vm7079_vm5 = vmmov %vm7070_vm0  ;;  %v2956_v9 = vmul.f32 0.125, %v7088_v26  ;;  %v2978_v26 = vmul.f32 2.0, %v6169_v4 }
 0x5a6   :  { %4833 = vmatmul.mubr.msk.f32.vlgmr.msra.gmra.mrb[24].mxu0 %vm7061_vm10, %v6440_v42  ;;  %v6455_v11 = vadd.f32 %v2328_v39, %v7064_v48  ;;  %vm2805_vm10 = vcmp.eq.f32.partialorder %v5319_v38, %v7074_v10 }
 0x5a7   :  { %v6451_v30 = vadd.f32 %v2323_v21, %v7062_v49  ;;  %4849 = vmatpush3.msra.mxu0 %v2551_v16 }
 0x5a8   :  { %4853 = vmatprep.subr.mxu0 %v2638_v36 }
 0x5a9   :  { %4835 = vmatprep.mubr.msk.f32.mxu0 %vm7066_vm1, %v6451_v30  ;;  %vm7080_vm1 = vmmov %vm7070_vm0 }
 0x5aa   :  { %4836 = vmatmul.mubr.msk.f32.gmra.mrb[26].mxu0 %vm7067_vm8, %v6455_v11  ;;  %vm2806_vm8 = vcmp.eq.f32.partialorder %v6139_v41, %v7074_v10 }
 0x5ab   :  { %4850 = vmatprep.mubr.msk.f32.mxu0 %vm7068_vm11, %v6458_v0  ;;  %vm7081_vm11 = vmmov %vm7070_vm0 }
 0x5ae   :  { %4851 = vmatmul.mubr.msk.f32.vlgmr.msra.gmra.mrb[28].mxu0 %vm7070_vm0, %v6467_v20  ;;  %vm2807_vm0 = vcmp.eq.f32.partialorder %v6148_v8, %v7074_v10 }
 0x5af   :  { %4854 = vmatpush3.msra.mxu0 %v2638_v36  ;;  %4855 = vmatprep.mubr.msk.f32.mxu0 %vm7071_vm12, %v6458_v0  ;;  %vm7082_vm12 = vmmov %vm7080_vm1 }
 0x5b2   :  { %4856 = vmatmul.mubr.msk.f32.vlgmr.msra.gmra.mrb[30].mxu0 %vm7072_vm13, %v6467_v20  ;;  %vm2808_vm13 = vcmp.eq.f32.partialorder %v7083_v19, %v7074_v10 }
 0x679   :  { %v4834_v29 = vpop.f32.mrb[24].mxu0 }
 0x67a   :  { %v2419_v62 = vpop.f32.mrb[25].mxu0  ;;  %v2425_v50 = vadd.f32 %v4834_v29, %v4475_v28 }
 0x67b   :  { %v2420_v1 = vadd.f32 %v4475_v28, %v2419_v62  ;;  %v7091_v62 = vld [vmem:[#allocation4_spill] sm:$0xff] }
 0x67d   :  { %v4837_v63 = vpop.f32.mrb[26].mxu0  ;;  %4842 = vmatprep.mubr.msk.f32.mxu1 %vm2445_vm14, %v2420_v1  ;;  %v2958_v1 = vmul.f32 0.125, %v7091_v62 }
 0x67e   :  { %v2429_v14 = vpop.f32.mrb[27].mxu0  ;;  %4843 = vmatmul.mubr.msk.f32.vlgmr.msra.gmra.mrb[30].mxu1 %vm2445_vm14, %v2425_v50  ;;  %v2435_v53 = vadd.f32 %v4837_v63, %v4475_v28  ;;  %v2964_v63 = vfloor.f32 %v2956_v9 }
 0x67f   :  { %v2430_v43 = vadd.f32 %v4475_v28, %v2429_v14  ;;  %4859 = vmatpush3.msra.mxu1 %v2719_v52  ;;  %v2955_v52 = vmul.f32 0.125, %v7089_v18  ;;  %v2972_v14 = vmul.f32 2.0, %v5303_v23 }
 0x681   :  { %4845 = vmatprep.mubr.msk.f32.mxu1 %vm2445_vm14, %v2430_v43  ;;  %v4852_v2 = vpop.f32.mrb[28].mxu0  ;;  %v7094_v43 = vld [vmem:[#allocation11_spill] sm:$0xff] }
 0x682   :  { %4846 = vmatmul.mubr.msk.f32.gmra.mrb[32].mxu1 %vm2445_vm14, %v2435_v53  ;;  %v2629_v56 = vpop.f32.mrb[29].mxu0  ;;  %v2635_v6 = vadd.f32 %v4852_v2, %v4485_v12  ;;  %v2987_v53 = vmul.f32 0.125, %v7094_v43  ;;  %v2963_v2 = vfloor.f32 %v2955_v52  ;;  %v2977_v52 = vmul.f32 2.0, %v7083_v19 }
 0x683   :  { %v2630_v17 = vadd.f32 %v4485_v12, %v2629_v56  ;;  %4860 = vmatprep.mubr.msk.f32.mxu1 %vm7073_vm15, %v6458_v0  ;;  %vm7084_vm15 = vmmov %vm7080_vm1  ;;  %v2971_v56 = vmul.f32 2.0, %v5301_v22 }
 0x684   :  { %v2811_v46 = vmul.f32 0.70710677, %v2635_v6  ;;  %v7096_v6 = vld [vmem:[#allocation14_spill] sm:$0xff] }
 0x685   :  { %v2810_v33 = vmul.f32 0.70710677, %v2630_v17  ;;  %v4857_v44 = vpop.f32.mrb[30].mxu0  ;;  %v2966_v17 = vfloor.f32 %v2958_v1 }
 0x686   :  { %v2716_v34 = vadd.f32 %v4857_v44, %v4488_v3  ;;  %v2710_v45 = vpop.f32.mrb[31].mxu0  ;;  %4861 = vmatmul.mubr.msk.f32.vlgmr.msra.gmra.mrb[34].mxu1 %vm7075_vm3, %v6467_v20  ;;  %v2813_v51 = vsel %vm2803_vm9, %v2811_v46, 0.0  ;;  %v2815_v16 = vsel %vm2805_vm10, %v2811_v46, 0.0  ;;  %v2817_v37 = vsel %vm2807_vm0, %v2811_v46, 0.0 }
 0x687   :  { %v2711_v47 = vadd.f32 %v4488_v3, %v2710_v45  ;;  %v2812_v24 = vsel %vm2802_vm2, %v2810_v33, 0.0  ;;  %v2814_v57 = vsel %vm2804_vm6, %v2810_v33, 0.0  ;;  %v2816_v13 = vsel %vm2806_vm8, %v2810_v33, 0.0 }
 0x688   :  { %4867 = vmatprep.mubr.msk.f32.mxu0 %vm7076_vm4, %v2812_v24  ;;  %v2818_v31 = vsel %vm2808_vm13, %v2810_v33, 0.0  ;;  %vm2809_vm3 = vcmp.eq.f32.partialorder %v6169_v4, %v7074_v10  ;;  %vm7085_vm4 = vmmov %vm7080_vm1  ;;  %v2974_v3 = vmul.f32 2.0, %v5319_v38  ;;  %v2973_v44 = vmul.f32 2.0, %v5340_v58  ;;  %v4178_v4 = vld [vmem:[%s6881_s3 + $0x148] sm:$0xff]  ;;  %v4179_v10 = vld [vmem:[%s6881_s3 + $0x150] sm:$0xff] }
 0x689   :  { %v5007_v61 = vpack.c.bf16 %v2716_v34, %v2711_v47  ;;  %v2819_v5 = vsel %vm2809_vm3, %v2811_v46, 0.0  ;;  %v7095_v34 = vld [vmem:[#allocation15_spill] sm:$0xff]  ;;  %v6601_v47 = vsub.f32 %v2964_v63, %v2972_v14  ;;  %v2988_v24 = vfloor.f32 %v2987_v53 }
 0x68a   :  { %v2960_v45 = vmul.f32 0.125, %v7095_v34  ;;  %v2959_v46 = vmul.f32 0.125, %v7096_v6  ;;  %v5037_v19 = vpack.c.bf16 %v4179_v10, %v4178_v4 }
 0x68b   :  { %5009 = vmatprep.subr.msk.bf16.mxu0 %vm7078_vm7, %v5007_v61 }
 0x68c   :  { %5012 = vmatpush3.bf16.xpose.msk.msra.mxu0 %vm7078_vm7, %v5007_v61  ;;  %v6603_v61 = vsub.f32 %v2963_v2, %v2971_v56 }
 0x693   :  { %4868 = vmatmul.mubr.msk.f32.vlgmr.msra.gmra.mrb[32].mxu0 %vm7079_vm5, %v2813_v51  ;;  %vm7086_vm5 = vmmov %vm7080_vm1  ;;  %v6606_v51 = vsub.f32 %v2966_v17, %v2974_v3 }
 0x694   :  { %4870 = vmatprep.mubr.msk.f32.mxu0 %vm7080_vm1, %v2814_v57 }
 0x697   :  { %4871 = vmatmul.mubr.msk.f32.gmra.mrb[34].mxu0 %vm7081_vm11, %v2815_v16  ;;  %vm7087_vm11 = vmmov %vm7080_vm1  ;;  %v2968_v16 = vfloor.f32 %v2960_v45 }
 0x698   :  { %4873 = vmatprep.mubr.msk.f32.mxu0 %vm7082_vm12, %v2816_v13  ;;  %vm7090_vm12 = vmmov %vm7080_vm1  ;;  %v2976_v13 = vmul.f32 2.0, %v6148_v8 }
 0x69b   :  { %4874 = vmatmul.mubr.msk.f32.gmra.mrb[36].mxu0 %vm7084_vm15, %v2817_v37  ;;  %vm7092_vm15 = vmmov %vm7080_vm1  ;;  %v7097_v37 = vld [vmem:[#allocation17_spill] sm:$0xff] }
 0x69c   :  { %4876 = vmatprep.mubr.msk.f32.mxu0 %vm7085_vm4, %v2818_v31  ;;  %vm2990_vm4 = vcmp.eq.f32.partialorder %v6601_v47, %v2988_v24  ;;  %v2962_v31 = vmul.f32 0.125, %v7097_v37 }
 0x69f   :  { %4877 = vmatmul.mubr.msk.f32.gmra.mrb[38].mxu0 %vm7086_vm5, %v2819_v5  ;;  %vm2989_vm5 = vcmp.eq.f32.partialorder %v6603_v61, %v2988_v24  ;;  %v2967_v5 = vfloor.f32 %v2959_v46 }
 0x751   :  { %v4844_v35 = vpop.f32.mrb[30].mxu1 }
 0x752   :  { %v2530_v39 = vadd.f32 %v4844_v35, %v4480_v60  ;;  %v2524_v15 = vpop.f32.mrb[31].mxu1  ;;  %v7098_v35 = vld [vmem:[#allocation16_spill] sm:$0xff] }
 0x753   :  { %v2525_v27 = vadd.f32 %v4480_v60, %v2524_v15 }
 0x754   :  { %v6557_v21 = vadd.f32 %v2530_v39, %v6440_v42  ;;  %v2961_v39 = vmul.f32 0.125, %v7098_v35 }
 0x755   :  { %v6560_v36 = vadd.f32 %v2525_v27, %v6437_v25  ;;  %v4847_v49 = vpop.f32.mrb[32].mxu1  ;;  %v4491_v25 = vld [vmem:[%s6881_s3 + $0xb8] ss:$0 sm:$0xff] }
 0x756   :  { %2548 = vst.msk [vmem:[%s6885_s5 + $0x8] sm:$0xff] %vm7080_vm1, %v6557_v21  ;;  %v2540_v55 = vadd.f32 %v4847_v49, %v4480_v60  ;;  %v2534_v54 = vpop.f32.mrb[33].mxu1  ;;  %vm2992_vm1 = vcmp.eq.f32.partialorder %v6606_v51, %v2988_v24  ;;  %v2969_v18 = vfloor.f32 %v2961_v39 }
 0x757   :  { %2547 = vst.msk [vmem:[%s6885_s5] sm:$0xff] %vm7087_vm11, %v6560_v36  ;;  %v2535_v42 = vadd.f32 %v4480_v60, %v2534_v54  ;;  %v2975_v60 = vmul.f32 2.0, %v6139_v41  ;;  %v4091_v41 = vld [vmem:[%s6881_s3 + $0x138] sm:$0xff] }
 0x758   :  { %v6576_v48 = vadd.f32 %v2540_v55, %v6455_v11  ;;  %v7093_v11 = vld [vmem:[#allocation5_spill] sm:$0xff]  ;;  %v6618_v55 = vsub.f32 %v2968_v16, %v2976_v13  ;;  %v6632_v63 = vsub.f32 %v2969_v18, %v2977_v52 }
 0x759   :  { %v6580_v7 = vadd.f32 %v2535_v42, %v6451_v30  ;;  %v4862_v59 = vpop.f32.mrb[34].mxu1  ;;  %v2957_v50 = vmul.f32 0.125, %v7093_v11 }
 0x75a   :  { %2550 = vst.msk [vmem:[%s6885_s5 + $0x18] sm:$0xff] %vm7090_vm12, %v6576_v48  ;;  %v2797_v28 = vadd.f32 %v4862_v59, %v4491_v25  ;;  %v2791_v29 = vpop.f32.mrb[35].mxu1  ;;  %v6623_v59 = vsub.f32 %v2967_v5, %v2975_v60  ;;  %vm2994_vm12 = vcmp.eq.f32.partialorder %v6618_v55, %v2988_v24 }
 0x75b   :  { %2549 = vst.msk [vmem:[%s6885_s5 + $0x10] sm:$0xff] %vm7092_vm15, %v6580_v7  ;;  %v2792_v30 = vadd.f32 %v4491_v25, %v2791_v29  ;;  %v2965_v33 = vfloor.f32 %v2957_v50  ;;  %v2970_v25 = vfloor.f32 %v2962_v31 }
 0x75c   :  { %vm2993_vm15 = vcmp.eq.f32.partialorder %v6623_v59, %v2988_v24 }
 0x75d   :  { %v5013_v12 = vpack.c.bf16 %v2797_v28, %v2792_v30  ;;  %v6608_v57 = vsub.f32 %v2965_v33, %v2973_v44  ;;  %v6628_v11 = vsub.f32 %v2970_v25, %v2978_v26 }
 0x75f   :  { %5014 = vmatprep.subr.bf16.mxu1 %v5013_v12  ;;  %vm2991_vm11 = vcmp.eq.f32.partialorder %v6608_v57, %v2988_v24 }
 0x760   :  { %5016 = vmatpush3.bf16.msra.mxu1 %v5013_v12 }
 0x766   :  { %v4869_v15 = vpop.f32.mrb[32].mxu0 }
 0x767   :  { %v2998_v27 = vsel %vm2990_vm4, %v4869_v15, -1e+30  ;;  %v2916_v49 = vpop.f32.mrb[33].mxu0  ;;  %vm2996_vm4 = vcmp.eq.f32.partialorder %v6628_v11, %v2988_v24 }
 0x768   :  { %v2997_v54 = vsel %vm2989_vm5, %v2916_v49, -1e+30  ;;  %v3008_v42 = vsel %vm2445_vm14, %v2998_v27, -inf  ;;  %vm2995_vm5 = vcmp.eq.f32.partialorder %v6632_v63, %v2988_v24 }
 0x769   :  { %3009 = vmax.xlane.f32.xlu1 %v3008_v42  ;;  %v3005_v9 = vsel %vm2445_vm14, %v2997_v54, -inf }
 0x76a   :  { %3006 = vmax.xlane.f32.xlu0 %v3005_v9  ;;  %v4872_v28 = vpop.f32.mrb[34].mxu0 }
 0x76b   :  { %v3000_v29 = vsel %vm2992_vm1, %v4872_v28, -1e+30  ;;  %v2926_v62 = vpop.f32.mrb[35].mxu0  ;;  %vm7099_vm1 = vcmask 64512  }
 0x76c   :  { %v2999_v1 = vsel %vm2991_vm11, %v2926_v62, -1e+30  ;;  %v3014_v30 = vsel %vm2445_vm14, %v3000_v29, -inf  ;;  %vm7100_vm11 = vmmov %vm7099_vm1 }
 0x76d   :  { %3015 = vmax.xlane.f32.xlu1 %v3014_v30  ;;  %v3011_v50 = vsel %vm2445_vm14, %v2999_v1, -inf }
 0x76e   :  { %3012 = vmax.xlane.f32.xlu0 %v3011_v50  ;;  %v4875_v14 = vpop.f32.mrb[36].mxu0 }
 0x76f   :  { %v3002_v43 = vsel %vm2994_vm12, %v4875_v14, -1e+30  ;;  %v2936_v53 = vpop.f32.mrb[37].mxu0  ;;  %vm7101_vm12 = vmmov %vm7099_vm1 }
 0x770   :  { %v3001_v12 = vsel %vm2993_vm15, %v2936_v53, -1e+30  ;;  %v3020_v2 = vsel %vm2445_vm14, %v3002_v43, -inf  ;;  %vm7102_vm15 = vmmov %vm7099_vm1 }
 0x771   :  { %3021 = vmax.xlane.f32.xlu1 %v3020_v2  ;;  %v3017_v56 = vsel %vm2445_vm14, %v3001_v12, -inf }
 0x772   :  { %3018 = vmax.xlane.f32.xlu0 %v3017_v56  ;;  %v4878_v17 = vpop.f32.mrb[38].mxu0 }
 0x773   :  { %v3004_v3 = vsel %vm2996_vm4, %v4878_v17, -1e+30  ;;  %v2946_v33 = vpop.f32.mrb[39].mxu0  ;;  %vm7103_vm4 = vmmov %vm7099_vm1 }
 0x774   :  { %v3003_v44 = vsel %vm2995_vm5, %v2946_v33, -1e+30  ;;  %v3026_v34 = vsel %vm2445_vm14, %v3004_v3, -inf  ;;  %vm7104_vm5 = vmmov %vm7099_vm1 }
 0x775   :  { %3027 = vmax.xlane.f32.xlu1 %v3026_v34  ;;  %v3023_v45 = vsel %vm2445_vm14, %v3003_v44, -inf }
 0x776   :  { %3024 = vmax.xlane.f32.xlu0 %v3023_v45 }
 0x7f6   :  { %v3010_v6 = vpop.xlane.xlu1 %3009 }
 0x7f7   :  { %v3030_v46 = vsub.f32 %v2998_v27, %v3010_v6  ;;  %v3007_v16 = vpop.xlane.xlu0 %3006 }
 0x7f8   :  { %v3029_v13 = vsub.f32 %v2997_v54, %v3007_v16 }
 0x7f9   :  { %v3039_v37 = vmul.f32 1.442695, %v3030_v46 }
 0x7fa   :  { %v3037_v31 = vmul.f32 1.442695, %v3029_v13  ;;  %v3016_v5 = vpop.xlane.xlu1 %3015 }
 0x7fb   :  { %5147 = vpow2.f32 %v3039_v37  ;;  %v3032_v24 = vsub.f32 %v3000_v29, %v3016_v5  ;;  %v3013_v60 = vpop.xlane.xlu0 %3012 }
 0x7fc   :  { %5149 = vpow2.f32 %v3037_v31  ;;  %v3031_v35 = vsub.f32 %v2999_v1, %v3013_v60 }
 0x7fd   :  { %v3043_v39 = vmul.f32 1.442695, %v3032_v24 }
 0x7fe   :  { %v3041_v15 = vmul.f32 1.442695, %v3031_v35  ;;  %v3022_v49 = vpop.xlane.xlu1 %3021 }
 0x7ff   :  { %5151 = vpow2.f32 %v3043_v39  ;;  %v3034_v42 = vsub.f32 %v3002_v43, %v3022_v49  ;;  %v3019_v25 = vpop.xlane.xlu0 %3018 }
 0x800   :  { %5153 = vpow2.f32 %v3041_v15  ;;  %v3033_v26 = vsub.f32 %v3001_v12, %v3019_v25 }
 0x801   :  { %v3047_v9 = vmul.f32 1.442695, %v3034_v42 }
 0x802   :  { %v3045_v27 = vmul.f32 1.442695, %v3033_v26  ;;  %v3028_v18 = vpop.xlane.xlu1 %3027 }
 0x803   :  { %5155 = vpow2.f32 %v3047_v9  ;;  %v3036_v54 = vsub.f32 %v3004_v3, %v3028_v18  ;;  %v3025_v52 = vpop.xlane.xlu0 %3024 }
 0x804   :  { %5157 = vpow2.f32 %v3045_v27  ;;  %v3035_v28 = vsub.f32 %v3003_v44, %v3025_v52 }
 0x805   :  { %v5148_v29 = vpop.eup %5147  ;;  %v3051_v62 = vmul.f32 1.442695, %v3036_v54 }
 0x806   :  { %v5150_v30 = vpop.eup %5149  ;;  %v3049_v1 = vmul.f32 1.442695, %v3035_v28  ;;  %v3056_v50 = vsel %vm2445_vm14, %v5148_v29, 0.0 }
 0x807   :  { %5159 = vpow2.f32 %v3051_v62  ;;  %3057 = vadd.xlane.f32.xlu1 %v3056_v50  ;;  %v3053_v14 = vsel %vm2445_vm14, %v5150_v30, 0.0  ;;  %v3410_v50 = vld [vmem:[%s6881_s3 + $0xe0] sm:$0xff] }
 0x808   :  { %5161 = vpow2.f32 %v3049_v1  ;;  %3054 = vadd.xlane.f32.xlu0 %v3053_v14  ;;  %v2800_v1 = vld [vmem:[%s6881_s3 + $0xc0] sm:$0xff]  ;;  %v3323_v14 = vld [vmem:[%s6881_s3 + $0xd0] sm:$0xff] }
 0x809   :  { %v5152_v43 = vpop.eup %5151  ;;  %4895 = vmatprep.subr.mxu1 %v2800_v1  ;;  %4900 = vmatprep.subr.mxu0 %v3323_v14 }
 0x80a   :  { %v5154_v53 = vpop.eup %5153  ;;  %v3062_v12 = vsel %vm2445_vm14, %v5152_v43, 0.0  ;;  %4901 = vmatpush3.msra.mxu0 %v3323_v14 }
 0x80b   :  { %3063 = vadd.xlane.f32.xlu1 %v3062_v12  ;;  %v3059_v2 = vsel %vm2445_vm14, %v5154_v53, 0.0 }
 0x80c   :  { %3060 = vadd.xlane.f32.xlu0 %v3059_v2 }
 0x80d   :  { %v5156_v56 = vpop.eup %5155 }
 0x80e   :  { %v5158_v17 = vpop.eup %5157  ;;  %v3068_v3 = vsel %vm2445_vm14, %v5156_v56, 0.0 }
 0x80f   :  { %3069 = vadd.xlane.f32.xlu1 %v3068_v3  ;;  %v3065_v33 = vsel %vm2445_vm14, %v5158_v17, 0.0 }
 0x810   :  { %3066 = vadd.xlane.f32.xlu0 %v3065_v33 }
 0x811   :  { %v5160_v44 = vpop.eup %5159 }
 0x812   :  { %v5162_v34 = vpop.eup %5161  ;;  %v3074_v45 = vsel %vm2445_vm14, %v5160_v44, 0.0 }
 0x813   :  { %3075 = vadd.xlane.f32.xlu1 %v3074_v45  ;;  %v3071_v6 = vsel %vm2445_vm14, %v5162_v34, 0.0 }
 0x814   :  { %3072 = vadd.xlane.f32.xlu0 %v3071_v6 }
 0x894   :  { %v3058_v46 = vpop.xlane.xlu1 %3057 }
 0x895   :  { %5163 = vrcp.f32 %v3058_v46  ;;  %v3055_v16 = vpop.xlane.xlu0 %3054 }
 0x896   :  { %5165 = vrcp.f32 %v3055_v16 }
 0x898   :  { %v3064_v13 = vpop.xlane.xlu1 %3063 }
 0x899   :  { %5167 = vrcp.f32 %v3064_v13  ;;  %v3061_v37 = vpop.xlane.xlu0 %3060 }
 0x89a   :  { %5169 = vrcp.f32 %v3061_v37 }
 0x89c   :  { %v3070_v31 = vpop.xlane.xlu1 %3069 }
 0x89d   :  { %5171 = vrcp.f32 %v3070_v31  ;;  %v3067_v5 = vpop.xlane.xlu0 %3066 }
 0x89e   :  { %5173 = vrcp.f32 %v3067_v5 }
 0x89f   :  { %v5164_v24 = vpop.eup %5163 }
 0x8a0   :  { %v5166_v60 = vpop.eup %5165  ;;  %v3076_v35 = vpop.xlane.xlu1 %3075  ;;  %v3086_v49 = vmul.f32 %v5164_v24, %v5148_v29 }
 0x8a1   :  { %5175 = vrcp.f32 %v3076_v35  ;;  %v3073_v39 = vpop.xlane.xlu0 %3072  ;;  %v3085_v15 = vmul.f32 %v5166_v60, %v5150_v30 }
 0x8a2   :  { %5177 = vrcp.f32 %v3073_v39 }
 0x8a3   :  { %v5168_v42 = vpop.eup %5167  ;;  %4883 = vmatprep.mubr.msk.f32.mxu1 %vm2445_vm14, %v3085_v15  ;;  %v3513_v15 = vld [vmem:[%s6881_s3 + $0xf0] sm:$0xff] }
 0x8a4   :  { %v5170_v25 = vpop.eup %5169  ;;  %4884 = vmatmul.mubr.msk.f32.vlgmr.msra.gmra.mrb[36].mxu1 %vm2445_vm14, %v3086_v49  ;;  %v3088_v9 = vmul.f32 %v5168_v42, %v5152_v43  ;;  %4913 = vmatprep.subr.mxu0 %v3513_v15  ;;  %v4512_v49 = vld [vmem:[%s6881_s3 + $0xc8] ss:$0 sm:$0xff] }
 0x8a5   :  { %v3087_v26 = vmul.f32 %v5170_v25, %v5154_v53  ;;  %4896 = vmatpush3.msra.mxu1 %v2800_v1 }
 0x8a6   :  { %4905 = vmatprep.subr.mxu1 %v3410_v50 }
 0x8a7   :  { %v5172_v27 = vpop.eup %5171  ;;  %4886 = vmatprep.mubr.msk.f32.mxu1 %vm2445_vm14, %v3087_v26 }
 0x8a8   :  { %v5174_v18 = vpop.eup %5173  ;;  %4887 = vmatmul.mubr.msk.f32.gmra.mrb[38].mxu1 %vm2445_vm14, %v3088_v9  ;;  %v3090_v52 = vmul.f32 %v5172_v27, %v5156_v56  ;;  %v4518_v27 = vld [vmem:[%s6881_s3 + $0xe8] ss:$0 sm:$0xff] }
 0x8a9   :  { %v3089_v54 = vmul.f32 %v5174_v18, %v5158_v17 }
 0x8ab   :  { %v5176_v28 = vpop.eup %5175  ;;  %4889 = vmatprep.mubr.msk.f32.mxu1 %vm2445_vm14, %v3089_v54 }
 0x8ac   :  { %v5178_v29 = vpop.eup %5177  ;;  %4890 = vmatmul.mubr.msk.f32.gmra.mrb[40].mxu1 %vm2445_vm14, %v3090_v52  ;;  %v3092_v30 = vmul.f32 %v5176_v28, %v5160_v44 }
 0x8ad   :  { %v3091_v62 = vmul.f32 %v5178_v29, %v5162_v34 }
 0x8af   :  { %4892 = vmatprep.mubr.msk.f32.mxu1 %vm2445_vm14, %v3091_v62 }
 0x8b0   :  { %4893 = vmatmul.mubr.msk.f32.gmra.mrb[42].mxu1 %vm2445_vm14, %v3092_v30 }
 0x977   :  { %v4885_v43 = vpop.f32.mrb[36].mxu1 }
 0x978   :  { %v3183_v53 = vpop.f32.mrb[37].mxu1  ;;  %v3223_v2 = vsel %vm2803_vm9, %v4885_v43, 0.0 }
 0x979   :  { %v3222_v3 = vsel %vm2802_vm2, %v3183_v53, 0.0 }
 0x97b   :  { %v4888_v12 = vpop.f32.mrb[38].mxu1 }
 0x97c   :  { %v3225_v56 = vsel %vm2805_vm10, %v4888_v12, 0.0  ;;  %v3193_v17 = vpop.f32.mrb[39].mxu1 }
 0x97d   :  { %v3231_v33 = vadd.f32 %v3225_v56, %v3223_v2  ;;  %v3224_v44 = vsel %vm2804_vm6, %v3193_v17, 0.0 }
 0x97e   :  { %v3230_v34 = vadd.f32 %v3224_v44, %v3222_v3 }
 0x97f   :  { %v4891_v45 = vpop.f32.mrb[40].mxu1 }
 0x980   :  { %v3227_v6 = vsel %vm2807_vm0, %v4891_v45, 0.0  ;;  %v3203_v46 = vpop.f32.mrb[41].mxu1 }
 0x981   :  { %v3233_v16 = vadd.f32 %v3231_v33, %v3227_v6  ;;  %v3226_v13 = vsel %vm2806_vm8, %v3203_v46, 0.0 }
 0x982   :  { %v3232_v37 = vadd.f32 %v3230_v34, %v3226_v13 }
 0x983   :  { %v4894_v31 = vpop.f32.mrb[42].mxu1 }
 0x984   :  { %v3229_v5 = vsel %vm2809_vm3, %v4894_v31, 0.0  ;;  %v3213_v24 = vpop.f32.mrb[43].mxu1 }
 0x985   :  { %v3235_v60 = vadd.f32 %v3233_v16, %v3229_v5  ;;  %v3228_v35 = vsel %vm2808_vm13, %v3213_v24, 0.0 }
 0x986   :  { %v3234_v39 = vadd.f32 %v3232_v37, %v3228_v35 }
 0x988   :  { %4897 = vmatprep.mubr.msk.f32.mxu1 %vm7099_vm1, %v3234_v39 }
 0x989   :  { %4898 = vmatmul.mubr.msk.f32.vlgmr.msra.gmra.mrb[44].mxu1 %vm7100_vm11, %v3235_v60  ;;  %vm7105_vm11 = vmmov %vm7099_vm1 }
 0x98a   :  { %4907 = vmatprep.mubr.msk.f32.mxu1 %vm7101_vm12, %v6560_v36  ;;  %4906 = vmatpush3.msra.mxu1 %v3410_v50  ;;  %vm7106_vm12 = vmmov %vm7099_vm1 }
 0x98d   :  { %4908 = vmatmul.mubr.msk.f32.vlgmr.msra.gmra.mrb[46].mxu1 %vm7102_vm15, %v6557_v21  ;;  %vm7107_vm15 = vmmov %vm7099_vm1 }
 0x98e   :  { %4910 = vmatprep.mubr.msk.f32.mxu1 %vm7103_vm4, %v6580_v7  ;;  %vm7108_vm4 = vmmov %vm7099_vm1 }
 0x991   :  { %4911 = vmatmul.mubr.msk.f32.gmra.mrb[48].mxu1 %vm7104_vm5, %v6576_v48  ;;  %vm7109_vm5 = vmmov %vm7099_vm1 }
 0xa5c   :  { %v4899_v42 = vpop.f32.mrb[44].mxu1 }
 0xa5d   :  { %v3318_v25 = vadd.f32 %v4899_v42, %v4512_v49  ;;  %v3312_v26 = vpop.f32.mrb[45].mxu1 }
 0xa5e   :  { %v3313_v9 = vadd.f32 %v4512_v49, %v3312_v26 }
 0xa5f   :  { %v6712_v52 = vadd.f32 %v3318_v25, %v6467_v20 }
 0xa60   :  { %v6709_v18 = vadd.f32 %v3313_v9, %v6458_v0  ;;  %v4909_v54 = vpop.f32.mrb[46].mxu1 }
 0xa61   :  { %v3500_v28 = vadd.f32 %v4909_v54, %v4518_v27  ;;  %v3494_v29 = vpop.f32.mrb[47].mxu1 }
 0xa62   :  { %v3495_v62 = vadd.f32 %v4518_v27, %v3494_v29  ;;  %4902 = vmatprep.mubr.msk.f32.mxu0 %vm7099_vm1, %v6709_v18 }
 0xa63   :  { %4903 = vmatmul.mubr.msk.f32.vlgmr.msra.gmra.mrb[40].mxu0 %vm7105_vm11, %v6712_v52  ;;  %vm7111_vm11 = vmmov %vm7099_vm1 }
 0xa64   :  { %v5017_v30 = vpack.c.bf16 %v3500_v28, %v3495_v62  ;;  %v4912_v1 = vpop.f32.mrb[48].mxu1  ;;  %4915 = vmatprep.mubr.msk.f32.mxu0 %vm7106_vm12, %v6560_v36  ;;  %4914 = vmatpush3.msra.mxu0 %v3513_v15  ;;  %vm7112_vm12 = vmmov %vm7099_vm1 }
 0xa65   :  { %v3510_v0 = vadd.f32 %v4912_v1, %v4518_v27  ;;  %v3504_v50 = vpop.f32.mrb[49].mxu1 }
 0xa66   :  { %v3505_v14 = vadd.f32 %v4518_v27, %v3504_v50  ;;  %5019 = vmatprep.subr.msk.bf16.mxu1 %vm7078_vm7, %v5017_v30 }
 0xa67   :  { %4916 = vmatmul.mubr.msk.f32.vlgmr.msra.gmra.mrb[42].mxu0 %vm7107_vm15, %v6557_v21  ;;  %5022 = vmatpush3.bf16.xpose.msk.msra.mxu1 %vm7078_vm7, %v5017_v30  ;;  %v4515_v21 = vld [vmem:[%s6881_s3 + $0xd8] ss:$0 sm:$0xff]  ;;  %vm7113_vm15 = vmmov %vm7099_vm1 }
 0xa68   :  { %v5023_v20 = vpack.c.bf16 %v3510_v0, %v3505_v14  ;;  %4918 = vmatprep.mubr.msk.f32.mxu0 %vm7108_vm4, %v6580_v7  ;;  %v4523_v7 = vld [vmem:[%s6881_s3 + $0xf8] ss:$0 sm:$0xff]  ;;  %vm7114_vm4 = vmmov %vm7099_vm1 }
 0xa6a   :  { %5025 = vmatprep.subr.msk.bf16.mxu1 %vm7078_vm7, %v5023_v20 }
 0xa6b   :  { %4919 = vmatmul.mubr.msk.f32.gmra.mrb[44].mxu0 %vm7109_vm5, %v6576_v48  ;;  %vm7115_vm5 = vmmov %vm7099_vm1 }
 0xa6f   :  { %5028 = vmatpush3.bf16.xpose.msk.msra.mxu1 %vm7078_vm7, %v5023_v20  ;;  %vm7110_vm7 = vmmov %vm7099_vm1 }
 0xa70   :  { %5038 = vmatprep.subr.bf16.mxu1 %v5037_v19 }
 0xb36   :  { %v4904_v36 = vpop.f32.mrb[40].mxu0 }
 0xb37   :  { %v3407_v43 = vadd.f32 %v4904_v36, %v4515_v21  ;;  %v3401_v53 = vpop.f32.mrb[41].mxu0 }
 0xb38   :  { %v3402_v12 = vadd.f32 %v4515_v21, %v3401_v53 }
 0xb39   :  { %v3607_v2 = vmul.f32 0.70710677, %v3407_v43 }
 0xb3a   :  { %v3606_v56 = vmul.f32 0.70710677, %v3402_v12  ;;  %v4917_v17 = vpop.f32.mrb[42].mxu0 }
 0xb3b   :  { %v3591_v3 = vadd.f32 %v4917_v17, %v4523_v7  ;;  %v3585_v48 = vpop.f32.mrb[43].mxu0  ;;  %v3609_v44 = vsel %vm2803_vm9, %v3607_v2, 0.0  ;;  %v3611_v37 = vsel %vm2805_vm10, %v3607_v2, 0.0  ;;  %v3613_v24 = vsel %vm2807_vm0, %v3607_v2, 0.0 }
 0xb3c   :  { %v3586_v33 = vadd.f32 %v4523_v7, %v3585_v48  ;;  %v3608_v40 = vsel %vm2802_vm2, %v3606_v56, 0.0  ;;  %v3610_v6 = vsel %vm2804_vm6, %v3606_v56, 0.0  ;;  %v3612_v5 = vsel %vm2806_vm8, %v3606_v56, 0.0 }
 0xb3d   :  { %4929 = vmatprep.mubr.msk.f32.mxu1 %vm7110_vm7, %v3608_v40  ;;  %v3614_v60 = vsel %vm2808_vm13, %v3606_v56, 0.0  ;;  %v3615_v35 = vsel %vm2809_vm3, %v3607_v2, 0.0  ;;  %vm7116_vm7 = vmmov %vm7099_vm1 }
 0xb3e   :  { %v5029_v34 = vpack.c.bf16 %v3591_v3, %v3586_v33  ;;  %v4920_v45 = vpop.f32.mrb[44].mxu0  ;;  %4930 = vmatmul.mubr.msk.f32.vlgmr.msra.gmra.mrb[50].mxu1 %vm7099_vm1, %v3609_v44  ;;  %vm3758_vm1 = vcmp.eq.f32.partialorder %v6601_v47, %v6130_v32 }
 0xb3f   :  { %v3601_v46 = vadd.f32 %v4920_v45, %v4523_v7  ;;  %v3595_v16 = vpop.f32.mrb[45].mxu0  ;;  %4932 = vmatprep.mubr.msk.f32.mxu1 %vm7111_vm11, %v3610_v6  ;;  %vm3757_vm11 = vcmp.eq.f32.partialorder %v6603_v61, %v6130_v32  ;;  %5040 = vmatpush3.bf16.msra.mxu1 %v5037_v19 }
 0xb40   :  { %v3596_v13 = vadd.f32 %v4523_v7, %v3595_v16  ;;  %5030 = vmatprep.subr.bf16.mxu0 %v5029_v34 }
 0xb41   :  { %5032 = vmatpush3.bf16.msra.mxu0 %v5029_v34 }
 0xb42   :  { %v5033_v31 = vpack.c.bf16 %v3601_v46, %v3596_v13  ;;  %4933 = vmatmul.mubr.msk.f32.gmra.mrb[52].mxu1 %vm7112_vm12, %v3611_v37  ;;  %vm7117_vm12 = vcmask 261120  }
 0xb43   :  { %4935 = vmatprep.mubr.msk.f32.mxu1 %vm7113_vm15, %v3612_v5  ;;  %vm3760_vm15 = vcmp.eq.f32.partialorder %v6606_v51, %v6130_v32 }
 0xb44   :  { %5034 = vmatprep.subr.bf16.mxu0 %v5033_v31 }
 0xb45   :  { %5036 = vmatpush3.bf16.msra.mxu0 %v5033_v31 }
 0xb46   :  { %4936 = vmatmul.mubr.msk.f32.gmra.mrb[54].mxu1 %vm7114_vm4, %v3613_v24  ;;  %vm7118_vm4 = vmmov %vm7117_vm12 }
 0xb47   :  { %4938 = vmatprep.mubr.msk.f32.mxu1 %vm7115_vm5, %v3614_v60  ;;  %vm3759_vm5 = vcmp.eq.f32.partialorder %v6608_v57, %v6130_v32 }
 0xb4a   :  { %4939 = vmatmul.mubr.msk.f32.gmra.mrb[56].mxu1 %vm7116_vm7, %v3615_v35  ;;  %vm7119_vm7 = vmmov %vm7118_vm4 }
 0xc11   :  { %v4931_v39 = vpop.f32.mrb[50].mxu1 }
 0xc12   :  { %v3766_v15 = vsel %vm3758_vm1, %v4931_v39, -1e+30  ;;  %v3718_v49 = vpop.f32.mrb[51].mxu1  ;;  %vm3762_vm1 = vcmp.eq.f32.partialorder %v6618_v55, %v6130_v32 }
 0xc13   :  { %v3765_v42 = vsel %vm3757_vm11, %v3718_v49, -1e+30  ;;  %v3776_v25 = vsel %vm7117_vm12, %v3766_v15, -inf  ;;  %vm7120_vm11 = vmmov %vm7118_vm4  ;;  %vm3761_vm12 = vcmp.eq.f32.partialorder %v6623_v59, %v6130_v32 }
 0xc14   :  { %3777 = vmax.xlane.f32.xlu1 %v3776_v25  ;;  %v3773_v26 = vsel %vm7118_vm4, %v3765_v42, -inf }
 0xc15   :  { %3774 = vmax.xlane.f32.xlu0 %v3773_v26  ;;  %v4934_v47 = vpop.f32.mrb[52].mxu1 }
 0xc16   :  { %v3768_v9 = vsel %vm3760_vm15, %v4934_v47, -1e+30  ;;  %v3728_v27 = vpop.f32.mrb[53].mxu1  ;;  %vm3764_vm15 = vcmp.eq.f32.partialorder %v6628_v11, %v6130_v32 }
 0xc17   :  { %v3767_v61 = vsel %vm3759_vm5, %v3728_v27, -1e+30  ;;  %v3782_v54 = vsel %vm7119_vm7, %v3768_v9, -inf  ;;  %vm7121_vm5 = vmmov %vm7118_vm4  ;;  %vm3763_vm7 = vcmp.eq.f32.partialorder %v6632_v63, %v6130_v32 }
 0xc18   :  { %3783 = vmax.xlane.f32.xlu1 %v3782_v54  ;;  %v3779_v28 = vsel %vm7120_vm11, %v3767_v61, -inf  ;;  %vm7122_vm11 = vmmov %vm7118_vm4 }
 0xc19   :  { %3780 = vmax.xlane.f32.xlu0 %v3779_v28  ;;  %v4937_v51 = vpop.f32.mrb[54].mxu1 }
 0xc1a   :  { %v3770_v29 = vsel %vm3762_vm1, %v4937_v51, -1e+30  ;;  %v3738_v57 = vpop.f32.mrb[55].mxu1  ;;  %vm7123_vm1 = vmmov %vm7118_vm4 }
 0xc1b   :  { %v3769_v62 = vsel %vm3761_vm12, %v3738_v57, -1e+30  ;;  %v3788_v30 = vsel %vm7118_vm4, %v3770_v29, -inf  ;;  %vm7124_vm12 = vmmov %vm7123_vm1 }
 0xc1c   :  { %3789 = vmax.xlane.f32.xlu1 %v3788_v30  ;;  %v3785_v1 = vsel %vm7121_vm5, %v3769_v62, -inf  ;;  %vm7125_vm4 = vmmov %vm7123_vm1 }
 0xc1d   :  { %3786 = vmax.xlane.f32.xlu0 %v3785_v1  ;;  %v4940_v55 = vpop.f32.mrb[56].mxu1  ;;  %vm7127_vm5 = vmmov %vm7123_vm1 }
 0xc1e   :  { %v3772_v0 = vsel %vm3764_vm15, %v4940_v55, -1e+30  ;;  %v3748_v59 = vpop.f32.mrb[57].mxu1  ;;  %vm7126_vm15 = vmmov %vm7123_vm1 }
 0xc1f   :  { %v3771_v50 = vsel %vm3763_vm7, %v3748_v59, -1e+30  ;;  %v3794_v14 = vsel %vm7122_vm11, %v3772_v0, -inf  ;;  %vm7128_vm7 = vmmov %vm7123_vm1 }
 0xc20   :  { %3795 = vmax.xlane.f32.xlu1 %v3794_v14  ;;  %v3791_v20 = vsel %vm7123_vm1, %v3771_v50, -inf  ;;  %vm7129_vm11 = vmmov %vm7123_vm1 }
 0xc21   :  { %3792 = vmax.xlane.f32.xlu0 %v3791_v20 }
 0xca1   :  { %v3778_v21 = vpop.xlane.xlu1 %3777 }
 0xca2   :  { %v3798_v36 = vsub.f32 %v3766_v15, %v3778_v21  ;;  %v3775_v11 = vpop.xlane.xlu0 %3774 }
 0xca3   :  { %v3797_v43 = vsub.f32 %v3765_v42, %v3775_v11 }
 0xca4   :  { %v3807_v53 = vmul.f32 1.442695, %v3798_v36 }
 0xca5   :  { %v3805_v12 = vmul.f32 1.442695, %v3797_v43  ;;  %v3784_v7 = vpop.xlane.xlu1 %3783 }
 0xca6   :  { %5179 = vpow2.f32 %v3807_v53  ;;  %v3800_v32 = vsub.f32 %v3768_v9, %v3784_v7  ;;  %v3781_v63 = vpop.xlane.xlu0 %3780 }
 0xca7   :  { %5181 = vpow2.f32 %v3805_v12  ;;  %v3799_v2 = vsub.f32 %v3767_v61, %v3781_v63 }
 0xca8   :  { %v3811_v56 = vmul.f32 1.442695, %v3800_v32 }
 0xca9   :  { %v3809_v17 = vmul.f32 1.442695, %v3799_v2  ;;  %v3790_v3 = vpop.xlane.xlu1 %3789 }
 0xcaa   :  { %5183 = vpow2.f32 %v3811_v56  ;;  %v3802_v48 = vsub.f32 %v3770_v29, %v3790_v3  ;;  %v3787_v33 = vpop.xlane.xlu0 %3786 }
 0xcab   :  { %5185 = vpow2.f32 %v3809_v17  ;;  %v3801_v40 = vsub.f32 %v3769_v62, %v3787_v33  ;;  %v3604_v17 = vld [vmem:[%s6881_s3 + $0x100] sm:$0xff] }
 0xcac   :  { %v3815_v44 = vmul.f32 1.442695, %v3802_v48  ;;  %4961 = vmatprep.subr.mxu0 %v3604_v17 }
 0xcad   :  { %v3813_v34 = vmul.f32 1.442695, %v3801_v40  ;;  %v3796_v45 = vpop.xlane.xlu1 %3795 }
 0xcae   :  { %5187 = vpow2.f32 %v3815_v44  ;;  %v3804_v6 = vsub.f32 %v3772_v0, %v3796_v45  ;;  %v3793_v46 = vpop.xlane.xlu0 %3792 }
 0xcaf   :  { %5189 = vpow2.f32 %v3813_v34  ;;  %v3803_v16 = vsub.f32 %v3771_v50, %v3793_v46 }
 0xcb0   :  { %v5180_v13 = vpop.eup %5179  ;;  %v3819_v37 = vmul.f32 1.442695, %v3804_v6 }
 0xcb1   :  { %v5182_v31 = vpop.eup %5181  ;;  %v3817_v5 = vmul.f32 1.442695, %v3803_v16  ;;  %v3824_v24 = vsel %vm7124_vm12, %v5180_v13, 0.0  ;;  %vm7130_vm12 = vmmov %vm7123_vm1 }
 0xcb2   :  { %5191 = vpow2.f32 %v3819_v37  ;;  %3825 = vadd.xlane.f32.xlu1 %v3824_v24  ;;  %v3821_v60 = vsel %vm7125_vm4, %v5182_v31, 0.0  ;;  %vm7131_vm4 = vmmov %vm7123_vm1 }
 0xcb3   :  { %5193 = vpow2.f32 %v3817_v5  ;;  %3822 = vadd.xlane.f32.xlu0 %v3821_v60 }
 0xcb4   :  { %v5184_v35 = vpop.eup %5183 }
 0xcb5   :  { %v5186_v39 = vpop.eup %5185  ;;  %v3830_v15 = vsel %vm7126_vm15, %v5184_v35, 0.0  ;;  %vm7132_vm15 = vmmov %vm7123_vm1 }
 0xcb6   :  { %3831 = vadd.xlane.f32.xlu1 %v3830_v15  ;;  %v3827_v49 = vsel %vm7127_vm5, %v5186_v39, 0.0  ;;  %vm7133_vm5 = vmmov %vm7123_vm1 }
 0xcb7   :  { %3828 = vadd.xlane.f32.xlu0 %v3827_v49 }
 0xcb8   :  { %v5188_v42 = vpop.eup %5187 }
 0xcb9   :  { %v5190_v25 = vpop.eup %5189  ;;  %v3836_v26 = vsel %vm7128_vm7, %v5188_v42, 0.0  ;;  %vm7134_vm7 = vmmov %vm7123_vm1 }
 0xcba   :  { %3837 = vadd.xlane.f32.xlu1 %v3836_v26  ;;  %v3833_v47 = vsel %vm7129_vm11, %v5190_v25, 0.0  ;;  %vm7135_vm11 = vmmov %vm7123_vm1 }
 0xcbb   :  { %3834 = vadd.xlane.f32.xlu0 %v3833_v47 }
 0xcbc   :  { %v5192_v9 = vpop.eup %5191 }
 0xcbd   :  { %v5194_v27 = vpop.eup %5193  ;;  %v3842_v61 = vsel %vm7123_vm1, %v5192_v9, 0.0 }
 0xcbe   :  { %3843 = vadd.xlane.f32.xlu1 %v3842_v61  ;;  %v3839_v54 = vsel %vm7130_vm12, %v5194_v27, 0.0  ;;  %vm7136_vm12 = vmmov %vm7123_vm1 }
 0xcbf   :  { %3840 = vadd.xlane.f32.xlu0 %v3839_v54 }
 0xd3f   :  { %v3826_v28 = vpop.xlane.xlu1 %3825 }
 0xd40   :  { %5195 = vrcp.f32 %v3826_v28  ;;  %v3823_v51 = vpop.xlane.xlu0 %3822 }
 0xd41   :  { %5197 = vrcp.f32 %v3823_v51 }
 0xd43   :  { %v3832_v29 = vpop.xlane.xlu1 %3831 }
 0xd44   :  { %5199 = vrcp.f32 %v3832_v29  ;;  %v3829_v57 = vpop.xlane.xlu0 %3828 }
 0xd45   :  { %5201 = vrcp.f32 %v3829_v57 }
 0xd47   :  { %v3838_v62 = vpop.xlane.xlu1 %3837 }
 0xd48   :  { %5203 = vrcp.f32 %v3838_v62  ;;  %v3835_v30 = vpop.xlane.xlu0 %3834 }
 0xd49   :  { %5205 = vrcp.f32 %v3835_v30 }
 0xd4a   :  { %v5196_v1 = vpop.eup %5195 }
 0xd4b   :  { %v5198_v55 = vpop.eup %5197  ;;  %v3844_v0 = vpop.xlane.xlu1 %3843  ;;  %v3854_v14 = vmul.f32 %v5196_v1, %v5180_v13 }
 0xd4c   :  { %5207 = vrcp.f32 %v3844_v0  ;;  %v3841_v59 = vpop.xlane.xlu0 %3840  ;;  %v3853_v50 = vmul.f32 %v5198_v55, %v5182_v31  ;;  %v4557_v55 = vld [vmem:[%s6881_s3 + $0x48] ss:$0 sm:$0xff] }
 0xd4d   :  { %5209 = vrcp.f32 %v3841_v59 }
 0xd4e   :  { %v5200_v20 = vpop.eup %5199  ;;  %4949 = vmatprep.mubr.msk.f32.mxu0 %vm7131_vm4, %v3853_v50  ;;  %vm7137_vm4 = vmmov %vm7123_vm1 }
 0xd4f   :  { %v5202_v21 = vpop.eup %5201  ;;  %4950 = vmatmul.mubr.msk.f32.vlgmr.msra.gmra.mrb[46].mxu0 %vm7132_vm15, %v3854_v14  ;;  %v3856_v11 = vmul.f32 %v5200_v20, %v5184_v35 }
 0xd50   :  { %v3855_v36 = vmul.f32 %v5202_v21, %v5186_v39  ;;  %4962 = vmatpush3.msra.mxu0 %v3604_v17  ;;  %v4548_v39 = vld [vmem:[%s6881_s3 + $0x108] ss:$0 sm:$0xff] }
 0xd51   :  { %4966 = vmatprep.subr.mxu0 %v4091_v41 }
 0xd52   :  { %v5204_v43 = vpop.eup %5203  ;;  %4952 = vmatprep.mubr.msk.f32.mxu0 %vm7133_vm5, %v3855_v36 }
 0xd53   :  { %v5206_v53 = vpop.eup %5205  ;;  %4953 = vmatmul.mubr.msk.f32.gmra.mrb[48].mxu0 %vm7134_vm7, %v3856_v11  ;;  %v3858_v7 = vmul.f32 %v5204_v43, %v5188_v42 }
 0xd54   :  { %v3857_v12 = vmul.f32 %v5206_v53, %v5190_v25 }
 0xd56   :  { %v5208_v32 = vpop.eup %5207  ;;  %4955 = vmatprep.mubr.msk.f32.mxu0 %vm7135_vm11, %v3857_v12 }
 0xd57   :  { %v5210_v63 = vpop.eup %5209  ;;  %4956 = vmatmul.mubr.msk.f32.gmra.mrb[50].mxu0 %vm7123_vm1, %v3858_v7  ;;  %v3860_v56 = vmul.f32 %v5208_v32, %v5192_v9  ;;  %v4551_v9 = vld [vmem:[%s6881_s3 + $0x140] ss:$0 sm:$0xff] }
 0xd58   :  { %v3859_v2 = vmul.f32 %v5210_v63, %v5194_v27 }
 0xd5a   :  { %4958 = vmatprep.mubr.msk.f32.mxu0 %vm7136_vm12, %v3859_v2 }
 0xd5b   :  { %4959 = vmatmul.mubr.msk.f32.gmra.mrb[52].mxu0 %vm7137_vm4, %v3860_v56 }
 0xe22   :  { %v4951_v3 = vpop.f32.mrb[46].mxu0 }
 0xe23   :  { %v3951_v48 = vpop.f32.mrb[47].mxu0  ;;  %v3991_v40 = vsel %vm2803_vm9, %v4951_v3, 0.0 }
 0xe24   :  { %v3990_v45 = vsel %vm2802_vm2, %v3951_v48, 0.0  ;;  %vm7138_vm2 = vcmask 64512  }
 0xe25   :  { %vm7139_vm9 = vmmov %vm7138_vm2 }
 0xe26   :  { %v4954_v33 = vpop.f32.mrb[48].mxu0 }
 0xe27   :  { %v3993_v44 = vsel %vm2805_vm10, %v4954_v33, 0.0  ;;  %v3961_v34 = vpop.f32.mrb[49].mxu0  ;;  %vm7141_vm10 = vmmov %vm7138_vm2 }
 0xe28   :  { %v3999_v6 = vadd.f32 %v3993_v44, %v3991_v40  ;;  %v3992_v46 = vsel %vm2804_vm6, %v3961_v34, 0.0  ;;  %vm7140_vm6 = vmmov %vm7138_vm2 }
 0xe29   :  { %v3998_v16 = vadd.f32 %v3992_v46, %v3990_v45 }
 0xe2a   :  { %v4957_v13 = vpop.f32.mrb[50].mxu0 }
 0xe2b   :  { %v3995_v23 = vsel %vm2807_vm0, %v4957_v13, 0.0  ;;  %v3971_v37 = vpop.f32.mrb[51].mxu0  ;;  %vm7143_vm0 = vmmov %vm7138_vm2 }
 0xe2c   :  { %v4001_v31 = vadd.f32 %v3999_v6, %v3995_v23  ;;  %v3994_v38 = vsel %vm2806_vm8, %v3971_v37, 0.0  ;;  %vm7142_vm8 = vmmov %vm7138_vm2 }
 0xe2d   :  { %v4000_v5 = vadd.f32 %v3998_v16, %v3994_v38 }
 0xe2e   :  { %v4960_v22 = vpop.f32.mrb[52].mxu0 }
 0xe2f   :  { %v3997_v24 = vsel %vm2809_vm3, %v4960_v22, 0.0  ;;  %v3981_v58 = vpop.f32.mrb[53].mxu0 }
 0xe30   :  { %v4003_v60 = vadd.f32 %v4001_v31, %v3997_v24  ;;  %v3996_v35 = vsel %vm2808_vm13, %v3981_v58, 0.0 }
 0xe31   :  { %v4002_v8 = vadd.f32 %v4000_v5, %v3996_v35 }
 0xe33   :  { %4963 = vmatprep.mubr.msk.f32.mxu0 %vm7138_vm2, %v4002_v8 }
 0xe34   :  { %4964 = vmatmul.mubr.msk.f32.vlgmr.msra.gmra.mrb[54].mxu0 %vm7139_vm9, %v4003_v60 }
 0xe35   :  { %4967 = vmatpush3.msra.mxu0 %v4091_v41 }
 0xf07   :  { %v4965_v15 = vpop.f32.mrb[54].mxu0 }
 0xf08   :  { %v4086_v49 = vadd.f32 %v4965_v15, %v4548_v39  ;;  %v4080_v42 = vpop.f32.mrb[55].mxu0 }
 0xf09   :  { %v4081_v25 = vadd.f32 %v4548_v39, %v4080_v42 }
 0xf0a   :  { %v4090_v47 = vadd.f32 %v4086_v49, %v6712_v52  ;;  %v4554_v52 = vld [vmem:[%s6881_s3 + $0x158] ss:$0 sm:$0xff] }
 0xf0b   :  { %v4089_v26 = vadd.f32 %v4081_v25, %v6709_v18  ;;  %v4268_v18 = vld [vmem:[%s6881_s3 + $0x40] sm:$0xff] }
 0xf0c   :  { %4978 = vmatprep.subr.mxu0 %v4268_v18 }
 0xf0d   :  { %4968 = vmatprep.mubr.msk.f32.mxu0 %vm7140_vm6, %v4089_v26 }
 0xf0e   :  { %4969 = vmatmul.mubr.msk.f32.vlgmr.msra.gmra.mrb[56].mxu0 %vm7141_vm10, %v4090_v47 }
 0xf0f   :  { %4979 = vmatpush3.msra.mxu0 %v4268_v18 }
 0xfe1   :  { %v4970_v27 = vpop.f32.mrb[56].mxu0 }
 0xfe2   :  { %v4169_v61 = vpop.f32.mrb[57].mxu0  ;;  %v4175_v28 = vadd.f32 %v4970_v27, %v4551_v9 }
 0xfe3   :  { %v4170_v54 = vadd.f32 %v4551_v9, %v4169_v61 }
 0xfe5   :  { %4975 = vmatprep.mubr.msk.f32.mxu1 %vm2445_vm14, %v4170_v54 }
 0xfe6   :  { %4976 = vmatmul.mubr.msk.f32.vlgmr.msra.gmra.mrb[58].mxu1 %vm2445_vm14, %v4175_v28  ;;  %vm7144_vm14 = vcmask 31744  }
 0xfe7   :  { %vm7145_vm13 = vmmov %vm7144_vm14 }
0x10b9   :  { %v4977_v51 = vpop.f32.mrb[58].mxu1 }
0x10ba   :  { %v4263_v29 = vadd.f32 %v4977_v51, %v4554_v52  ;;  %v4257_v57 = vpop.f32.mrb[59].mxu1 }
0x10bb   :  { %v4258_v62 = vadd.f32 %v4554_v52, %v4257_v57 }
0x10bc   :  { %v4267_v1 = vadd.f32 %v4263_v29, %v4090_v47 }
0x10bd   :  { %v4266_v30 = vadd.f32 %v4258_v62, %v4089_v26 }
0x10bf   :  { %4980 = vmatprep.mubr.msk.f32.mxu0 %vm7142_vm8, %v4266_v30 }
0x10c0   :  { %4981 = vmatmul.mubr.msk.f32.vlgmr.msra.gmra.mrb[58].mxu0 %vm7143_vm0, %v4267_v1 }
0x1193   :  { %v4982_v0 = vpop.f32.mrb[58].mxu0 }
0x1194   :  { %v4352_v59 = vadd.f32 %v4982_v0, %v4557_v55  ;;  %v4346_v50 = vpop.f32.mrb[59].mxu0 }
0x1195   :  { %v4347_v14 = vadd.f32 %v4557_v55, %v4346_v50 }
0x1196   :  { %v4356_v20 = vsub.f32 0.0, %v4352_v59 }
0x1197   :  { %v4355_v21 = vsub.f32 0.0, %v4347_v14 }
0x1198   :  { %v4359_v36 = vmul.f32 1.442695, %v4356_v20 }
0x1199   :  { %v4357_v11 = vmul.f32 1.442695, %v4355_v21 }
0x119a   :  { %5211 = vpow2.f32 %v4359_v36 }
0x119b   :  { %5213 = vpow2.f32 %v4357_v11 }
0x11a4   :  { %v5212_v43 = vpop.eup %5211 }
0x11a5   :  { %v5214_v53 = vpop.eup %5213  ;;  %v4362_v12 = vadd.f32 1.0, %v5212_v43 }
0x11a6   :  { %v4361_v7 = vadd.f32 1.0, %v5214_v53 }
0x11a7   :  { %5215 = vrcp.f32 %v4362_v12 }
0x11a8   :  { %5217 = vrcp.f32 %v4361_v7 }
0x11b1   :  { %v5216_v32 = vpop.eup %5215 }
0x11b2   :  { %v5218_v63 = vpop.eup %5217  ;;  %4368 = vst.msk [vmem:[%s6886_s4 + $0x8] sm:$0xff] %vm7144_vm14, %v5216_v32 }
0x11b3   :  { %4367 = vst.msk [vmem:[%s6886_s4] sm:$0xff] %vm7145_vm13, %v5218_v63 }

</bundles_post_ra>
